<compile_context>
chip_gen: v7x
topology: tpu7x:2x2x1
jax: 0.10.0
libtpu: 0.0.40
codegen_flags: <defaults>
</compile_context>

<pallas_src>
import jax
import jax.numpy as jnp
from jax.experimental import pallas as pl
from jax.experimental.pallas import tpu as pltpu

BN_EPS = 1e-3


def _round_up(x, m):
    return (x + m - 1) // m * m


def _cdiv(a, b):
    return -(-a // b)


# ----------------------------- Pallas kernels -----------------------------

def _gemm_bias_relu_kernel(a_ref, w_ref, b_ref, o_ref):
    """Fused 1x1-conv GEMM: (tm, K) x (K, Npad) with the whole weight resident in VMEM.

    BN scale is pre-folded into the weight columns, so the epilogue is bias + ReLU only.
    """
    acc = jnp.dot(a_ref[...], w_ref[...], preferred_element_type=jnp.float32)
    o_ref[...] = jnp.maximum(acc + b_ref[...], 0.0).astype(o_ref.dtype)


def _make_conv_taps_kernel(length, tap_starts):
    """Direct 3x3 conv: one MXU dot per kernel tap on a row-flattened VMEM image.

      x_ref: (1, flat_len, Cin_eff) bf16   (whole padded image of one batch element)
      w_ref: (T, Cin_eff, Cout)     bf16   (BN scale folded in)
      b_ref: (1, Cout)              f32
      o_ref: (1, length, Cout)      bf16   ("wide" rows; invalid columns sliced off outside)
    """
    def kernel(x_ref, w_ref, b_ref, o_ref):
        s0 = tap_starts[0]
        acc = jnp.dot(x_ref[0, s0:s0 + length, :], w_ref[0],
                      preferred_element_type=jnp.float32)
        for t in range(1, len(tap_starts)):
            s = tap_starts[t]
            acc = acc + jnp.dot(x_ref[0, s:s + length, :], w_ref[t],
                                preferred_element_type=jnp.float32)
        o_ref[0] = jnp.maximum(acc + b_ref[...], 0.0).astype(o_ref.dtype)
    return kernel


def _make_maxpool_kernel(ho, wo):
    """MaxPool2d(3, stride=2) over one batch element held entirely in VMEM.

      x_ref:   (1, H, W, C)    o_ref: (1, Ho, Wo, C)    row_ref: (W, C) scratch
    Only contiguous static slices + elementwise maxima (no strided loads, no HBM views).
    """
    def kernel(x_ref, o_ref, row_ref):
        for r in range(ho):
            row_ref[...] = jnp.maximum(
                jnp.maximum(x_ref[0, 2 * r], x_ref[0, 2 * r + 1]),
                x_ref[0, 2 * r + 2])
            for cw in range(wo):
                o_ref[0, r, cw:cw + 1, :] = jnp.maximum(
                    jnp.maximum(row_ref[2 * cw:2 * cw + 1, :],
                                row_ref[2 * cw + 1:2 * cw + 2, :]),
                    row_ref[2 * cw + 2:2 * cw + 3, :])
    return kernel


# ----------------------------- layer wrappers ------------------------------

def _gemm_bias_relu(a_bf16, w_f32, bias_f32):
    """(M, K) bf16 x (K, Cout) GEMM + bias + ReLU, weight resident in VMEM, bf16 output."""
    m, k = a_bf16.shape
    _, n_out = w_f32.shape
    n_pad = _round_up(n_out, 128)

    num_m = _cdiv(m, 512)
    tm = _round_up(_cdiv(m, num_m), 8)
    m_pad = tm * num_m

    a_p = jnp.pad(a_bf16, ((0, m_pad - m), (0, 0)))
    w_p = jnp.pad(w_f32.astype(jnp.bfloat16), ((0, 0), (0, n_pad - n_out)))
    b_p = jnp.pad(bias_f32.astype(jnp.float32).reshape(1, -1),
                  ((0, 0), (0, n_pad - n_out)))

    out = pl.pallas_call(
        _gemm_bias_relu_kernel,
        out_shape=jax.ShapeDtypeStruct((m_pad, n_pad), jnp.bfloat16),
        grid_spec=pltpu.PrefetchScalarGridSpec(
            num_scalar_prefetch=0,
            grid=(num_m,),
            in_specs=[
                pl.BlockSpec((tm, k), lambda i: (i, 0)),
                pl.BlockSpec((k, n_pad), lambda i: (0, 0)),   # resident weight
                pl.BlockSpec((1, n_pad), lambda i: (0, 0)),   # resident bias
            ],
            out_specs=pl.BlockSpec((tm, n_pad), lambda i: (i, 0)),
        ),
        compiler_params=pltpu.CompilerParams(
            dimension_semantics=("parallel",)),
    )(a_p, w_p, b_p)
    return out[:m, :n_out]


def fused_pointwise_conv(x_nhwc_bf16, params_list):
    """Several 1x1 Conv+BN+ReLU blocks sharing the same input, fused into one GEMM."""
    n, h, w, cin = x_nhwc_bf16.shape
    w_cols, biases = [], []
    for (wt, gamma, beta, mean, var) in params_list:
        inv_std = gamma / jnp.sqrt(var + BN_EPS)
        w_cols.append(wt[:, :, 0, 0].T * inv_std[None, :])   # (Cin, Cout_i), scale folded
        biases.append(beta - mean * inv_std)
    w_all = jnp.concatenate(w_cols, axis=1)
    b_all = jnp.concatenate(biases, axis=0)
    ctot = w_all.shape[1]

    a = x_nhwc_bf16.reshape(n * h * w, cin)
    out = _gemm_bias_relu(a, w_all, b_all)
    return out.reshape(n, h, w, ctot)


def conv3x3_bn_relu(x_nhwc_bf16, params, stride, padding):
    """ConBlock with a 3x3 conv as a direct Pallas convolution (no im2col in HBM)."""
    wt, gamma, beta, mean, var = params
    cout, cin = wt.shape[0], wt.shape[1]

    inv_std = gamma / jnp.sqrt(var + BN_EPS)
    bias = (beta - mean * inv_std).astype(jnp.float32).reshape(1, -1)
    # (Cout, Cin, 3, 3) -> (3, 3, Cin, Cout), BN scale folded in (f32, cast bf16 later).
    w_taps = jnp.transpose(wt * inv_std[:, None, None, None], (2, 3, 1, 0))

    x = x_nhwc_bf16
    if padding:
        x = jnp.pad(x, ((0, 0), (padding, padding), (padding, padding), (0, 0)))
    n, h, w, _ = x.shape

    if stride == 1:
        ho, wo = h - 2, w - 2
        wide_w = w
        flat_len = h * w
        cin_eff = cin
        tap_starts = [ki * w + kj for ki in range(3) for kj in range(3)]
        w_mat = w_taps.reshape(9, cin, cout).astype(jnp.bfloat16)
        x_flat = x.reshape(n, flat_len, cin)
    else:  # stride == 2, valid padding
        ho = (h - 3) // 2 + 1
        wo = (w - 3) // 2 + 1
        if w % 2:  # pad one zero column so the (W,C)->(W/2,2C) merge is exact
            x = jnp.pad(x, ((0, 0), (0, 0), (0, 1), (0, 0)))
            w += 1
        wm = w // 2
        wide_w = 2 * wm
        flat_len = h * wm
        cin_eff = 2 * cin
        tap_starts = [ki * wm + kj for ki in range(3) for kj in range(2)]
        zeros = jnp.zeros((cin, cout), w_taps.dtype)
        mats = []
        for ki in range(3):
            mats.append(jnp.concatenate([w_taps[ki, 0], w_taps[ki, 1]], axis=0))
            mats.append(jnp.concatenate([w_taps[ki, 2], zeros], axis=0))
        w_mat = jnp.stack(mats, axis=0).astype(jnp.bfloat16)   # (6, 2*Cin, Cout)
        # Column stride 2 becomes channel selection after this free, contiguous reshape.
        x_flat = x.reshape(n, flat_len, cin_eff)

    length = ho * wide_w
    pad_tail = max(0, tap_starts[-1] + length - flat_len)
    if pad_tail:
        x_flat = jnp.pad(x_flat, ((0, 0), (0, pad_tail), (0, 0)))
    flat_in = x_flat.shape[1]

    kernel = _make_conv_taps_kernel(length, tap_starts)
    out_wide = pl.pallas_call(
        kernel,
        out_shape=jax.ShapeDtypeStruct((n, length, cout), jnp.bfloat16),
        grid_spec=pltpu.PrefetchScalarGridSpec(
            num_scalar_prefetch=0,
            grid=(n,),
            in_specs=[
                pl.BlockSpec((1, flat_in, cin_eff), lambda b: (b, 0, 0)),
                pl.BlockSpec(w_mat.shape, lambda b: (0, 0, 0)),
                pl.BlockSpec((1, cout), lambda b: (0, 0)),
            ],
            out_specs=pl.BlockSpec((1, length, cout), lambda b: (b, 0, 0)),
        ),
        compiler_params=pltpu.CompilerParams(
            dimension_semantics=("parallel",)),
    )(x_flat, w_mat, bias)

    # Drop the "wide" columns computed past the valid output width.
    return out_wide.reshape(n, ho, wide_w, cout)[:, :, :wo, :]


def max_pool_3x3_s2(x_nhwc):
    """nn.MaxPool2d(kernel_size=3, stride=2), no padding, NHWC in/out (f32)."""
    n, h, w, c = x_nhwc.shape
    ho = (h - 3) // 2 + 1
    wo = (w - 3) // 2 + 1
    kernel = _make_maxpool_kernel(ho, wo)
    return pl.pallas_call(
        kernel,
        out_shape=jax.ShapeDtypeStruct((n, ho, wo, c), x_nhwc.dtype),
        grid_spec=pltpu.PrefetchScalarGridSpec(
            num_scalar_prefetch=0,
            grid=(n,),
            in_specs=[pl.BlockSpec((1, h, w, c), lambda b: (b, 0, 0, 0))],
            out_specs=pl.BlockSpec((1, ho, wo, c), lambda b: (b, 0, 0, 0)),
            scratch_shapes=[pltpu.VMEM((w, c), x_nhwc.dtype)],
        ),
        compiler_params=pltpu.CompilerParams(
            dimension_semantics=("parallel",)),
    )(x_nhwc)


# ------------------------------- module ------------------------------------

def inception_d(x_nchw, params):
    """Forward pass of InceptionD; x: NCHW f32, returns NCHW f32 (concat on channel dim)."""
    x = jnp.transpose(x_nchw, (0, 2, 3, 1))           # -> NHWC
    x_bf16 = x.astype(jnp.bfloat16)

    # Fused 1x1 stage: branch_1[0] + branch_2[0] read the input once, in one GEMM.
    c1 = params["b1_0"][0].shape[0]
    fused = fused_pointwise_conv(x_bf16, [params["b1_0"], params["b2_0"]])
    b1 = fused[..., :c1]
    b2 = fused[..., c1:]

    # branch 1: 1x1 s1 -> 3x3 s2
    b1 = conv3x3_bn_relu(b1, params["b1_1"], stride=2, padding=0)

    # branch 2: 1x1 s1 -> 3x3 s1 pad1 -> 3x3 s2
    b2 = conv3x3_bn_relu(b2, params["b2_1"], stride=1, padding=1)
    b2 = conv3x3_bn_relu(b2, params["b2_2"], stride=2, padding=0)

    # branch 3: MaxPool2d(3, 2) on the original (f32) activation
    b3 = max_pool_3x3_s2(x)

    out = jnp.concatenate(
        [b1.astype(jnp.float32), b2.astype(jnp.float32), b3], axis=-1)
    return jnp.transpose(out, (0, 3, 1, 2))            # -> NCHW


# --------------------- deterministic parameter init ------------------------

def make_conblock_params(key, cin, cout, kh, kw):
    k1, k2, k3, k4, k5 = jax.random.split(key, 5)
    w = 0.1 * jax.random.normal(k1, (cout, cin, kh, kw), jnp.float32)
    gamma = 1.0 + 0.1 * jax.random.normal(k2, (cout,), jnp.float32)
    beta = 0.1 * jax.random.normal(k3, (cout,), jnp.float32)
    mean = 0.1 * jax.random.normal(k4, (cout,), jnp.float32)
    var = 1.0 + 0.1 * jnp.abs(jax.random.normal(k5, (cout,), jnp.float32))
    return (w, gamma, beta, mean, var)


# ------------------------- plain-JAX reference ------------------------------

def _ref_conblock(x_nchw, params, stride, padding):
    w, gamma, beta, mean, var = params
    y = jax.lax.conv_general_dilated(
        x_nchw, w, window_strides=(stride, stride),
        padding=[(padding, padding), (padding, padding)],
        dimension_numbers=("NCHW", "OIHW", "NCHW"))
    scale = gamma / jnp.sqrt(var + BN_EPS)
    bias = beta - mean * scale
    y = y * scale[None, :, None, None] + bias[None, :, None, None]
    return jnp.maximum(y, 0.0)


def _ref_inception_d(x_nchw, params):
    b1 = _ref_conblock(x_nchw, params["b1_0"], 1, 0)
    b1 = _ref_conblock(b1, params["b1_1"], 2, 0)
    b2 = _ref_conblock(x_nchw, params["b2_0"], 1, 0)
    b2 = _ref_conblock(b2, params["b2_1"], 1, 1)
    b2 = _ref_conblock(b2, params["b2_2"], 2, 0)
    b3 = jax.lax.reduce_window(
        x_nchw, -jnp.inf, jax.lax.max,
        window_dimensions=(1, 1, 3, 3), window_strides=(1, 1, 2, 2),
        padding="VALID")
    return jnp.concatenate([b1, b2, b3], axis=1)


# ------------------------------- main ---------------------------------------

if __name__ == "__main__":
    # Module hyper-parameters (small, synthetic)
    in_channel, in_branch_1, out_branch_1, in_branch_2, out_branch_2 = 4, 8, 8, 8, 8

    key = jax.random.PRNGKey(0)
    kx, k1, k2, k3, k4, k5 = jax.random.split(key, 6)

    x = jax.random.normal(kx, (2, in_channel, 16, 16), jnp.float32)  # NCHW

    params = {
        "b1_0": make_conblock_params(k1, in_channel, in_branch_1, 1, 1),
        "b1_1": make_conblock_params(k2, in_branch_1, out_branch_1, 3, 3),
        "b2_0": make_conblock_params(k3, in_channel, in_branch_2, 1, 1),
        "b2_1": make_conblock_params(k4, in_branch_2, out_branch_2, 3, 3),
        "b2_2": make_conblock_params(k5, out_branch_2, out_branch_2, 3, 3),
    }

    fwd = jax.jit(inception_d)
    out = jax.block_until_ready(fwd(x, params))

    expected_channels = out_branch_1 + out_branch_2 + in_channel  # torch.cat dim=1
    assert out.shape == (2, expected_channels, 7, 7), out.shape

    ref = jax.block_until_ready(_ref_inception_d(x, params))
    max_err = float(jnp.max(jnp.abs(out - ref)))
    # Tolerance relaxed vs. a pure-f32 check: GEMM inputs are bf16 (f32 accumulation),
    # BN scale is folded into the bf16 weights, and inter-layer activations are stored
    # as bf16 -> ~1e-2-level rounding across the chained conv layers.
    assert jnp.allclose(out, ref, atol=3e-2, rtol=3e-2), f"max abs err = {max_err}"

    print("KERNEL_OK")
</pallas_src>

<mosaic_0001>
module attributes {stable_mosaic.version = 11 : i64} {
  func.func @_gemm_bias_relu_kernel(%arg0: i32, %arg1: memref<512x4xbf16, #tpu.memory_space<vmem>>, %arg2: memref<4x128xbf16, #tpu.memory_space<vmem>>, %arg3: memref<1x128xf32, #tpu.memory_space<vmem>>, %arg4: memref<512x128xbf16, #tpu.memory_space<vmem>>) attributes {dimension_semantics = [#tpu.dimension_semantics<parallel>], iteration_bounds = array<i64: 1>, scalar_prefetch = 0 : i64, scratch_operands = 0 : i64, tpu.core_type = #tpu.core_type<tc>, window_params = [{transform_indices = @transform_0, window_bounds = array<i64: 512, 4>}, {pipeline_mode = #tpu.pipeline_mode<synchronous>, transform_indices = @transform_1, window_bounds = array<i64: 4, 128>}, {pipeline_mode = #tpu.pipeline_mode<synchronous>, transform_indices = @transform_2, window_bounds = array<i64: 1, 128>}, {transform_indices = @transform_3, window_bounds = array<i64: 512, 128>}]} {
    %c0 = arith.constant 0 : index
    %c0_0 = arith.constant 0 : index
    %0 = vector.load %arg1[%c0, %c0_0] : memref<512x4xbf16, #tpu.memory_space<vmem>>, vector<512x4xbf16>
    %c0_1 = arith.constant 0 : index
    %c0_2 = arith.constant 0 : index
    %1 = vector.load %arg2[%c0_1, %c0_2] : memref<4x128xbf16, #tpu.memory_space<vmem>>, vector<4x128xbf16>
    %cst = arith.constant dense<0.000000e+00> : vector<512x128xf32>
    %2 = tpu.matmul %0, %1, %cst {dimension_numbers = #tpu.dot_dimension_numbers<[1], [0], [0], [1], [0, 0, 1, 1], [], []>} : vector<512x4xbf16>, vector<4x128xbf16>, vector<512x128xf32> -> vector<512x128xf32>
    %c0_3 = arith.constant 0 : index
    %c0_4 = arith.constant 0 : index
    %3 = vector.load %arg3[%c0_3, %c0_4] : memref<1x128xf32, #tpu.memory_space<vmem>>, vector<1x128xf32>
    %4 = vector.broadcast %3 : vector<1x128xf32> to vector<512x128xf32>
    %5 = arith.addf %2, %4 : vector<512x128xf32>
    %cst_5 = arith.constant 0.000000e+00 : f32
    %6 = vector.broadcast %cst_5 : f32 to vector<512x128xf32>
    %7 = arith.maximumf %5, %6 : vector<512x128xf32>
    %8 = arith.truncf %7 : vector<512x128xf32> to vector<512x128xbf16>
    %c0_6 = arith.constant 0 : index
    %c0_7 = arith.constant 0 : index
    %9 = vector.load %arg4[%c0_6, %c0_7] : memref<512x128xbf16, #tpu.memory_space<vmem>>, vector<512x128xbf16>
    tpu.vector_store %arg4[%c0_6, %c0_7], %8 {strides = array<i32>} : memref<512x128xbf16, #tpu.memory_space<vmem>>, vector<512x128xbf16>,
    return
  }
  func.func @transform_0(%arg0: i32) -> (i32, i32) {
    %c0_i32 = arith.constant 0 : i32
    %c0_i32_0 = arith.constant 0 : i32
    return %arg0, %c0_i32 : i32, i32
  }
  func.func @transform_1(%arg0: i32) -> (i32, i32) {
    %c0_i32 = arith.constant 0 : i32
    %c0_i32_0 = arith.constant 0 : i32
    %c0_i32_1 = arith.constant 0 : i32
    return %c0_i32, %c0_i32_0 : i32, i32
  }
  func.func @transform_2(%arg0: i32) -> (i32, i32) {
    %c0_i32 = arith.constant 0 : i32
    %c0_i32_0 = arith.constant 0 : i32
    %c0_i32_1 = arith.constant 0 : i32
    return %c0_i32, %c0_i32_0 : i32, i32
  }
  func.func @transform_3(%arg0: i32) -> (i32, i32) {
    %c0_i32 = arith.constant 0 : i32
    %c0_i32_0 = arith.constant 0 : i32
    return %arg0, %c0_i32 : i32, i32
  }
}

module attributes {stable_mosaic.version = 11 : i64} {
  func.func @kernel(%arg0: i32, %arg1: memref<1x16x16x4xf32, #tpu.memory_space<vmem>>, %arg2: memref<1x7x7x4xf32, #tpu.memory_space<vmem>>, %arg3: memref<16x4xf32, #tpu.memory_space<vmem>>) attributes {dimension_semantics = [#tpu.dimension_semantics<parallel>], iteration_bounds = array<i64: 2>, scalar_prefetch = 0 : i64, scratch_operands = 1 : i64, tpu.core_type = #tpu.core_type<tc>, window_params = [{transform_indices = @transform_0, window_bounds = array<i64: 1, 16, 16, 4>}, {transform_indices = @transform_1, window_bounds = array<i64: 1, 7, 7, 4>}]} {
    %c0 = arith.constant 0 : index
    %c0_0 = arith.constant 0 : index
    %c0_1 = arith.constant 0 : index
    %c0_2 = arith.constant 0 : index
    %0 = vector.load %arg1[%c0, %c0_0, %c0_1, %c0_2] : memref<1x16x16x4xf32, #tpu.memory_space<vmem>>, vector<1x1x16x4xf32>
    %1 = vector.shape_cast %0 : vector<1x1x16x4xf32> to vector<16x4xf32>
    %c0_3 = arith.constant 0 : index
    %c1 = arith.constant 1 : index
    %c0_4 = arith.constant 0 : index
    %c0_5 = arith.constant 0 : index
    %2 = vector.load %arg1[%c0_3, %c1, %c0_4, %c0_5] : memref<1x16x16x4xf32, #tpu.memory_space<vmem>>, vector<1x1x16x4xf32>
    %3 = vector.shape_cast %2 : vector<1x1x16x4xf32> to vector<16x4xf32>
    %4 = arith.maximumf %1, %3 : vector<16x4xf32>
    %c0_6 = arith.constant 0 : index
    %c2 = arith.constant 2 : index
    %c0_7 = arith.constant 0 : index
    %c0_8 = arith.constant 0 : index
    %5 = vector.load %arg1[%c0_6, %c2, %c0_7, %c0_8] : memref<1x16x16x4xf32, #tpu.memory_space<vmem>>, vector<1x1x16x4xf32>
    %6 = vector.shape_cast %5 : vector<1x1x16x4xf32> to vector<16x4xf32>
    %7 = arith.maximumf %4, %6 : vector<16x4xf32>
    %c0_9 = arith.constant 0 : index
    %c0_10 = arith.constant 0 : index
    %8 = vector.load %arg3[%c0_9, %c0_10] : memref<16x4xf32, #tpu.memory_space<vmem>>, vector<16x4xf32>
    tpu.vector_store %arg3[%c0_9, %c0_10], %7 {strides = array<i32>} : memref<16x4xf32, #tpu.memory_space<vmem>>, vector<16x4xf32>,
    %c0_11 = arith.constant 0 : index
    %c0_12 = arith.constant 0 : index
    %9 = vector.load %arg3[%c0_11, %c0_12] : memref<16x4xf32, #tpu.memory_space<vmem>>, vector<1x4xf32>
    %c1_13 = arith.constant 1 : index
    %c0_14 = arith.constant 0 : index
    %10 = vector.load %arg3[%c1_13, %c0_14] : memref<16x4xf32, #tpu.memory_space<vmem>>, vector<1x4xf32>
    %11 = arith.maximumf %9, %10 : vector<1x4xf32>
    %c2_15 = arith.constant 2 : index
    %c0_16 = arith.constant 0 : index
    %12 = vector.load %arg3[%c2_15, %c0_16] : memref<16x4xf32, #tpu.memory_space<vmem>>, vector<1x4xf32>
    %13 = arith.maximumf %11, %12 : vector<1x4xf32>
    %c0_17 = arith.constant 0 : index
    %c0_18 = arith.constant 0 : index
    %c0_19 = arith.constant 0 : index
    %c0_20 = arith.constant 0 : index
    %14 = vector.load %arg2[%c0_17, %c0_18, %c0_19, %c0_20] : memref<1x7x7x4xf32, #tpu.memory_space<vmem>>, vector<1x1x1x4xf32>
    %15 = vector.shape_cast %14 : vector<1x1x1x4xf32> to vector<1x4xf32>
    %16 = vector.shape_cast %13 : vector<1x4xf32> to vector<1x1x1x4xf32>
    tpu.vector_store %arg2[%c0_17, %c0_18, %c0_19, %c0_20], %16 {strides = array<i32>} : memref<1x7x7x4xf32, #tpu.memory_space<vmem>>, vector<1x1x1x4xf32>,
    %c2_21 = arith.constant 2 : index
    %c0_22 = arith.constant 0 : index
    %17 = vector.load %arg3[%c2_21, %c0_22] : memref<16x4xf32, #tpu.memory_space<vmem>>, vector<1x4xf32>
    %c3 = arith.constant 3 : index
    %c0_23 = arith.constant 0 : index
    %18 = vector.load %arg3[%c3, %c0_23] : memref<16x4xf32, #tpu.memory_space<vmem>>, vector<1x4xf32>
    %19 = arith.maximumf %17, %18 : vector<1x4xf32>
    %c4 = arith.constant 4 : index
    %c0_24 = arith.constant 0 : index
    %20 = vector.load %arg3[%c4, %c0_24] : memref<16x4xf32, #tpu.memory_space<vmem>>, vector<1x4xf32>
    %21 = arith.maximumf %19, %20 : vector<1x4xf32>
    %c0_25 = arith.constant 0 : index
    %c0_26 = arith.constant 0 : index
    %c1_27 = arith.constant 1 : index
    %c0_28 = arith.constant 0 : index
    %22 = vector.load %arg2[%c0_25, %c0_26, %c1_27, %c0_28] : memref<1x7x7x4xf32, #tpu.memory_space<vmem>>, vector<1x1x1x4xf32>
    %23 = vector.shape_cast %22 : vector<1x1x1x4xf32> to vector<1x4xf32>
    %24 = vector.shape_cast %21 : vector<1x4xf32> to vector<1x1x1x4xf32>
    tpu.vector_store %arg2[%c0_25, %c0_26, %c1_27, %c0_28], %24 {strides = array<i32>} : memref<1x7x7x4xf32, #tpu.memory_space<vmem>>, vector<1x1x1x4xf32>,
    %c4_29 = arith.constant 4 : index
    %c0_30 = arith.constant 0 : index
    %25 = vector.load %arg3[%c4_29, %c0_30] : memref<16x4xf32, #tpu.memory_space<vmem>>, vector<1x4xf32>
    %c5 = arith.constant 5 : index
    %c0_31 = arith.constant 0 : index
    %26 = vector.load %arg3[%c5, %c0_31] : memref<16x4xf32, #tpu.memory_space<vmem>>, vector<1x4xf32>
    %27 = arith.maximumf %25, %26 : vector<1x4xf32>
    %c6 = arith.constant 6 : index
    %c0_32 = arith.constant 0 : index
    %28 = vector.load %arg3[%c6, %c0_32] : memref<16x4xf32, #tpu.memory_space<vmem>>, vector<1x4xf32>
    %29 = arith.maximumf %27, %28 : vector<1x4xf32>
    %c0_33 = arith.constant 0 : index
    %c0_34 = arith.constant 0 : index
    %c2_35 = arith.constant 2 : index
    %c0_36 = arith.constant 0 : index
    %30 = vector.load %arg2[%c0_33, %c0_34, %c2_35, %c0_36] : memref<1x7x7x4xf32, #tpu.memory_space<vmem>>, vector<1x1x1x4xf32>
    %31 = vector.shape_cast %30 : vector<1x1x1x4xf32> to vector<1x4xf32>
    %32 = vector.shape_cast %29 : vector<1x4xf32> to vector<1x1x1x4xf32>
    tpu.vector_store %arg2[%c0_33, %c0_34, %c2_35, %c0_36], %32 {strides = array<i32>} : memref<1x7x7x4xf32, #tpu.memory_space<vmem>>, vector<1x1x1x4xf32>,
    %c6_37 = arith.constant 6 : index
    %c0_38 = arith.constant 0 : index
    %33 = vector.load %arg3[%c6_37, %c0_38] : memref<16x4xf32, #tpu.memory_space<vmem>>, vector<1x4xf32>
    %c7 = arith.constant 7 : index
    %c0_39 = arith.constant 0 : index
    %34 = vector.load %arg3[%c7, %c0_39] : memref<16x4xf32, #tpu.memory_space<vmem>>, vector<1x4xf32>
    %35 = arith.maximumf %33, %34 : vector<1x4xf32>
    %c8 = arith.constant 8 : index
    %c0_40 = arith.constant 0 : index
    %36 = vector.load %arg3[%c8, %c0_40] : memref<16x4xf32, #tpu.memory_space<vmem>>, vector<1x4xf32>
    %37 = arith.maximumf %35, %36 : vector<1x4xf32>
    %c0_41 = arith.constant 0 : index
    %c0_42 = arith.constant 0 : index
    %c3_43 = arith.constant 3 : index
    %c0_44 = arith.constant 0 : index
    %38 = vector.load %arg2[%c0_41, %c0_42, %c3_43, %c0_44] : memref<1x7x7x4xf32, #tpu.memory_space<vmem>>, vector<1x1x1x4xf32>
    %39 = vector.shape_cast %38 : vector<1x1x1x4xf32> to vector<1x4xf32>
    %40 = vector.shape_cast %37 : vector<1x4xf32> to vector<1x1x1x4xf32>
    tpu.vector_store %arg2[%c0_41, %c0_42, %c3_43, %c0_44], %40 {strides = array<i32>} : memref<1x7x7x4xf32, #tpu.memory_space<vmem>>, vector<1x1x1x4xf32>,
    %c8_45 = arith.constant 8 : index
    %c0_46 = arith.constant 0 : index
    %41 = vector.load %arg3[%c8_45, %c0_46] : memref<16x4xf32, #tpu.memory_space<vmem>>, vector<1x4xf32>
    %c9 = arith.constant 9 : index
    %c0_47 = arith.constant 0 : index
    %42 = vector.load %arg3[%c9, %c0_47] : memref<16x4xf32, #tpu.memory_space<vmem>>, vector<1x4xf32>
    %43 = arith.maximumf %41, %42 : vector<1x4xf32>
    %c10 = arith.constant 10 : index
    %c0_48 = arith.constant 0 : index
    %44 = vector.load %arg3[%c10, %c0_48] : memref<16x4xf32, #tpu.memory_space<vmem>>, vector<1x4xf32>
    %45 = arith.maximumf %43, %44 : vector<1x4xf32>
    %c0_49 = arith.constant 0 : index
    %c0_50 = arith.constant 0 : index
    %c4_51 = arith.constant 4 : index
    %c0_52 = arith.constant 0 : index
    %46 = vector.load %arg2[%c0_49, %c0_50, %c4_51, %c0_52] : memref<1x7x7x4xf32, #tpu.memory_space<vmem>>, vector<1x1x1x4xf32>
    %47 = vector.shape_cast %46 : vector<1x1x1x4xf32> to vector<1x4xf32>
    %48 = vector.shape_cast %45 : vector<1x4xf32> to vector<1x1x1x4xf32>
    tpu.vector_store %arg2[%c0_49, %c0_50, %c4_51, %c0_52], %48 {strides = array<i32>} : memref<1x7x7x4xf32, #tpu.memory_space<vmem>>, vector<1x1x1x4xf32>,
    %c10_53 = arith.constant 10 : index
    %c0_54 = arith.constant 0 : index
    %49 = vector.load %arg3[%c10_53, %c0_54] : memref<16x4xf32, #tpu.memory_space<vmem>>, vector<1x4xf32>
    %c11 = arith.constant 11 : index
    %c0_55 = arith.constant 0 : index
    %50 = vector.load %arg3[%c11, %c0_55] : memref<16x4xf32, #tpu.memory_space<vmem>>, vector<1x4xf32>
    %51 = arith.maximumf %49, %50 : vector<1x4xf32>
    %c12 = arith.constant 12 : index
    %c0_56 = arith.constant 0 : index
    %52 = vector.load %arg3[%c12, %c0_56] : memref<16x4xf32, #tpu.memory_space<vmem>>, vector<1x4xf32>
    %53 = arith.maximumf %51, %52 : vector<1x4xf32>
    %c0_57 = arith.constant 0 : index
    %c0_58 = arith.constant 0 : index
    %c5_59 = arith.constant 5 : index
    %c0_60 = arith.constant 0 : index
    %54 = vector.load %arg2[%c0_57, %c0_58, %c5_59, %c0_60] : memref<1x7x7x4xf32, #tpu.memory_space<vmem>>, vector<1x1x1x4xf32>
    %55 = vector.shape_cast %54 : vector<1x1x1x4xf32> to vector<1x4xf32>
    %56 = vector.shape_cast %53 : vector<1x4xf32> to vector<1x1x1x4xf32>
    tpu.vector_store %arg2[%c0_57, %c0_58, %c5_59, %c0_60], %56 {strides = array<i32>} : memref<1x7x7x4xf32, #tpu.memory_space<vmem>>, vector<1x1x1x4xf32>,
    %c12_61 = arith.constant 12 : index
    %c0_62 = arith.constant 0 : index
    %57 = vector.load %arg3[%c12_61, %c0_62] : memref<16x4xf32, #tpu.memory_space<vmem>>, vector<1x4xf32>
    %c13 = arith.constant 13 : index
    %c0_63 = arith.constant 0 : index
    %58 = vector.load %arg3[%c13, %c0_63] : memref<16x4xf32, #tpu.memory_space<vmem>>, vector<1x4xf32>
    %59 = arith.maximumf %57, %58 : vector<1x4xf32>
    %c14 = arith.constant 14 : index
    %c0_64 = arith.constant 0 : index
    %60 = vector.load %arg3[%c14, %c0_64] : memref<16x4xf32, #tpu.memory_space<vmem>>, vector<1x4xf32>
    %61 = arith.maximumf %59, %60 : vector<1x4xf32>
    %c0_65 = arith.constant 0 : index
    %c0_66 = arith.constant 0 : index
    %c6_67 = arith.constant 6 : index
    %c0_68 = arith.constant 0 : index
    %62 = vector.load %arg2[%c0_65, %c0_66, %c6_67, %c0_68] : memref<1x7x7x4xf32, #tpu.memory_space<vmem>>, vector<1x1x1x4xf32>
    %63 = vector.shape_cast %62 : vector<1x1x1x4xf32> to vector<1x4xf32>
    %64 = vector.shape_cast %61 : vector<1x4xf32> to vector<1x1x1x4xf32>
    tpu.vector_store %arg2[%c0_65, %c0_66, %c6_67, %c0_68], %64 {strides = array<i32>} : memref<1x7x7x4xf32, #tpu.memory_space<vmem>>, vector<1x1x1x4xf32>,
    %c0_69 = arith.constant 0 : index
    %c2_70 = arith.constant 2 : index
    %c0_71 = arith.constant 0 : index
    %c0_72 = arith.constant 0 : index
    %65 = vector.load %arg1[%c0_69, %c2_70, %c0_71, %c0_72] : memref<1x16x16x4xf32, #tpu.memory_space<vmem>>, vector<1x1x16x4xf32>
    %66 = vector.shape_cast %65 : vector<1x1x16x4xf32> to vector<16x4xf32>
    %c0_73 = arith.constant 0 : index
    %c3_74 = arith.constant 3 : index
    %c0_75 = arith.constant 0 : index
    %c0_76 = arith.constant 0 : index
    %67 = vector.load %arg1[%c0_73, %c3_74, %c0_75, %c0_76] : memref<1x16x16x4xf32, #tpu.memory_space<vmem>>, vector<1x1x16x4xf32>
    %68 = vector.shape_cast %67 : vector<1x1x16x4xf32> to vector<16x4xf32>
    %69 = arith.maximumf %66, %68 : vector<16x4xf32>
    %c0_77 = arith.constant 0 : index
    %c4_78 = arith.constant 4 : index
    %c0_79 = arith.constant 0 : index
    %c0_80 = arith.constant 0 : index
    %70 = vector.load %arg1[%c0_77, %c4_78, %c0_79, %c0_80] : memref<1x16x16x4xf32, #tpu.memory_space<vmem>>, vector<1x1x16x4xf32>
    %71 = vector.shape_cast %70 : vector<1x1x16x4xf32> to vector<16x4xf32>
    %72 = arith.maximumf %69, %71 : vector<16x4xf32>
    %c0_81 = arith.constant 0 : index
    %c0_82 = arith.constant 0 : index
    %73 = vector.load %arg3[%c0_81, %c0_82] : memref<16x4xf32, #tpu.memory_space<vmem>>, vector<16x4xf32>
    tpu.vector_store %arg3[%c0_81, %c0_82], %72 {strides = array<i32>} : memref<16x4xf32, #tpu.memory_space<vmem>>, vector<16x4xf32>,
    %c0_83 = arith.constant 0 : index
    %c0_84 = arith.constant 0 : index
    %74 = vector.load %arg3[%c0_83, %c0_84] : memref<16x4xf32, #tpu.memory_space<vmem>>, vector<1x4xf32>
    %c1_85 = arith.constant 1 : index
    %c0_86 = arith.constant 0 : index
    %75 = vector.load %arg3[%c1_85, %c0_86] : memref<16x4xf32, #tpu.memory_space<vmem>>, vector<1x4xf32>
    %76 = arith.maximumf %74, %75 : vector<1x4xf32>
    %c2_87 = arith.constant 2 : index
    %c0_88 = arith.constant 0 : index
    %77 = vector.load %arg3[%c2_87, %c0_88] : memref<16x4xf32, #tpu.memory_space<vmem>>, vector<1x4xf32>
    %78 = arith.maximumf %76, %77 : vector<1x4xf32>
    %c0_89 = arith.constant 0 : index
    %c1_90 = arith.constant 1 : index
    %c0_91 = arith.constant 0 : index
    %c0_92 = arith.constant 0 : index
    %79 = vector.load %arg2[%c0_89, %c1_90, %c0_91, %c0_92] : memref<1x7x7x4xf32, #tpu.memory_space<vmem>>, vector<1x1x1x4xf32>
    %80 = vector.shape_cast %79 : vector<1x1x1x4xf32> to vector<1x4xf32>
    %81 = vector.shape_cast %78 : vector<1x4xf32> to vector<1x1x1x4xf32>
    tpu.vector_store %arg2[%c0_89, %c1_90, %c0_91, %c0_92], %81 {strides = array<i32>} : memref<1x7x7x4xf32, #tpu.memory_space<vmem>>, vector<1x1x1x4xf32>,
    %c2_93 = arith.constant 2 : index
    %c0_94 = arith.constant 0 : index
    %82 = vector.load %arg3[%c2_93, %c0_94] : memref<16x4xf32, #tpu.memory_space<vmem>>, vector<1x4xf32>
    %c3_95 = arith.constant 3 : index
    %c0_96 = arith.constant 0 : index
    %83 = vector.load %arg3[%c3_95, %c0_96] : memref<16x4xf32, #tpu.memory_space<vmem>>, vector<1x4xf32>
    %84 = arith.maximumf %82, %83 : vector<1x4xf32>
    %c4_97 = arith.constant 4 : index
    %c0_98 = arith.constant 0 : index
    %85 = vector.load %arg3[%c4_97, %c0_98] : memref<16x4xf32, #tpu.memory_space<vmem>>, vector<1x4xf32>
    %86 = arith.maximumf %84, %85 : vector<1x4xf32>
    %c0_99 = arith.constant 0 : index
    %c1_100 = arith.constant 1 : index
    %c1_101 = arith.constant 1 : index
    %c0_102 = arith.constant 0 : index
    %87 = vector.load %arg2[%c0_99, %c1_100, %c1_101, %c0_102] : memref<1x7x7x4xf32, #tpu.memory_space<vmem>>, vector<1x1x1x4xf32>
    %88 = vector.shape_cast %87 : vector<1x1x1x4xf32> to vector<1x4xf32>
    %89 = vector.shape_cast %86 : vector<1x4xf32> to vector<1x1x1x4xf32>
    tpu.vector_store %arg2[%c0_99, %c1_100, %c1_101, %c0_102], %89 {strides = array<i32>} : memref<1x7x7x4xf32, #tpu.memory_space<vmem>>, vector<1x1x1x4xf32>,
    %c4_103 = arith.constant 4 : index
    %c0_104 = arith.constant 0 : index
    %90 = vector.load %arg3[%c4_103, %c0_104] : memref<16x4xf32, #tpu.memory_space<vmem>>, vector<1x4xf32>
    %c5_105 = arith.constant 5 : index
    %c0_106 = arith.constant 0 : index
    %91 = vector.load %arg3[%c5_105, %c0_106] : memref<16x4xf32, #tpu.memory_space<vmem>>, vector<1x4xf32>
    %92 = arith.maximumf %90, %91 : vector<1x4xf32>
    %c6_107 = arith.constant 6 : index
    %c0_108 = arith.constant 0 : index
    %93 = vector.load %arg3[%c6_107, %c0_108] : memref<16x4xf32, #tpu.memory_space<vmem>>, vector<1x4xf32>
    %94 = arith.maximumf %92, %93 : vector<1x4xf32>
    %c0_109 = arith.constant 0 : index
    %c1_110 = arith.constant 1 : index
    %c2_111 = arith.constant 2 : index
    %c0_112 = arith.constant 0 : index
    %95 = vector.load %arg2[%c0_109, %c1_110, %c2_111, %c0_112] : memref<1x7x7x4xf32, #tpu.memory_space<vmem>>, vector<1x1x1x4xf32>
    %96 = vector.shape_cast %95 : vector<1x1x1x4xf32> to vector<1x4xf32>
    %97 = vector.shape_cast %94 : vector<1x4xf32> to vector<1x1x1x4xf32>
    tpu.vector_store %arg2[%c0_109, %c1_110, %c2_111, %c0_112], %97 {strides = array<i32>} : memref<1x7x7x4xf32, #tpu.memory_space<vmem>>, vector<1x1x1x4xf32>,
    %c6_113 = arith.constant 6 : index
    %c0_114 = arith.constant 0 : index
    %98 = vector.load %arg3[%c6_113, %c0_114] : memref<16x4xf32, #tpu.memory_space<vmem>>, vector<1x4xf32>
    %c7_115 = arith.constant 7 : index
    %c0_116 = arith.constant 0 : index
    %99 = vector.load %arg3[%c7_115, %c0_116] : memref<16x4xf32, #tpu.memory_space<vmem>>, vector<1x4xf32>
    %100 = arith.maximumf %98, %99 : vector<1x4xf32>
    %c8_117 = arith.constant 8 : index
    %c0_118 = arith.constant 0 : index
    %101 = vector.load %arg3[%c8_117, %c0_118] : memref<16x4xf32, #tpu.memory_space<vmem>>, vector<1x4xf32>
    %102 = arith.maximumf %100, %101 : vector<1x4xf32>
    %c0_119 = arith.constant 0 : index
    %c1_120 = arith.constant 1 : index
    %c3_121 = arith.constant 3 : index
    %c0_122 = arith.constant 0 : index
    %103 = vector.load %arg2[%c0_119, %c1_120, %c3_121, %c0_122] : memref<1x7x7x4xf32, #tpu.memory_space<vmem>>, vector<1x1x1x4xf32>
    %104 = vector.shape_cast %103 : vector<1x1x1x4xf32> to vector<1x4xf32>
    %105 = vector.shape_cast %102 : vector<1x4xf32> to vector<1x1x1x4xf32>
    tpu.vector_store %arg2[%c0_119, %c1_120, %c3_121, %c0_122], %105 {strides = array<i32>} : memref<1x7x7x4xf32, #tpu.memory_space<vmem>>, vector<1x1x1x4xf32>,
    %c8_123 = arith.constant 8 : index
    %c0_124 = arith.constant 0 : index
    %106 = vector.load %arg3[%c8_123, %c0_124] : memref<16x4xf32, #tpu.memory_space<vmem>>, vector<1x4xf32>
    %c9_125 = arith.constant 9 : index
    %c0_126 = arith.constant 0 : index
    %107 = vector.load %arg3[%c9_125, %c0_126] : memref<16x4xf32, #tpu.memory_space<vmem>>, vector<1x4xf32>
    %108 = arith.maximumf %106, %107 : vector<1x4xf32>
    %c10_127 = arith.constant 10 : index
    %c0_128 = arith.constant 0 : index
    %109 = vector.load %arg3[%c10_127, %c0_128] : memref<16x4xf32, #tpu.memory_space<vmem>>, vector<1x4xf32>
    %110 = arith.maximumf %108, %109 : vector<1x4xf32>
    %c0_129 = arith.constant 0 : index
    %c1_130 = arith.constant 1 : index
    %c4_131 = arith.constant 4 : index
    %c0_132 = arith.constant 0 : index
    %111 = vector.load %arg2[%c0_129, %c1_130, %c4_131, %c0_132] : memref<1x7x7x4xf32, #tpu.memory_space<vmem>>, vector<1x1x1x4xf32>
    %112 = vector.shape_cast %111 : vector<1x1x1x4xf32> to vector<1x4xf32>
    %113 = vector.shape_cast %110 : vector<1x4xf32> to vector<1x1x1x4xf32>
    tpu.vector_store %arg2[%c0_129, %c1_130, %c4_131, %c0_132], %113 {strides = array<i32>} : memref<1x7x7x4xf32, #tpu.memory_space<vmem>>, vector<1x1x1x4xf32>,
    %c10_133 = arith.constant 10 : index
    %c0_134 = arith.constant 0 : index
    %114 = vector.load %arg3[%c10_133, %c0_134] : memref<16x4xf32, #tpu.memory_space<vmem>>, vector<1x4xf32>
    %c11_135 = arith.constant 11 : index
    %c0_136 = arith.constant 0 : index
    %115 = vector.load %arg3[%c11_135, %c0_136] : memref<16x4xf32, #tpu.memory_space<vmem>>, vector<1x4xf32>
    %116 = arith.maximumf %114, %115 : vector<1x4xf32>
    %c12_137 = arith.constant 12 : index
    %c0_138 = arith.constant 0 : index
    %117 = vector.load %arg3[%c12_137, %c0_138] : memref<16x4xf32, #tpu.memory_space<vmem>>, vector<1x4xf32>
    %118 = arith.maximumf %116, %117 : vector<1x4xf32>
    %c0_139 = arith.constant 0 : index
    %c1_140 = arith.constant 1 : index
    %c5_141 = arith.constant 5 : index
    %c0_142 = arith.constant 0 : index
    %119 = vector.load %arg2[%c0_139, %c1_140, %c5_141, %c0_142] : memref<1x7x7x4xf32, #tpu.memory_space<vmem>>, vector<1x1x1x4xf32>
    %120 = vector.shape_cast %119 : vector<1x1x1x4xf32> to vector<1x4xf32>
    %121 = vector.shape_cast %118 : vector<1x4xf32> to vector<1x1x1x4xf32>
    tpu.vector_store %arg2[%c0_139, %c1_140, %c5_141, %c0_142], %121 {strides = array<i32>} : memref<1x7x7x4xf32, #tpu.memory_space<vmem>>, vector<1x1x1x4xf32>,
    %c12_143 = arith.constant 12 : index
    %c0_144 = arith.constant 0 : index
    %122 = vector.load %arg3[%c12_143, %c0_144] : memref<16x4xf32, #tpu.memory_space<vmem>>, vector<1x4xf32>
    %c13_145 = arith.constant 13 : index
    %c0_146 = arith.constant 0 : index
    %123 = vector.load %arg3[%c13_145, %c0_146] : memref<16x4xf32, #tpu.memory_space<vmem>>, vector<1x4xf32>
    %124 = arith.maximumf %122, %123 : vector<1x4xf32>
    %c14_147 = arith.constant 14 : index
    %c0_148 = arith.constant 0 : index
    %125 = vector.load %arg3[%c14_147, %c0_148] : memref<16x4xf32, #tpu.memory_space<vmem>>, vector<1x4xf32>
    %126 = arith.maximumf %124, %125 : vector<1x4xf32>
    %c0_149 = arith.constant 0 : index
    %c1_150 = arith.constant 1 : index
    %c6_151 = arith.constant 6 : index
    %c0_152 = arith.constant 0 : index
    %127 = vector.load %arg2[%c0_149, %c1_150, %c6_151, %c0_152] : memref<1x7x7x4xf32, #tpu.memory_space<vmem>>, vector<1x1x1x4xf32>
    %128 = vector.shape_cast %127 : vector<1x1x1x4xf32> to vector<1x4xf32>
    %129 = vector.shape_cast %126 : vector<1x4xf32> to vector<1x1x1x4xf32>
    tpu.vector_store %arg2[%c0_149, %c1_150, %c6_151, %c0_152], %129 {strides = array<i32>} : memref<1x7x7x4xf32, #tpu.memory_space<vmem>>, vector<1x1x1x4xf32>,
    %c0_153 = arith.constant 0 : index
    %c4_154 = arith.constant 4 : index
    %c0_155 = arith.constant 0 : index
    %c0_156 = arith.constant 0 : index
    %130 = vector.load %arg1[%c0_153, %c4_154, %c0_155, %c0_156] : memref<1x16x16x4xf32, #tpu.memory_space<vmem>>, vector<1x1x16x4xf32>
    %131 = vector.shape_cast %130 : vector<1x1x16x4xf32> to vector<16x4xf32>
    %c0_157 = arith.constant 0 : index
    %c5_158 = arith.constant 5 : index
    %c0_159 = arith.constant 0 : index
    %c0_160 = arith.constant 0 : index
    %132 = vector.load %arg1[%c0_157, %c5_158, %c0_159, %c0_160] : memref<1x16x16x4xf32, #tpu.memory_space<vmem>>, vector<1x1x16x4xf32>
    %133 = vector.shape_cast %132 : vector<1x1x16x4xf32> to vector<16x4xf32>
    %134 = arith.maximumf %131, %133 : vector<16x4xf32>
    %c0_161 = arith.constant 0 : index
    %c6_162 = arith.constant 6 : index
    %c0_163 = arith.constant 0 : index
    %c0_164 = arith.constant 0 : index
    %135 = vector.load %arg1[%c0_161, %c6_162, %c0_163, %c0_164] : memref<1x16x16x4xf32, #tpu.memory_space<vmem>>, vector<1x1x16x4xf32>
    %136 = vector.shape_cast %135 : vector<1x1x16x4xf32> to vector<16x4xf32>
    %137 = arith.maximumf %134, %136 : vector<16x4xf32>
    %c0_165 = arith.constant 0 : index
    %c0_166 = arith.constant 0 : index
    %138 = vector.load %arg3[%c0_165, %c0_166] : memref<16x4xf32, #tpu.memory_space<vmem>>, vector<16x4xf32>
    tpu.vector_store %arg3[%c0_165, %c0_166], %137 {strides = array<i32>} : memref<16x4xf32, #tpu.memory_space<vmem>>, vector<16x4xf32>,
    %c0_167 = arith.constant 0 : index
    %c0_168 = arith.constant 0 : index
    %139 = vector.load %arg3[%c0_167, %c0_168] : memref<16x4xf32, #tpu.memory_space<vmem>>, vector<1x4xf32>
    %c1_169 = arith.constant 1 : index
    %c0_170 = arith.constant 0 : index
    %140 = vector.load %arg3[%c1_169, %c0_170] : memref<16x4xf32, #tpu.memory_space<vmem>>, vector<1x4xf32>
    %141 = arith.maximumf %139, %140 : vector<1x4xf32>
    %c2_171 = arith.constant 2 : index
    %c0_172 = arith.constant 0 : index
    %142 = vector.load %arg3[%c2_171, %c0_172] : memref<16x4xf32, #tpu.memory_space<vmem>>, vector<1x4xf32>
    %143 = arith.maximumf %141, %142 : vector<1x4xf32>
    %c0_173 = arith.constant 0 : index
    %c2_174 = arith.constant 2 : index
    %c0_175 = arith.constant 0 : index
    %c0_176 = arith.constant 0 : index
    %144 = vector.load %arg2[%c0_173, %c2_174, %c0_175, %c0_176] : memref<1x7x7x4xf32, #tpu.memory_space<vmem>>, vector<1x1x1x4xf32>
    %145 = vector.shape_cast %144 : vector<1x1x1x4xf32> to vector<1x4xf32>
    %146 = vector.shape_cast %143 : vector<1x4xf32> to vector<1x1x1x4xf32>
    tpu.vector_store %arg2[%c0_173, %c2_174, %c0_175, %c0_176], %146 {strides = array<i32>} : memref<1x7x7x4xf32, #tpu.memory_space<vmem>>, vector<1x1x1x4xf32>,
    %c2_177 = arith.constant 2 : index
    %c0_178 = arith.constant 0 : index
    %147 = vector.load %arg3[%c2_177, %c0_178] : memref<16x4xf32, #tpu.memory_space<vmem>>, vector<1x4xf32>
    %c3_179 = arith.constant 3 : index
    %c0_180 = arith.constant 0 : index
    %148 = vector.load %arg3[%c3_179, %c0_180] : memref<16x4xf32, #tpu.memory_space<vmem>>, vector<1x4xf32>
    %149 = arith.maximumf %147, %148 : vector<1x4xf32>
    %c4_181 = arith.constant 4 : index
    %c0_182 = arith.constant 0 : index
    %150 = vector.load %arg3[%c4_181, %c0_182] : memref<16x4xf32, #tpu.memory_space<vmem>>, vector<1x4xf32>
    %151 = arith.maximumf %149, %150 : vector<1x4xf32>
    %c0_183 = arith.constant 0 : index
    %c2_184 = arith.constant 2 : index
    %c1_185 = arith.constant 1 : index
    %c0_186 = arith.constant 0 : index
    %152 = vector.load %arg2[%c0_183, %c2_184, %c1_185, %c0_186] : memref<1x7x7x4xf32, #tpu.memory_space<vmem>>, vector<1x1x1x4xf32>
    %153 = vector.shape_cast %152 : vector<1x1x1x4xf32> to vector<1x4xf32>
    %154 = vector.shape_cast %151 : vector<1x4xf32> to vector<1x1x1x4xf32>
    tpu.vector_store %arg2[%c0_183, %c2_184, %c1_185, %c0_186], %154 {strides = array<i32>} : memref<1x7x7x4xf32, #tpu.memory_space<vmem>>, vector<1x1x1x4xf32>,
    %c4_187 = arith.constant 4 : index
    %c0_188 = arith.constant 0 : index
    %155 = vector.load %arg3[%c4_187, %c0_188] : memref<16x4xf32, #tpu.memory_space<vmem>>, vector<1x4xf32>
    %c5_189 = arith.constant 5 : index
    %c0_190 = arith.constant 0 : index
    %156 = vector.load %arg3[%c5_189, %c0_190] : memref<16x4xf32, #tpu.memory_space<vmem>>, vector<1x4xf32>
    %157 = arith.maximumf %155, %156 : vector<1x4xf32>
    %c6_191 = arith.constant 6 : index
    %c0_192 = arith.constant 0 : index
    %158 = vector.load %arg3[%c6_191, %c0_192] : memref<16x4xf32, #tpu.memory_space<vmem>>, vector<1x4xf32>
    %159 = arith.maximumf %157, %158 : vector<1x4xf32>
    %c0_193 = arith.constant 0 : index
    %c2_194 = arith.constant 2 : index
    %c2_195 = arith.constant 2 : index
    %c0_196 = arith.constant 0 : index
    %160 = vector.load %arg2[%c0_193, %c2_194, %c2_195, %c0_196] : memref<1x7x7x4xf32, #tpu.memory_space<vmem>>, vector<1x1x1x4xf32>
    %161 = vector.shape_cast %160 : vector<1x1x1x4xf32> to vector<1x4xf32>
    %162 = vector.shape_cast %159 : vector<1x4xf32> to vector<1x1x1x4xf32>
    tpu.vector_store %arg2[%c0_193, %c2_194, %c2_195, %c0_196], %162 {strides = array<i32>} : memref<1x7x7x4xf32, #tpu.memory_space<vmem>>, vector<1x1x1x4xf32>,
    %c6_197 = arith.constant 6 : index
    %c0_198 = arith.constant 0 : index
    %163 = vector.load %arg3[%c6_197, %c0_198] : memref<16x4xf32, #tpu.memory_space<vmem>>, vector<1x4xf32>
    %c7_199 = arith.constant 7 : index
    %c0_200 = arith.constant 0 : index
    %164 = vector.load %arg3[%c7_199, %c0_200] : memref<16x4xf32, #tpu.memory_space<vmem>>, vector<1x4xf32>
    %165 = arith.maximumf %163, %164 : vector<1x4xf32>
    %c8_201 = arith.constant 8 : index
    %c0_202 = arith.constant 0 : index
    %166 = vector.load %arg3[%c8_201, %c0_202] : memref<16x4xf32, #tpu.memory_space<vmem>>, vector<1x4xf32>
    %167 = arith.maximumf %165, %166 : vector<1x4xf32>
    %c0_203 = arith.constant 0 : index
    %c2_204 = arith.constant 2 : index
    %c3_205 = arith.constant 3 : index
    %c0_206 = arith.constant 0 : index
    %168 = vector.load %arg2[%c0_203, %c2_204, %c3_205, %c0_206] : memref<1x7x7x4xf32, #tpu.memory_space<vmem>>, vector<1x1x1x4xf32>
    %169 = vector.shape_cast %168 : vector<1x1x1x4xf32> to vector<1x4xf32>
    %170 = vector.shape_cast %167 : vector<1x4xf32> to vector<1x1x1x4xf32>
    tpu.vector_store %arg2[%c0_203, %c2_204, %c3_205, %c0_206], %170 {strides = array<i32>} : memref<1x7x7x4xf32, #tpu.memory_space<vmem>>, vector<1x1x1x4xf32>,
    %c8_207 = arith.constant 8 : index
    %c0_208 = arith.constant 0 : index
    %171 = vector.load %arg3[%c8_207, %c0_208] : memref<16x4xf32, #tpu.memory_space<vmem>>, vector<1x4xf32>
    %c9_209 = arith.constant 9 : index
    %c0_210 = arith.constant 0 : index
    %172 = vector.load %arg3[%c9_209, %c0_210] : memref<16x4xf32, #tpu.memory_space<vmem>>, vector<1x4xf32>
    %173 = arith.maximumf %171, %172 : vector<1x4xf32>
    %c10_211 = arith.constant 10 : index
    %c0_212 = arith.constant 0 : index
    %174 = vector.load %arg3[%c10_211, %c0_212] : memref<16x4xf32, #tpu.memory_space<vmem>>, vector<1x4xf32>
    %175 = arith.maximumf %173, %174 : vector<1x4xf32>
    %c0_213 = arith.constant 0 : index
    %c2_214 = arith.constant 2 : index
    %c4_215 = arith.constant 4 : index
    %c0_216 = arith.constant 0 : index
    %176 = vector.load %arg2[%c0_213, %c2_214, %c4_215, %c0_216] : memref<1x7x7x4xf32, #tpu.memory_space<vmem>>, vector<1x1x1x4xf32>
    %177 = vector.shape_cast %176 : vector<1x1x1x4xf32> to vector<1x4xf32>
    %178 = vector.shape_cast %175 : vector<1x4xf32> to vector<1x1x1x4xf32>
    tpu.vector_store %arg2[%c0_213, %c2_214, %c4_215, %c0_216], %178 {strides = array<i32>} : memref<1x7x7x4xf32, #tpu.memory_space<vmem>>, vector<1x1x1x4xf32>,
    %c10_217 = arith.constant 10 : index
    %c0_218 = arith.constant 0 : index
    %179 = vector.load %arg3[%c10_217, %c0_218] : memref<16x4xf32, #tpu.memory_space<vmem>>, vector<1x4xf32>
    %c11_219 = arith.constant 11 : index
    %c0_220 = arith.constant 0 : index
    %180 = vector.load %arg3[%c11_219, %c0_220] : memref<16x4xf32, #tpu.memory_space<vmem>>, vector<1x4xf32>
    %181 = arith.maximumf %179, %180 : vector<1x4xf32>
    %c12_221 = arith.constant 12 : index
    %c0_222 = arith.constant 0 : index
    %182 = vector.load %arg3[%c12_221, %c0_222] : memref<16x4xf32, #tpu.memory_space<vmem>>, vector<1x4xf32>
    %183 = arith.maximumf %181, %182 : vector<1x4xf32>
    %c0_223 = arith.constant 0 : index
    %c2_224 = arith.constant 2 : index
    %c5_225 = arith.constant 5 : index
    %c0_226 = arith.constant 0 : index
    %184 = vector.load %arg2[%c0_223, %c2_224, %c5_225, %c0_226] : memref<1x7x7x4xf32, #tpu.memory_space<vmem>>, vector<1x1x1x4xf32>
    %185 = vector.shape_cast %184 : vector<1x1x1x4xf32> to vector<1x4xf32>
    %186 = vector.shape_cast %183 : vector<1x4xf32> to vector<1x1x1x4xf32>
    tpu.vector_store %arg2[%c0_223, %c2_224, %c5_225, %c0_226], %186 {strides = array<i32>} : memref<1x7x7x4xf32, #tpu.memory_space<vmem>>, vector<1x1x1x4xf32>,
    %c12_227 = arith.constant 12 : index
    %c0_228 = arith.constant 0 : index
    %187 = vector.load %arg3[%c12_227, %c0_228] : memref<16x4xf32, #tpu.memory_space<vmem>>, vector<1x4xf32>
    %c13_229 = arith.constant 13 : index
    %c0_230 = arith.constant 0 : index
    %188 = vector.load %arg3[%c13_229, %c0_230] : memref<16x4xf32, #tpu.memory_space<vmem>>, vector<1x4xf32>
    %189 = arith.maximumf %187, %188 : vector<1x4xf32>
    %c14_231 = arith.constant 14 : index
    %c0_232 = arith.constant 0 : index
    %190 = vector.load %arg3[%c14_231, %c0_232] : memref<16x4xf32, #tpu.memory_space<vmem>>, vector<1x4xf32>
    %191 = arith.maximumf %189, %190 : vector<1x4xf32>
    %c0_233 = arith.constant 0 : index
    %c2_234 = arith.constant 2 : index
    %c6_235 = arith.constant 6 : index
    %c0_236 = arith.constant 0 : index
    %192 = vector.load %arg2[%c0_233, %c2_234, %c6_235, %c0_236] : memref<1x7x7x4xf32, #tpu.memory_space<vmem>>, vector<1x1x1x4xf32>
    %193 = vector.shape_cast %192 : vector<1x1x1x4xf32> to vector<1x4xf32>
    %194 = vector.shape_cast %191 : vector<1x4xf32> to vector<1x1x1x4xf32>
    tpu.vector_store %arg2[%c0_233, %c2_234, %c6_235, %c0_236], %194 {strides = array<i32>} : memref<1x7x7x4xf32, #tpu.memory_space<vmem>>, vector<1x1x1x4xf32>,
    %c0_237 = arith.constant 0 : index
    %c6_238 = arith.constant 6 : index
    %c0_239 = arith.constant 0 : index
    %c0_240 = arith.constant 0 : index
    %195 = vector.load %arg1[%c0_237, %c6_238, %c0_239, %c0_240] : memref<1x16x16x4xf32, #tpu.memory_space<vmem>>, vector<1x1x16x4xf32>
    %196 = vector.shape_cast %195 : vector<1x1x16x4xf32> to vector<16x4xf32>
    %c0_241 = arith.constant 0 : index
    %c7_242 = arith.constant 7 : index
    %c0_243 = arith.constant 0 : index
    %c0_244 = arith.constant 0 : index
    %197 = vector.load %arg1[%c0_241, %c7_242, %c0_243, %c0_244] : memref<1x16x16x4xf32, #tpu.memory_space<vmem>>, vector<1x1x16x4xf32>
    %198 = vector.shape_cast %197 : vector<1x1x16x4xf32> to vector<16x4xf32>
    %199 = arith.maximumf %196, %198 : vector<16x4xf32>
    %c0_245 = arith.constant 0 : index
    %c8_246 = arith.constant 8 : index
    %c0_247 = arith.constant 0 : index
    %c0_248 = arith.constant 0 : index
    %200 = vector.load %arg1[%c0_245, %c8_246, %c0_247, %c0_248] : memref<1x16x16x4xf32, #tpu.memory_space<vmem>>, vector<1x1x16x4xf32>
    %201 = vector.shape_cast %200 : vector<1x1x16x4xf32> to vector<16x4xf32>
    %202 = arith.maximumf %199, %201 : vector<16x4xf32>
    %c0_249 = arith.constant 0 : index
    %c0_250 = arith.constant 0 : index
    %203 = vector.load %arg3[%c0_249, %c0_250] : memref<16x4xf32, #tpu.memory_space<vmem>>, vector<16x4xf32>
    tpu.vector_store %arg3[%c0_249, %c0_250], %202 {strides = array<i32>} : memref<16x4xf32, #tpu.memory_space<vmem>>, vector<16x4xf32>,
    %c0_251 = arith.constant 0 : index
    %c0_252 = arith.constant 0 : index
    %204 = vector.load %arg3[%c0_251, %c0_252] : memref<16x4xf32, #tpu.memory_space<vmem>>, vector<1x4xf32>
    %c1_253 = arith.constant 1 : index
    %c0_254 = arith.constant 0 : index
    %205 = vector.load %arg3[%c1_253, %c0_254] : memref<16x4xf32, #tpu.memory_space<vmem>>, vector<1x4xf32>
    %206 = arith.maximumf %204, %205 : vector<1x4xf32>
    %c2_255 = arith.constant 2 : index
    %c0_256 = arith.constant 0 : index
    %207 = vector.load %arg3[%c2_255, %c0_256] : memref<16x4xf32, #tpu.memory_space<vmem>>, vector<1x4xf32>
    %208 = arith.maximumf %206, %207 : vector<1x4xf32>
    %c0_257 = arith.constant 0 : index
    %c3_258 = arith.constant 3 : index
    %c0_259 = arith.constant 0 : index
    %c0_260 = arith.constant 0 : index
    %209 = vector.load %arg2[%c0_257, %c3_258, %c0_259, %c0_260] : memref<1x7x7x4xf32, #tpu.memory_space<vmem>>, vector<1x1x1x4xf32>
    %210 = vector.shape_cast %209 : vector<1x1x1x4xf32> to vector<1x4xf32>
    %211 = vector.shape_cast %208 : vector<1x4xf32> to vector<1x1x1x4xf32>
    tpu.vector_store %arg2[%c0_257, %c3_258, %c0_259, %c0_260], %211 {strides = array<i32>} : memref<1x7x7x4xf32, #tpu.memory_space<vmem>>, vector<1x1x1x4xf32>,
    %c2_261 = arith.constant 2 : index
    %c0_262 = arith.constant 0 : index
    %212 = vector.load %arg3[%c2_261, %c0_262] : memref<16x4xf32, #tpu.memory_space<vmem>>, vector<1x4xf32>
    %c3_263 = arith.constant 3 : index
    %c0_264 = arith.constant 0 : index
    %213 = vector.load %arg3[%c3_263, %c0_264] : memref<16x4xf32, #tpu.memory_space<vmem>>, vector<1x4xf32>
    %214 = arith.maximumf %212, %213 : vector<1x4xf32>
    %c4_265 = arith.constant 4 : index
    %c0_266 = arith.constant 0 : index
    %215 = vector.load %arg3[%c4_265, %c0_266] : memref<16x4xf32, #tpu.memory_space<vmem>>, vector<1x4xf32>
    %216 = arith.maximumf %214, %215 : vector<1x4xf32>
    %c0_267 = arith.constant 0 : index
    %c3_268 = arith.constant 3 : index
    %c1_269 = arith.constant 1 : index
    %c0_270 = arith.constant 0 : index
    %217 = vector.load %arg2[%c0_267, %c3_268, %c1_269, %c0_270] : memref<1x7x7x4xf32, #tpu.memory_space<vmem>>, vector<1x1x1x4xf32>
    %218 = vector.shape_cast %217 : vector<1x1x1x4xf32> to vector<1x4xf32>
    %219 = vector.shape_cast %216 : vector<1x4xf32> to vector<1x1x1x4xf32>
    tpu.vector_store %arg2[%c0_267, %c3_268, %c1_269, %c0_270], %219 {strides = array<i32>} : memref<1x7x7x4xf32, #tpu.memory_space<vmem>>, vector<1x1x1x4xf32>,
    %c4_271 = arith.constant 4 : index
    %c0_272 = arith.constant 0 : index
    %220 = vector.load %arg3[%c4_271, %c0_272] : memref<16x4xf32, #tpu.memory_space<vmem>>, vector<1x4xf32>
    %c5_273 = arith.constant 5 : index
    %c0_274 = arith.constant 0 : index
    %221 = vector.load %arg3[%c5_273, %c0_274] : memref<16x4xf32, #tpu.memory_space<vmem>>, vector<1x4xf32>
    %222 = arith.maximumf %220, %221 : vector<1x4xf32>
    %c6_275 = arith.constant 6 : index
    %c0_276 = arith.constant 0 : index
    %223 = vector.load %arg3[%c6_275, %c0_276] : memref<16x4xf32, #tpu.memory_space<vmem>>, vector<1x4xf32>
    %224 = arith.maximumf %222, %223 : vector<1x4xf32>
    %c0_277 = arith.constant 0 : index
    %c3_278 = arith.constant 3 : index
    %c2_279 = arith.constant 2 : index
    %c0_280 = arith.constant 0 : index
    %225 = vector.load %arg2[%c0_277, %c3_278, %c2_279, %c0_280] : memref<1x7x7x4xf32, #tpu.memory_space<vmem>>, vector<1x1x1x4xf32>
    %226 = vector.shape_cast %225 : vector<1x1x1x4xf32> to vector<1x4xf32>
    %227 = vector.shape_cast %224 : vector<1x4xf32> to vector<1x1x1x4xf32>
    tpu.vector_store %arg2[%c0_277, %c3_278, %c2_279, %c0_280], %227 {strides = array<i32>} : memref<1x7x7x4xf32, #tpu.memory_space<vmem>>, vector<1x1x1x4xf32>,
    %c6_281 = arith.constant 6 : index
    %c0_282 = arith.constant 0 : index
    %228 = vector.load %arg3[%c6_281, %c0_282] : memref<16x4xf32, #tpu.memory_space<vmem>>, vector<1x4xf32>
    %c7_283 = arith.constant 7 : index
    %c0_284 = arith.constant 0 : index
    %229 = vector.load %arg3[%c7_283, %c0_284] : memref<16x4xf32, #tpu.memory_space<vmem>>, vector<1x4xf32>
    %230 = arith.maximumf %228, %229 : vector<1x4xf32>
    %c8_285 = arith.constant 8 : index
    %c0_286 = arith.constant 0 : index
    %231 = vector.load %arg3[%c8_285, %c0_286] : memref<16x4xf32, #tpu.memory_space<vmem>>, vector<1x4xf32>
    %232 = arith.maximumf %230, %231 : vector<1x4xf32>
    %c0_287 = arith.constant 0 : index
    %c3_288 = arith.constant 3 : index
    %c3_289 = arith.constant 3 : index
    %c0_290 = arith.constant 0 : index
    %233 = vector.load %arg2[%c0_287, %c3_288, %c3_289, %c0_290] : memref<1x7x7x4xf32, #tpu.memory_space<vmem>>, vector<1x1x1x4xf32>
    %234 = vector.shape_cast %233 : vector<1x1x1x4xf32> to vector<1x4xf32>
    %235 = vector.shape_cast %232 : vector<1x4xf32> to vector<1x1x1x4xf32>
    tpu.vector_store %arg2[%c0_287, %c3_288, %c3_289, %c0_290], %235 {strides = array<i32>} : memref<1x7x7x4xf32, #tpu.memory_space<vmem>>, vector<1x1x1x4xf32>,
    %c8_291 = arith.constant 8 : index
    %c0_292 = arith.constant 0 : index
    %236 = vector.load %arg3[%c8_291, %c0_292] : memref<16x4xf32, #tpu.memory_space<vmem>>, vector<1x4xf32>
    %c9_293 = arith.constant 9 : index
    %c0_294 = arith.constant 0 : index
    %237 = vector.load %arg3[%c9_293, %c0_294] : memref<16x4xf32, #tpu.memory_space<vmem>>, vector<1x4xf32>
    %238 = arith.maximumf %236, %237 : vector<1x4xf32>
    %c10_295 = arith.constant 10 : index
    %c0_296 = arith.constant 0 : index
    %239 = vector.load %arg3[%c10_295, %c0_296] : memref<16x4xf32, #tpu.memory_space<vmem>>, vector<1x4xf32>
    %240 = arith.maximumf %238, %239 : vector<1x4xf32>
    %c0_297 = arith.constant 0 : index
    %c3_298 = arith.constant 3 : index
    %c4_299 = arith.constant 4 : index
    %c0_300 = arith.constant 0 : index
    %241 = vector.load %arg2[%c0_297, %c3_298, %c4_299, %c0_300] : memref<1x7x7x4xf32, #tpu.memory_space<vmem>>, vector<1x1x1x4xf32>
    %242 = vector.shape_cast %241 : vector<1x1x1x4xf32> to vector<1x4xf32>
    %243 = vector.shape_cast %240 : vector<1x4xf32> to vector<1x1x1x4xf32>
    tpu.vector_store %arg2[%c0_297, %c3_298, %c4_299, %c0_300], %243 {strides = array<i32>} : memref<1x7x7x4xf32, #tpu.memory_space<vmem>>, vector<1x1x1x4xf32>,
    %c10_301 = arith.constant 10 : index
    %c0_302 = arith.constant 0 : index
    %244 = vector.load %arg3[%c10_301, %c0_302] : memref<16x4xf32, #tpu.memory_space<vmem>>, vector<1x4xf32>
    %c11_303 = arith.constant 11 : index
    %c0_304 = arith.constant 0 : index
    %245 = vector.load %arg3[%c11_303, %c0_304] : memref<16x4xf32, #tpu.memory_space<vmem>>, vector<1x4xf32>
    %246 = arith.maximumf %244, %245 : vector<1x4xf32>
    %c12_305 = arith.constant 12 : index
    %c0_306 = arith.constant 0 : index
    %247 = vector.load %arg3[%c12_305, %c0_306] : memref<16x4xf32, #tpu.memory_space<vmem>>, vector<1x4xf32>
    %248 = arith.maximumf %246, %247 : vector<1x4xf32>
    %c0_307 = arith.constant 0 : index
    %c3_308 = arith.constant 3 : index
    %c5_309 = arith.constant 5 : index
    %c0_310 = arith.constant 0 : index
    %249 = vector.load %arg2[%c0_307, %c3_308, %c5_309, %c0_310] : memref<1x7x7x4xf32, #tpu.memory_space<vmem>>, vector<1x1x1x4xf32>
    %250 = vector.shape_cast %249 : vector<1x1x1x4xf32> to vector<1x4xf32>
    %251 = vector.shape_cast %248 : vector<1x4xf32> to vector<1x1x1x4xf32>
    tpu.vector_store %arg2[%c0_307, %c3_308, %c5_309, %c0_310], %251 {strides = array<i32>} : memref<1x7x7x4xf32, #tpu.memory_space<vmem>>, vector<1x1x1x4xf32>,
    %c12_311 = arith.constant 12 : index
    %c0_312 = arith.constant 0 : index
    %252 = vector.load %arg3[%c12_311, %c0_312] : memref<16x4xf32, #tpu.memory_space<vmem>>, vector<1x4xf32>
    %c13_313 = arith.constant 13 : index
    %c0_314 = arith.constant 0 : index
    %253 = vector.load %arg3[%c13_313, %c0_314] : memref<16x4xf32, #tpu.memory_space<vmem>>, vector<1x4xf32>
    %254 = arith.maximumf %252, %253 : vector<1x4xf32>
    %c14_315 = arith.constant 14 : index
    %c0_316 = arith.constant 0 : index
    %255 = vector.load %arg3[%c14_315, %c0_316] : memref<16x4xf32, #tpu.memory_space<vmem>>, vector<1x4xf32>
    %256 = arith.maximumf %254, %255 : vector<1x4xf32>
    %c0_317 = arith.constant 0 : index
    %c3_318 = arith.constant 3 : index
    %c6_319 = arith.constant 6 : index
    %c0_320 = arith.constant 0 : index
    %257 = vector.load %arg2[%c0_317, %c3_318, %c6_319, %c0_320] : memref<1x7x7x4xf32, #tpu.memory_space<vmem>>, vector<1x1x1x4xf32>
    %258 = vector.shape_cast %257 : vector<1x1x1x4xf32> to vector<1x4xf32>
    %259 = vector.shape_cast %256 : vector<1x4xf32> to vector<1x1x1x4xf32>
    tpu.vector_store %arg2[%c0_317, %c3_318, %c6_319, %c0_320], %259 {strides = array<i32>} : memref<1x7x7x4xf32, #tpu.memory_space<vmem>>, vector<1x1x1x4xf32>,
    %c0_321 = arith.constant 0 : index
    %c8_322 = arith.constant 8 : index
    %c0_323 = arith.constant 0 : index
    %c0_324 = arith.constant 0 : index
    %260 = vector.load %arg1[%c0_321, %c8_322, %c0_323, %c0_324] : memref<1x16x16x4xf32, #tpu.memory_space<vmem>>, vector<1x1x16x4xf32>
    %261 = vector.shape_cast %260 : vector<1x1x16x4xf32> to vector<16x4xf32>
    %c0_325 = arith.constant 0 : index
    %c9_326 = arith.constant 9 : index
    %c0_327 = arith.constant 0 : index
    %c0_328 = arith.constant 0 : index
    %262 = vector.load %arg1[%c0_325, %c9_326, %c0_327, %c0_328] : memref<1x16x16x4xf32, #tpu.memory_space<vmem>>, vector<1x1x16x4xf32>
    %263 = vector.shape_cast %262 : vector<1x1x16x4xf32> to vector<16x4xf32>
    %264 = arith.maximumf %261, %263 : vector<16x4xf32>
    %c0_329 = arith.constant 0 : index
    %c10_330 = arith.constant 10 : index
    %c0_331 = arith.constant 0 : index
    %c0_332 = arith.constant 0 : index
    %265 = vector.load %arg1[%c0_329, %c10_330, %c0_331, %c0_332] : memref<1x16x16x4xf32, #tpu.memory_space<vmem>>, vector<1x1x16x4xf32>
    %266 = vector.shape_cast %265 : vector<1x1x16x4xf32> to vector<16x4xf32>
    %267 = arith.maximumf %264, %266 : vector<16x4xf32>
    %c0_333 = arith.constant 0 : index
    %c0_334 = arith.constant 0 : index
    %268 = vector.load %arg3[%c0_333, %c0_334] : memref<16x4xf32, #tpu.memory_space<vmem>>, vector<16x4xf32>
    tpu.vector_store %arg3[%c0_333, %c0_334], %267 {strides = array<i32>} : memref<16x4xf32, #tpu.memory_space<vmem>>, vector<16x4xf32>,
    %c0_335 = arith.constant 0 : index
    %c0_336 = arith.constant 0 : index
    %269 = vector.load %arg3[%c0_335, %c0_336] : memref<16x4xf32, #tpu.memory_space<vmem>>, vector<1x4xf32>
    %c1_337 = arith.constant 1 : index
    %c0_338 = arith.constant 0 : index
    %270 = vector.load %arg3[%c1_337, %c0_338] : memref<16x4xf32, #tpu.memory_space<vmem>>, vector<1x4xf32>
    %271 = arith.maximumf %269, %270 : vector<1x4xf32>
    %c2_339 = arith.constant 2 : index
    %c0_340 = arith.constant 0 : index
    %272 = vector.load %arg3[%c2_339, %c0_340] : memref<16x4xf32, #tpu.memory_space<vmem>>, vector<1x4xf32>
    %273 = arith.maximumf %271, %272 : vector<1x4xf32>
    %c0_341 = arith.constant 0 : index
    %c4_342 = arith.constant 4 : index
    %c0_343 = arith.constant 0 : index
    %c0_344 = arith.constant 0 : index
    %274 = vector.load %arg2[%c0_341, %c4_342, %c0_343, %c0_344] : memref<1x7x7x4xf32, #tpu.memory_space<vmem>>, vector<1x1x1x4xf32>
    %275 = vector.shape_cast %274 : vector<1x1x1x4xf32> to vector<1x4xf32>
    %276 = vector.shape_cast %273 : vector<1x4xf32> to vector<1x1x1x4xf32>
    tpu.vector_store %arg2[%c0_341, %c4_342, %c0_343, %c0_344], %276 {strides = array<i32>} : memref<1x7x7x4xf32, #tpu.memory_space<vmem>>, vector<1x1x1x4xf32>,
    %c2_345 = arith.constant 2 : index
    %c0_346 = arith.constant 0 : index
    %277 = vector.load %arg3[%c2_345, %c0_346] : memref<16x4xf32, #tpu.memory_space<vmem>>, vector<1x4xf32>
    %c3_347 = arith.constant 3 : index
    %c0_348 = arith.constant 0 : index
    %278 = vector.load %arg3[%c3_347, %c0_348] : memref<16x4xf32, #tpu.memory_space<vmem>>, vector<1x4xf32>
    %279 = arith.maximumf %277, %278 : vector<1x4xf32>
    %c4_349 = arith.constant 4 : index
    %c0_350 = arith.constant 0 : index
    %280 = vector.load %arg3[%c4_349, %c0_350] : memref<16x4xf32, #tpu.memory_space<vmem>>, vector<1x4xf32>
    %281 = arith.maximumf %279, %280 : vector<1x4xf32>
    %c0_351 = arith.constant 0 : index
    %c4_352 = arith.constant 4 : index
    %c1_353 = arith.constant 1 : index
    %c0_354 = arith.constant 0 : index
    %282 = vector.load %arg2[%c0_351, %c4_352, %c1_353, %c0_354] : memref<1x7x7x4xf32, #tpu.memory_space<vmem>>, vector<1x1x1x4xf32>
    %283 = vector.shape_cast %282 : vector<1x1x1x4xf32> to vector<1x4xf32>
    %284 = vector.shape_cast %281 : vector<1x4xf32> to vector<1x1x1x4xf32>
    tpu.vector_store %arg2[%c0_351, %c4_352, %c1_353, %c0_354], %284 {strides = array<i32>} : memref<1x7x7x4xf32, #tpu.memory_space<vmem>>, vector<1x1x1x4xf32>,
    %c4_355 = arith.constant 4 : index
    %c0_356 = arith.constant 0 : index
    %285 = vector.load %arg3[%c4_355, %c0_356] : memref<16x4xf32, #tpu.memory_space<vmem>>, vector<1x4xf32>
    %c5_357 = arith.constant 5 : index
    %c0_358 = arith.constant 0 : index
    %286 = vector.load %arg3[%c5_357, %c0_358] : memref<16x4xf32, #tpu.memory_space<vmem>>, vector<1x4xf32>
    %287 = arith.maximumf %285, %286 : vector<1x4xf32>
    %c6_359 = arith.constant 6 : index
    %c0_360 = arith.constant 0 : index
    %288 = vector.load %arg3[%c6_359, %c0_360] : memref<16x4xf32, #tpu.memory_space<vmem>>, vector<1x4xf32>
    %289 = arith.maximumf %287, %288 : vector<1x4xf32>
    %c0_361 = arith.constant 0 : index
    %c4_362 = arith.constant 4 : index
    %c2_363 = arith.constant 2 : index
    %c0_364 = arith.constant 0 : index
    %290 = vector.load %arg2[%c0_361, %c4_362, %c2_363, %c0_364] : memref<1x7x7x4xf32, #tpu.memory_space<vmem>>, vector<1x1x1x4xf32>
    %291 = vector.shape_cast %290 : vector<1x1x1x4xf32> to vector<1x4xf32>
    %292 = vector.shape_cast %289 : vector<1x4xf32> to vector<1x1x1x4xf32>
    tpu.vector_store %arg2[%c0_361, %c4_362, %c2_363, %c0_364], %292 {strides = array<i32>} : memref<1x7x7x4xf32, #tpu.memory_space<vmem>>, vector<1x1x1x4xf32>,
    %c6_365 = arith.constant 6 : index
    %c0_366 = arith.constant 0 : index
    %293 = vector.load %arg3[%c6_365, %c0_366] : memref<16x4xf32, #tpu.memory_space<vmem>>, vector<1x4xf32>
    %c7_367 = arith.constant 7 : index
    %c0_368 = arith.constant 0 : index
    %294 = vector.load %arg3[%c7_367, %c0_368] : memref<16x4xf32, #tpu.memory_space<vmem>>, vector<1x4xf32>
    %295 = arith.maximumf %293, %294 : vector<1x4xf32>
    %c8_369 = arith.constant 8 : index
    %c0_370 = arith.constant 0 : index
    %296 = vector.load %arg3[%c8_369, %c0_370] : memref<16x4xf32, #tpu.memory_space<vmem>>, vector<1x4xf32>
    %297 = arith.maximumf %295, %296 : vector<1x4xf32>
    %c0_371 = arith.constant 0 : index
    %c4_372 = arith.constant 4 : index
    %c3_373 = arith.constant 3 : index
    %c0_374 = arith.constant 0 : index
    %298 = vector.load %arg2[%c0_371, %c4_372, %c3_373, %c0_374] : memref<1x7x7x4xf32, #tpu.memory_space<vmem>>, vector<1x1x1x4xf32>
    %299 = vector.shape_cast %298 : vector<1x1x1x4xf32> to vector<1x4xf32>
    %300 = vector.shape_cast %297 : vector<1x4xf32> to vector<1x1x1x4xf32>
    tpu.vector_store %arg2[%c0_371, %c4_372, %c3_373, %c0_374], %300 {strides = array<i32>} : memref<1x7x7x4xf32, #tpu.memory_space<vmem>>, vector<1x1x1x4xf32>,
    %c8_375 = arith.constant 8 : index
    %c0_376 = arith.constant 0 : index
    %301 = vector.load %arg3[%c8_375, %c0_376] : memref<16x4xf32, #tpu.memory_space<vmem>>, vector<1x4xf32>
    %c9_377 = arith.constant 9 : index
    %c0_378 = arith.constant 0 : index
    %302 = vector.load %arg3[%c9_377, %c0_378] : memref<16x4xf32, #tpu.memory_space<vmem>>, vector<1x4xf32>
    %303 = arith.maximumf %301, %302 : vector<1x4xf32>
    %c10_379 = arith.constant 10 : index
    %c0_380 = arith.constant 0 : index
    %304 = vector.load %arg3[%c10_379, %c0_380] : memref<16x4xf32, #tpu.memory_space<vmem>>, vector<1x4xf32>
    %305 = arith.maximumf %303, %304 : vector<1x4xf32>
    %c0_381 = arith.constant 0 : index
    %c4_382 = arith.constant 4 : index
    %c4_383 = arith.constant 4 : index
    %c0_384 = arith.constant 0 : index
    %306 = vector.load %arg2[%c0_381, %c4_382, %c4_383, %c0_384] : memref<1x7x7x4xf32, #tpu.memory_space<vmem>>, vector<1x1x1x4xf32>
    %307 = vector.shape_cast %306 : vector<1x1x1x4xf32> to vector<1x4xf32>
    %308 = vector.shape_cast %305 : vector<1x4xf32> to vector<1x1x1x4xf32>
    tpu.vector_store %arg2[%c0_381, %c4_382, %c4_383, %c0_384], %308 {strides = array<i32>} : memref<1x7x7x4xf32, #tpu.memory_space<vmem>>, vector<1x1x1x4xf32>,
    %c10_385 = arith.constant 10 : index
    %c0_386 = arith.constant 0 : index
    %309 = vector.load %arg3[%c10_385, %c0_386] : memref<16x4xf32, #tpu.memory_space<vmem>>, vector<1x4xf32>
    %c11_387 = arith.constant 11 : index
    %c0_388 = arith.constant 0 : index
    %310 = vector.load %arg3[%c11_387, %c0_388] : memref<16x4xf32, #tpu.memory_space<vmem>>, vector<1x4xf32>
    %311 = arith.maximumf %309, %310 : vector<1x4xf32>
    %c12_389 = arith.constant 12 : index
    %c0_390 = arith.constant 0 : index
    %312 = vector.load %arg3[%c12_389, %c0_390] : memref<16x4xf32, #tpu.memory_space<vmem>>, vector<1x4xf32>
    %313 = arith.maximumf %311, %312 : vector<1x4xf32>
    %c0_391 = arith.constant 0 : index
    %c4_392 = arith.constant 4 : index
    %c5_393 = arith.constant 5 : index
    %c0_394 = arith.constant 0 : index
    %314 = vector.load %arg2[%c0_391, %c4_392, %c5_393, %c0_394] : memref<1x7x7x4xf32, #tpu.memory_space<vmem>>, vector<1x1x1x4xf32>
    %315 = vector.shape_cast %314 : vector<1x1x1x4xf32> to vector<1x4xf32>
    %316 = vector.shape_cast %313 : vector<1x4xf32> to vector<1x1x1x4xf32>
    tpu.vector_store %arg2[%c0_391, %c4_392, %c5_393, %c0_394], %316 {strides = array<i32>} : memref<1x7x7x4xf32, #tpu.memory_space<vmem>>, vector<1x1x1x4xf32>,
    %c12_395 = arith.constant 12 : index
    %c0_396 = arith.constant 0 : index
    %317 = vector.load %arg3[%c12_395, %c0_396] : memref<16x4xf32, #tpu.memory_space<vmem>>, vector<1x4xf32>
    %c13_397 = arith.constant 13 : index
    %c0_398 = arith.constant 0 : index
    %318 = vector.load %arg3[%c13_397, %c0_398] : memref<16x4xf32, #tpu.memory_space<vmem>>, vector<1x4xf32>
    %319 = arith.maximumf %317, %318 : vector<1x4xf32>
    %c14_399 = arith.constant 14 : index
    %c0_400 = arith.constant 0 : index
    %320 = vector.load %arg3[%c14_399, %c0_400] : memref<16x4xf32, #tpu.memory_space<vmem>>, vector<1x4xf32>
    %321 = arith.maximumf %319, %320 : vector<1x4xf32>
    %c0_401 = arith.constant 0 : index
    %c4_402 = arith.constant 4 : index
    %c6_403 = arith.constant 6 : index
    %c0_404 = arith.constant 0 : index
    %322 = vector.load %arg2[%c0_401, %c4_402, %c6_403, %c0_404] : memref<1x7x7x4xf32, #tpu.memory_space<vmem>>, vector<1x1x1x4xf32>
    %323 = vector.shape_cast %322 : vector<1x1x1x4xf32> to vector<1x4xf32>
    %324 = vector.shape_cast %321 : vector<1x4xf32> to vector<1x1x1x4xf32>
    tpu.vector_store %arg2[%c0_401, %c4_402, %c6_403, %c0_404], %324 {strides = array<i32>} : memref<1x7x7x4xf32, #tpu.memory_space<vmem>>, vector<1x1x1x4xf32>,
    %c0_405 = arith.constant 0 : index
    %c10_406 = arith.constant 10 : index
    %c0_407 = arith.constant 0 : index
    %c0_408 = arith.constant 0 : index
    %325 = vector.load %arg1[%c0_405, %c10_406, %c0_407, %c0_408] : memref<1x16x16x4xf32, #tpu.memory_space<vmem>>, vector<1x1x16x4xf32>
    %326 = vector.shape_cast %325 : vector<1x1x16x4xf32> to vector<16x4xf32>
    %c0_409 = arith.constant 0 : index
    %c11_410 = arith.constant 11 : index
    %c0_411 = arith.constant 0 : index
    %c0_412 = arith.constant 0 : index
    %327 = vector.load %arg1[%c0_409, %c11_410, %c0_411, %c0_412] : memref<1x16x16x4xf32, #tpu.memory_space<vmem>>, vector<1x1x16x4xf32>
    %328 = vector.shape_cast %327 : vector<1x1x16x4xf32> to vector<16x4xf32>
    %329 = arith.maximumf %326, %328 : vector<16x4xf32>
    %c0_413 = arith.constant 0 : index
    %c12_414 = arith.constant 12 : index
    %c0_415 = arith.constant 0 : index
    %c0_416 = arith.constant 0 : index
    %330 = vector.load %arg1[%c0_413, %c12_414, %c0_415, %c0_416] : memref<1x16x16x4xf32, #tpu.memory_space<vmem>>, vector<1x1x16x4xf32>
    %331 = vector.shape_cast %330 : vector<1x1x16x4xf32> to vector<16x4xf32>
    %332 = arith.maximumf %329, %331 : vector<16x4xf32>
    %c0_417 = arith.constant 0 : index
    %c0_418 = arith.constant 0 : index
    %333 = vector.load %arg3[%c0_417, %c0_418] : memref<16x4xf32, #tpu.memory_space<vmem>>, vector<16x4xf32>
    tpu.vector_store %arg3[%c0_417, %c0_418], %332 {strides = array<i32>} : memref<16x4xf32, #tpu.memory_space<vmem>>, vector<16x4xf32>,
    %c0_419 = arith.constant 0 : index
    %c0_420 = arith.constant 0 : index
    %334 = vector.load %arg3[%c0_419, %c0_420] : memref<16x4xf32, #tpu.memory_space<vmem>>, vector<1x4xf32>
    %c1_421 = arith.constant 1 : index
    %c0_422 = arith.constant 0 : index
    %335 = vector.load %arg3[%c1_421, %c0_422] : memref<16x4xf32, #tpu.memory_space<vmem>>, vector<1x4xf32>
    %336 = arith.maximumf %334, %335 : vector<1x4xf32>
    %c2_423 = arith.constant 2 : index
    %c0_424 = arith.constant 0 : index
    %337 = vector.load %arg3[%c2_423, %c0_424] : memref<16x4xf32, #tpu.memory_space<vmem>>, vector<1x4xf32>
    %338 = arith.maximumf %336, %337 : vector<1x4xf32>
    %c0_425 = arith.constant 0 : index
    %c5_426 = arith.constant 5 : index
    %c0_427 = arith.constant 0 : index
    %c0_428 = arith.constant 0 : index
    %339 = vector.load %arg2[%c0_425, %c5_426, %c0_427, %c0_428] : memref<1x7x7x4xf32, #tpu.memory_space<vmem>>, vector<1x1x1x4xf32>
    %340 = vector.shape_cast %339 : vector<1x1x1x4xf32> to vector<1x4xf32>
    %341 = vector.shape_cast %338 : vector<1x4xf32> to vector<1x1x1x4xf32>
    tpu.vector_store %arg2[%c0_425, %c5_426, %c0_427, %c0_428], %341 {strides = array<i32>} : memref<1x7x7x4xf32, #tpu.memory_space<vmem>>, vector<1x1x1x4xf32>,
    %c2_429 = arith.constant 2 : index
    %c0_430 = arith.constant 0 : index
    %342 = vector.load %arg3[%c2_429, %c0_430] : memref<16x4xf32, #tpu.memory_space<vmem>>, vector<1x4xf32>
    %c3_431 = arith.constant 3 : index
    %c0_432 = arith.constant 0 : index
    %343 = vector.load %arg3[%c3_431, %c0_432] : memref<16x4xf32, #tpu.memory_space<vmem>>, vector<1x4xf32>
    %344 = arith.maximumf %342, %343 : vector<1x4xf32>
    %c4_433 = arith.constant 4 : index
    %c0_434 = arith.constant 0 : index
    %345 = vector.load %arg3[%c4_433, %c0_434] : memref<16x4xf32, #tpu.memory_space<vmem>>, vector<1x4xf32>
    %346 = arith.maximumf %344, %345 : vector<1x4xf32>
    %c0_435 = arith.constant 0 : index
    %c5_436 = arith.constant 5 : index
    %c1_437 = arith.constant 1 : index
    %c0_438 = arith.constant 0 : index
    %347 = vector.load %arg2[%c0_435, %c5_436, %c1_437, %c0_438] : memref<1x7x7x4xf32, #tpu.memory_space<vmem>>, vector<1x1x1x4xf32>
    %348 = vector.shape_cast %347 : vector<1x1x1x4xf32> to vector<1x4xf32>
    %349 = vector.shape_cast %346 : vector<1x4xf32> to vector<1x1x1x4xf32>
    tpu.vector_store %arg2[%c0_435, %c5_436, %c1_437, %c0_438], %349 {strides = array<i32>} : memref<1x7x7x4xf32, #tpu.memory_space<vmem>>, vector<1x1x1x4xf32>,
    %c4_439 = arith.constant 4 : index
    %c0_440 = arith.constant 0 : index
    %350 = vector.load %arg3[%c4_439, %c0_440] : memref<16x4xf32, #tpu.memory_space<vmem>>, vector<1x4xf32>
    %c5_441 = arith.constant 5 : index
    %c0_442 = arith.constant 0 : index
    %351 = vector.load %arg3[%c5_441, %c0_442] : memref<16x4xf32, #tpu.memory_space<vmem>>, vector<1x4xf32>
    %352 = arith.maximumf %350, %351 : vector<1x4xf32>
    %c6_443 = arith.constant 6 : index
    %c0_444 = arith.constant 0 : index
    %353 = vector.load %arg3[%c6_443, %c0_444] : memref<16x4xf32, #tpu.memory_space<vmem>>, vector<1x4xf32>
    %354 = arith.maximumf %352, %353 : vector<1x4xf32>
    %c0_445 = arith.constant 0 : index
    %c5_446 = arith.constant 5 : index
    %c2_447 = arith.constant 2 : index
    %c0_448 = arith.constant 0 : index
    %355 = vector.load %arg2[%c0_445, %c5_446, %c2_447, %c0_448] : memref<1x7x7x4xf32, #tpu.memory_space<vmem>>, vector<1x1x1x4xf32>
    %356 = vector.shape_cast %355 : vector<1x1x1x4xf32> to vector<1x4xf32>
    %357 = vector.shape_cast %354 : vector<1x4xf32> to vector<1x1x1x4xf32>
    tpu.vector_store %arg2[%c0_445, %c5_446, %c2_447, %c0_448], %357 {strides = array<i32>} : memref<1x7x7x4xf32, #tpu.memory_space<vmem>>, vector<1x1x1x4xf32>,
    %c6_449 = arith.constant 6 : index
    %c0_450 = arith.constant 0 : index
    %358 = vector.load %arg3[%c6_449, %c0_450] : memref<16x4xf32, #tpu.memory_space<vmem>>, vector<1x4xf32>
    %c7_451 = arith.constant 7 : index
    %c0_452 = arith.constant 0 : index
    %359 = vector.load %arg3[%c7_451, %c0_452] : memref<16x4xf32, #tpu.memory_space<vmem>>, vector<1x4xf32>
    %360 = arith.maximumf %358, %359 : vector<1x4xf32>
    %c8_453 = arith.constant 8 : index
    %c0_454 = arith.constant 0 : index
    %361 = vector.load %arg3[%c8_453, %c0_454] : memref<16x4xf32, #tpu.memory_space<vmem>>, vector<1x4xf32>
    %362 = arith.maximumf %360, %361 : vector<1x4xf32>
    %c0_455 = arith.constant 0 : index
    %c5_456 = arith.constant 5 : index
    %c3_457 = arith.constant 3 : index
    %c0_458 = arith.constant 0 : index
    %363 = vector.load %arg2[%c0_455, %c5_456, %c3_457, %c0_458] : memref<1x7x7x4xf32, #tpu.memory_space<vmem>>, vector<1x1x1x4xf32>
    %364 = vector.shape_cast %363 : vector<1x1x1x4xf32> to vector<1x4xf32>
    %365 = vector.shape_cast %362 : vector<1x4xf32> to vector<1x1x1x4xf32>
    tpu.vector_store %arg2[%c0_455, %c5_456, %c3_457, %c0_458], %365 {strides = array<i32>} : memref<1x7x7x4xf32, #tpu.memory_space<vmem>>, vector<1x1x1x4xf32>,
    %c8_459 = arith.constant 8 : index
    %c0_460 = arith.constant 0 : index
    %366 = vector.load %arg3[%c8_459, %c0_460] : memref<16x4xf32, #tpu.memory_space<vmem>>, vector<1x4xf32>
    %c9_461 = arith.constant 9 : index
    %c0_462 = arith.constant 0 : index
    %367 = vector.load %arg3[%c9_461, %c0_462] : memref<16x4xf32, #tpu.memory_space<vmem>>, vector<1x4xf32>
    %368 = arith.maximumf %366, %367 : vector<1x4xf32>
    %c10_463 = arith.constant 10 : index
    %c0_464 = arith.constant 0 : index
    %369 = vector.load %arg3[%c10_463, %c0_464] : memref<16x4xf32, #tpu.memory_space<vmem>>, vector<1x4xf32>
    %370 = arith.maximumf %368, %369 : vector<1x4xf32>
    %c0_465 = arith.constant 0 : index
    %c5_466 = arith.constant 5 : index
    %c4_467 = arith.constant 4 : index
    %c0_468 = arith.constant 0 : index
    %371 = vector.load %arg2[%c0_465, %c5_466, %c4_467, %c0_468] : memref<1x7x7x4xf32, #tpu.memory_space<vmem>>, vector<1x1x1x4xf32>
    %372 = vector.shape_cast %371 : vector<1x1x1x4xf32> to vector<1x4xf32>
    %373 = vector.shape_cast %370 : vector<1x4xf32> to vector<1x1x1x4xf32>
    tpu.vector_store %arg2[%c0_465, %c5_466, %c4_467, %c0_468], %373 {strides = array<i32>} : memref<1x7x7x4xf32, #tpu.memory_space<vmem>>, vector<1x1x1x4xf32>,
    %c10_469 = arith.constant 10 : index
    %c0_470 = arith.constant 0 : index
    %374 = vector.load %arg3[%c10_469, %c0_470] : memref<16x4xf32, #tpu.memory_space<vmem>>, vector<1x4xf32>
    %c11_471 = arith.constant 11 : index
    %c0_472 = arith.constant 0 : index
    %375 = vector.load %arg3[%c11_471, %c0_472] : memref<16x4xf32, #tpu.memory_space<vmem>>, vector<1x4xf32>
    %376 = arith.maximumf %374, %375 : vector<1x4xf32>
    %c12_473 = arith.constant 12 : index
    %c0_474 = arith.constant 0 : index
    %377 = vector.load %arg3[%c12_473, %c0_474] : memref<16x4xf32, #tpu.memory_space<vmem>>, vector<1x4xf32>
    %378 = arith.maximumf %376, %377 : vector<1x4xf32>
    %c0_475 = arith.constant 0 : index
    %c5_476 = arith.constant 5 : index
    %c5_477 = arith.constant 5 : index
    %c0_478 = arith.constant 0 : index
    %379 = vector.load %arg2[%c0_475, %c5_476, %c5_477, %c0_478] : memref<1x7x7x4xf32, #tpu.memory_space<vmem>>, vector<1x1x1x4xf32>
    %380 = vector.shape_cast %379 : vector<1x1x1x4xf32> to vector<1x4xf32>
    %381 = vector.shape_cast %378 : vector<1x4xf32> to vector<1x1x1x4xf32>
    tpu.vector_store %arg2[%c0_475, %c5_476, %c5_477, %c0_478], %381 {strides = array<i32>} : memref<1x7x7x4xf32, #tpu.memory_space<vmem>>, vector<1x1x1x4xf32>,
    %c12_479 = arith.constant 12 : index
    %c0_480 = arith.constant 0 : index
    %382 = vector.load %arg3[%c12_479, %c0_480] : memref<16x4xf32, #tpu.memory_space<vmem>>, vector<1x4xf32>
    %c13_481 = arith.constant 13 : index
    %c0_482 = arith.constant 0 : index
    %383 = vector.load %arg3[%c13_481, %c0_482] : memref<16x4xf32, #tpu.memory_space<vmem>>, vector<1x4xf32>
    %384 = arith.maximumf %382, %383 : vector<1x4xf32>
    %c14_483 = arith.constant 14 : index
    %c0_484 = arith.constant 0 : index
    %385 = vector.load %arg3[%c14_483, %c0_484] : memref<16x4xf32, #tpu.memory_space<vmem>>, vector<1x4xf32>
    %386 = arith.maximumf %384, %385 : vector<1x4xf32>
    %c0_485 = arith.constant 0 : index
    %c5_486 = arith.constant 5 : index
    %c6_487 = arith.constant 6 : index
    %c0_488 = arith.constant 0 : index
    %387 = vector.load %arg2[%c0_485, %c5_486, %c6_487, %c0_488] : memref<1x7x7x4xf32, #tpu.memory_space<vmem>>, vector<1x1x1x4xf32>
    %388 = vector.shape_cast %387 : vector<1x1x1x4xf32> to vector<1x4xf32>
    %389 = vector.shape_cast %386 : vector<1x4xf32> to vector<1x1x1x4xf32>
    tpu.vector_store %arg2[%c0_485, %c5_486, %c6_487, %c0_488], %389 {strides = array<i32>} : memref<1x7x7x4xf32, #tpu.memory_space<vmem>>, vector<1x1x1x4xf32>,
    %c0_489 = arith.constant 0 : index
    %c12_490 = arith.constant 12 : index
    %c0_491 = arith.constant 0 : index
    %c0_492 = arith.constant 0 : index
    %390 = vector.load %arg1[%c0_489, %c12_490, %c0_491, %c0_492] : memref<1x16x16x4xf32, #tpu.memory_space<vmem>>, vector<1x1x16x4xf32>
    %391 = vector.shape_cast %390 : vector<1x1x16x4xf32> to vector<16x4xf32>
    %c0_493 = arith.constant 0 : index
    %c13_494 = arith.constant 13 : index
    %c0_495 = arith.constant 0 : index
    %c0_496 = arith.constant 0 : index
    %392 = vector.load %arg1[%c0_493, %c13_494, %c0_495, %c0_496] : memref<1x16x16x4xf32, #tpu.memory_space<vmem>>, vector<1x1x16x4xf32>
    %393 = vector.shape_cast %392 : vector<1x1x16x4xf32> to vector<16x4xf32>
    %394 = arith.maximumf %391, %393 : vector<16x4xf32>
    %c0_497 = arith.constant 0 : index
    %c14_498 = arith.constant 14 : index
    %c0_499 = arith.constant 0 : index
    %c0_500 = arith.constant 0 : index
    %395 = vector.load %arg1[%c0_497, %c14_498, %c0_499, %c0_500] : memref<1x16x16x4xf32, #tpu.memory_space<vmem>>, vector<1x1x16x4xf32>
    %396 = vector.shape_cast %395 : vector<1x1x16x4xf32> to vector<16x4xf32>
    %397 = arith.maximumf %394, %396 : vector<16x4xf32>
    %c0_501 = arith.constant 0 : index
    %c0_502 = arith.constant 0 : index
    %398 = vector.load %arg3[%c0_501, %c0_502] : memref<16x4xf32, #tpu.memory_space<vmem>>, vector<16x4xf32>
    tpu.vector_store %arg3[%c0_501, %c0_502], %397 {strides = array<i32>} : memref<16x4xf32, #tpu.memory_space<vmem>>, vector<16x4xf32>,
    %c0_503 = arith.constant 0 : index
    %c0_504 = arith.constant 0 : index
    %399 = vector.load %arg3[%c0_503, %c0_504] : memref<16x4xf32, #tpu.memory_space<vmem>>, vector<1x4xf32>
    %c1_505 = arith.constant 1 : index
    %c0_506 = arith.constant 0 : index
    %400 = vector.load %arg3[%c1_505, %c0_506] : memref<16x4xf32, #tpu.memory_space<vmem>>, vector<1x4xf32>
    %401 = arith.maximumf %399, %400 : vector<1x4xf32>
    %c2_507 = arith.constant 2 : index
    %c0_508 = arith.constant 0 : index
    %402 = vector.load %arg3[%c2_507, %c0_508] : memref<16x4xf32, #tpu.memory_space<vmem>>, vector<1x4xf32>
    %403 = arith.maximumf %401, %402 : vector<1x4xf32>
    %c0_509 = arith.constant 0 : index
    %c6_510 = arith.constant 6 : index
    %c0_511 = arith.constant 0 : index
    %c0_512 = arith.constant 0 : index
    %404 = vector.load %arg2[%c0_509, %c6_510, %c0_511, %c0_512] : memref<1x7x7x4xf32, #tpu.memory_space<vmem>>, vector<1x1x1x4xf32>
    %405 = vector.shape_cast %404 : vector<1x1x1x4xf32> to vector<1x4xf32>
    %406 = vector.shape_cast %403 : vector<1x4xf32> to vector<1x1x1x4xf32>
    tpu.vector_store %arg2[%c0_509, %c6_510, %c0_511, %c0_512], %406 {strides = array<i32>} : memref<1x7x7x4xf32, #tpu.memory_space<vmem>>, vector<1x1x1x4xf32>,
    %c2_513 = arith.constant 2 : index
    %c0_514 = arith.constant 0 : index
    %407 = vector.load %arg3[%c2_513, %c0_514] : memref<16x4xf32, #tpu.memory_space<vmem>>, vector<1x4xf32>
    %c3_515 = arith.constant 3 : index
    %c0_516 = arith.constant 0 : index
    %408 = vector.load %arg3[%c3_515, %c0_516] : memref<16x4xf32, #tpu.memory_space<vmem>>, vector<1x4xf32>
    %409 = arith.maximumf %407, %408 : vector<1x4xf32>
    %c4_517 = arith.constant 4 : index
    %c0_518 = arith.constant 0 : index
    %410 = vector.load %arg3[%c4_517, %c0_518] : memref<16x4xf32, #tpu.memory_space<vmem>>, vector<1x4xf32>
    %411 = arith.maximumf %409, %410 : vector<1x4xf32>
    %c0_519 = arith.constant 0 : index
    %c6_520 = arith.constant 6 : index
    %c1_521 = arith.constant 1 : index
    %c0_522 = arith.constant 0 : index
    %412 = vector.load %arg2[%c0_519, %c6_520, %c1_521, %c0_522] : memref<1x7x7x4xf32, #tpu.memory_space<vmem>>, vector<1x1x1x4xf32>
    %413 = vector.shape_cast %412 : vector<1x1x1x4xf32> to vector<1x4xf32>
    %414 = vector.shape_cast %411 : vector<1x4xf32> to vector<1x1x1x4xf32>
    tpu.vector_store %arg2[%c0_519, %c6_520, %c1_521, %c0_522], %414 {strides = array<i32>} : memref<1x7x7x4xf32, #tpu.memory_space<vmem>>, vector<1x1x1x4xf32>,
    %c4_523 = arith.constant 4 : index
    %c0_524 = arith.constant 0 : index
    %415 = vector.load %arg3[%c4_523, %c0_524] : memref<16x4xf32, #tpu.memory_space<vmem>>, vector<1x4xf32>
    %c5_525 = arith.constant 5 : index
    %c0_526 = arith.constant 0 : index
    %416 = vector.load %arg3[%c5_525, %c0_526] : memref<16x4xf32, #tpu.memory_space<vmem>>, vector<1x4xf32>
    %417 = arith.maximumf %415, %416 : vector<1x4xf32>
    %c6_527 = arith.constant 6 : index
    %c0_528 = arith.constant 0 : index
    %418 = vector.load %arg3[%c6_527, %c0_528] : memref<16x4xf32, #tpu.memory_space<vmem>>, vector<1x4xf32>
    %419 = arith.maximumf %417, %418 : vector<1x4xf32>
    %c0_529 = arith.constant 0 : index
    %c6_530 = arith.constant 6 : index
    %c2_531 = arith.constant 2 : index
    %c0_532 = arith.constant 0 : index
    %420 = vector.load %arg2[%c0_529, %c6_530, %c2_531, %c0_532] : memref<1x7x7x4xf32, #tpu.memory_space<vmem>>, vector<1x1x1x4xf32>
    %421 = vector.shape_cast %420 : vector<1x1x1x4xf32> to vector<1x4xf32>
    %422 = vector.shape_cast %419 : vector<1x4xf32> to vector<1x1x1x4xf32>
    tpu.vector_store %arg2[%c0_529, %c6_530, %c2_531, %c0_532], %422 {strides = array<i32>} : memref<1x7x7x4xf32, #tpu.memory_space<vmem>>, vector<1x1x1x4xf32>,
    %c6_533 = arith.constant 6 : index
    %c0_534 = arith.constant 0 : index
    %423 = vector.load %arg3[%c6_533, %c0_534] : memref<16x4xf32, #tpu.memory_space<vmem>>, vector<1x4xf32>
    %c7_535 = arith.constant 7 : index
    %c0_536 = arith.constant 0 : index
    %424 = vector.load %arg3[%c7_535, %c0_536] : memref<16x4xf32, #tpu.memory_space<vmem>>, vector<1x4xf32>
    %425 = arith.maximumf %423, %424 : vector<1x4xf32>
    %c8_537 = arith.constant 8 : index
    %c0_538 = arith.constant 0 : index
    %426 = vector.load %arg3[%c8_537, %c0_538] : memref<16x4xf32, #tpu.memory_space<vmem>>, vector<1x4xf32>
    %427 = arith.maximumf %425, %426 : vector<1x4xf32>
    %c0_539 = arith.constant 0 : index
    %c6_540 = arith.constant 6 : index
    %c3_541 = arith.constant 3 : index
    %c0_542 = arith.constant 0 : index
    %428 = vector.load %arg2[%c0_539, %c6_540, %c3_541, %c0_542] : memref<1x7x7x4xf32, #tpu.memory_space<vmem>>, vector<1x1x1x4xf32>
    %429 = vector.shape_cast %428 : vector<1x1x1x4xf32> to vector<1x4xf32>
    %430 = vector.shape_cast %427 : vector<1x4xf32> to vector<1x1x1x4xf32>
    tpu.vector_store %arg2[%c0_539, %c6_540, %c3_541, %c0_542], %430 {strides = array<i32>} : memref<1x7x7x4xf32, #tpu.memory_space<vmem>>, vector<1x1x1x4xf32>,
    %c8_543 = arith.constant 8 : index
    %c0_544 = arith.constant 0 : index
    %431 = vector.load %arg3[%c8_543, %c0_544] : memref<16x4xf32, #tpu.memory_space<vmem>>, vector<1x4xf32>
    %c9_545 = arith.constant 9 : index
    %c0_546 = arith.constant 0 : index
    %432 = vector.load %arg3[%c9_545, %c0_546] : memref<16x4xf32, #tpu.memory_space<vmem>>, vector<1x4xf32>
    %433 = arith.maximumf %431, %432 : vector<1x4xf32>
    %c10_547 = arith.constant 10 : index
    %c0_548 = arith.constant 0 : index
    %434 = vector.load %arg3[%c10_547, %c0_548] : memref<16x4xf32, #tpu.memory_space<vmem>>, vector<1x4xf32>
    %435 = arith.maximumf %433, %434 : vector<1x4xf32>
    %c0_549 = arith.constant 0 : index
    %c6_550 = arith.constant 6 : index
    %c4_551 = arith.constant 4 : index
    %c0_552 = arith.constant 0 : index
    %436 = vector.load %arg2[%c0_549, %c6_550, %c4_551, %c0_552] : memref<1x7x7x4xf32, #tpu.memory_space<vmem>>, vector<1x1x1x4xf32>
    %437 = vector.shape_cast %436 : vector<1x1x1x4xf32> to vector<1x4xf32>
    %438 = vector.shape_cast %435 : vector<1x4xf32> to vector<1x1x1x4xf32>
    tpu.vector_store %arg2[%c0_549, %c6_550, %c4_551, %c0_552], %438 {strides = array<i32>} : memref<1x7x7x4xf32, #tpu.memory_space<vmem>>, vector<1x1x1x4xf32>,
    %c10_553 = arith.constant 10 : index
    %c0_554 = arith.constant 0 : index
    %439 = vector.load %arg3[%c10_553, %c0_554] : memref<16x4xf32, #tpu.memory_space<vmem>>, vector<1x4xf32>
    %c11_555 = arith.constant 11 : index
    %c0_556 = arith.constant 0 : index
    %440 = vector.load %arg3[%c11_555, %c0_556] : memref<16x4xf32, #tpu.memory_space<vmem>>, vector<1x4xf32>
    %441 = arith.maximumf %439, %440 : vector<1x4xf32>
    %c12_557 = arith.constant 12 : index
    %c0_558 = arith.constant 0 : index
    %442 = vector.load %arg3[%c12_557, %c0_558] : memref<16x4xf32, #tpu.memory_space<vmem>>, vector<1x4xf32>
    %443 = arith.maximumf %441, %442 : vector<1x4xf32>
    %c0_559 = arith.constant 0 : index
    %c6_560 = arith.constant 6 : index
    %c5_561 = arith.constant 5 : index
    %c0_562 = arith.constant 0 : index
    %444 = vector.load %arg2[%c0_559, %c6_560, %c5_561, %c0_562] : memref<1x7x7x4xf32, #tpu.memory_space<vmem>>, vector<1x1x1x4xf32>
    %445 = vector.shape_cast %444 : vector<1x1x1x4xf32> to vector<1x4xf32>
    %446 = vector.shape_cast %443 : vector<1x4xf32> to vector<1x1x1x4xf32>
    tpu.vector_store %arg2[%c0_559, %c6_560, %c5_561, %c0_562], %446 {strides = array<i32>} : memref<1x7x7x4xf32, #tpu.memory_space<vmem>>, vector<1x1x1x4xf32>,
    %c12_563 = arith.constant 12 : index
    %c0_564 = arith.constant 0 : index
    %447 = vector.load %arg3[%c12_563, %c0_564] : memref<16x4xf32, #tpu.memory_space<vmem>>, vector<1x4xf32>
    %c13_565 = arith.constant 13 : index
    %c0_566 = arith.constant 0 : index
    %448 = vector.load %arg3[%c13_565, %c0_566] : memref<16x4xf32, #tpu.memory_space<vmem>>, vector<1x4xf32>
    %449 = arith.maximumf %447, %448 : vector<1x4xf32>
    %c14_567 = arith.constant 14 : index
    %c0_568 = arith.constant 0 : index
    %450 = vector.load %arg3[%c14_567, %c0_568] : memref<16x4xf32, #tpu.memory_space<vmem>>, vector<1x4xf32>
    %451 = arith.maximumf %449, %450 : vector<1x4xf32>
    %c0_569 = arith.constant 0 : index
    %c6_570 = arith.constant 6 : index
    %c6_571 = arith.constant 6 : index
    %c0_572 = arith.constant 0 : index
    %452 = vector.load %arg2[%c0_569, %c6_570, %c6_571, %c0_572] : memref<1x7x7x4xf32, #tpu.memory_space<vmem>>, vector<1x1x1x4xf32>
    %453 = vector.shape_cast %452 : vector<1x1x1x4xf32> to vector<1x4xf32>
    %454 = vector.shape_cast %451 : vector<1x4xf32> to vector<1x1x1x4xf32>
    tpu.vector_store %arg2[%c0_569, %c6_570, %c6_571, %c0_572], %454 {strides = array<i32>} : memref<1x7x7x4xf32, #tpu.memory_space<vmem>>, vector<1x1x1x4xf32>,
    return
  }
  func.func @transform_0(%arg0: i32) -> (i32, i32, i32, i32) {
    %c0_i32 = arith.constant 0 : i32
    %c0_i32_0 = arith.constant 0 : i32
    %c0_i32_1 = arith.constant 0 : i32
    %c0_i32_2 = arith.constant 0 : i32
    return %arg0, %c0_i32, %c0_i32_0, %c0_i32_1 : i32, i32, i32, i32
  }
  func.func @transform_1(%arg0: i32) -> (i32, i32, i32, i32) {
    %c0_i32 = arith.constant 0 : i32
    %c0_i32_0 = arith.constant 0 : i32
    %c0_i32_1 = arith.constant 0 : i32
    %c0_i32_2 = arith.constant 0 : i32
    return %arg0, %c0_i32, %c0_i32_0, %c0_i32_1 : i32, i32, i32, i32
  }
}

module attributes {stable_mosaic.version = 11 : i64} {
  func.func @kernel(%arg0: i32, %arg1: memref<1x129x16xbf16, #tpu.memory_space<vmem>>, %arg2: memref<6x16x8xbf16, #tpu.memory_space<vmem>>, %arg3: memref<1x8xf32, #tpu.memory_space<vmem>>, %arg4: memref<1x112x8xbf16, #tpu.memory_space<vmem>>) attributes {dimension_semantics = [#tpu.dimension_semantics<parallel>], iteration_bounds = array<i64: 2>, scalar_prefetch = 0 : i64, scratch_operands = 0 : i64, tpu.core_type = #tpu.core_type<tc>, window_params = [{transform_indices = @transform_0, window_bounds = array<i64: 1, 129, 16>}, {pipeline_mode = #tpu.pipeline_mode<synchronous>, transform_indices = @transform_1, window_bounds = array<i64: 6, 16, 8>}, {pipeline_mode = #tpu.pipeline_mode<synchronous>, transform_indices = @transform_2, window_bounds = array<i64: 1, 8>}, {transform_indices = @transform_3, window_bounds = array<i64: 1, 112, 8>}]} {
    %c0 = arith.constant 0 : index
    %c0_0 = arith.constant 0 : index
    %c0_1 = arith.constant 0 : index
    %0 = vector.load %arg1[%c0, %c0_0, %c0_1] : memref<1x129x16xbf16, #tpu.memory_space<vmem>>, vector<1x112x16xbf16>
    %1 = vector.shape_cast %0 : vector<1x112x16xbf16> to vector<112x16xbf16>
    %c0_2 = arith.constant 0 : index
    %c0_3 = arith.constant 0 : index
    %c0_4 = arith.constant 0 : index
    %2 = vector.load %arg2[%c0_2, %c0_3, %c0_4] : memref<6x16x8xbf16, #tpu.memory_space<vmem>>, vector<1x16x8xbf16>
    %3 = vector.shape_cast %2 : vector<1x16x8xbf16> to vector<16x8xbf16>
    %cst = arith.constant dense<0.000000e+00> : vector<112x8xf32>
    %4 = tpu.matmul %1, %3, %cst {dimension_numbers = #tpu.dot_dimension_numbers<[1], [0], [0], [1], [0, 0, 1, 1], [], []>} : vector<112x16xbf16>, vector<16x8xbf16>, vector<112x8xf32> -> vector<112x8xf32>
    %c0_5 = arith.constant 0 : index
    %c1 = arith.constant 1 : index
    %c0_6 = arith.constant 0 : index
    %5 = vector.load %arg1[%c0_5, %c1, %c0_6] : memref<1x129x16xbf16, #tpu.memory_space<vmem>>, vector<1x112x16xbf16>
    %6 = vector.shape_cast %5 : vector<1x112x16xbf16> to vector<112x16xbf16>
    %c1_7 = arith.constant 1 : index
    %c0_8 = arith.constant 0 : index
    %c0_9 = arith.constant 0 : index
    %7 = vector.load %arg2[%c1_7, %c0_8, %c0_9] : memref<6x16x8xbf16, #tpu.memory_space<vmem>>, vector<1x16x8xbf16>
    %8 = vector.shape_cast %7 : vector<1x16x8xbf16> to vector<16x8xbf16>
    %cst_10 = arith.constant dense<0.000000e+00> : vector<112x8xf32>
    %9 = tpu.matmul %6, %8, %cst_10 {dimension_numbers = #tpu.dot_dimension_numbers<[1], [0], [0], [1], [0, 0, 1, 1], [], []>} : vector<112x16xbf16>, vector<16x8xbf16>, vector<112x8xf32> -> vector<112x8xf32>
    %10 = arith.addf %4, %9 : vector<112x8xf32>
    %c0_11 = arith.constant 0 : index
    %c8 = arith.constant 8 : index
    %c0_12 = arith.constant 0 : index
    %11 = vector.load %arg1[%c0_11, %c8, %c0_12] : memref<1x129x16xbf16, #tpu.memory_space<vmem>>, vector<1x112x16xbf16>
    %12 = vector.shape_cast %11 : vector<1x112x16xbf16> to vector<112x16xbf16>
    %c2 = arith.constant 2 : index
    %c0_13 = arith.constant 0 : index
    %c0_14 = arith.constant 0 : index
    %13 = vector.load %arg2[%c2, %c0_13, %c0_14] : memref<6x16x8xbf16, #tpu.memory_space<vmem>>, vector<1x16x8xbf16>
    %14 = vector.shape_cast %13 : vector<1x16x8xbf16> to vector<16x8xbf16>
    %cst_15 = arith.constant dense<0.000000e+00> : vector<112x8xf32>
    %15 = tpu.matmul %12, %14, %cst_15 {dimension_numbers = #tpu.dot_dimension_numbers<[1], [0], [0], [1], [0, 0, 1, 1], [], []>} : vector<112x16xbf16>, vector<16x8xbf16>, vector<112x8xf32> -> vector<112x8xf32>
    %16 = arith.addf %10, %15 : vector<112x8xf32>
    %c0_16 = arith.constant 0 : index
    %c9 = arith.constant 9 : index
    %c0_17 = arith.constant 0 : index
    %17 = vector.load %arg1[%c0_16, %c9, %c0_17] : memref<1x129x16xbf16, #tpu.memory_space<vmem>>, vector<1x112x16xbf16>
    %18 = vector.shape_cast %17 : vector<1x112x16xbf16> to vector<112x16xbf16>
    %c3 = arith.constant 3 : index
    %c0_18 = arith.constant 0 : index
    %c0_19 = arith.constant 0 : index
    %19 = vector.load %arg2[%c3, %c0_18, %c0_19] : memref<6x16x8xbf16, #tpu.memory_space<vmem>>, vector<1x16x8xbf16>
    %20 = vector.shape_cast %19 : vector<1x16x8xbf16> to vector<16x8xbf16>
    %cst_20 = arith.constant dense<0.000000e+00> : vector<112x8xf32>
    %21 = tpu.matmul %18, %20, %cst_20 {dimension_numbers = #tpu.dot_dimension_numbers<[1], [0], [0], [1], [0, 0, 1, 1], [], []>} : vector<112x16xbf16>, vector<16x8xbf16>, vector<112x8xf32> -> vector<112x8xf32>
    %22 = arith.addf %16, %21 : vector<112x8xf32>
    %c0_21 = arith.constant 0 : index
    %c16 = arith.constant 16 : index
    %c0_22 = arith.constant 0 : index
    %23 = vector.load %arg1[%c0_21, %c16, %c0_22] : memref<1x129x16xbf16, #tpu.memory_space<vmem>>, vector<1x112x16xbf16>
    %24 = vector.shape_cast %23 : vector<1x112x16xbf16> to vector<112x16xbf16>
    %c4 = arith.constant 4 : index
    %c0_23 = arith.constant 0 : index
    %c0_24 = arith.constant 0 : index
    %25 = vector.load %arg2[%c4, %c0_23, %c0_24] : memref<6x16x8xbf16, #tpu.memory_space<vmem>>, vector<1x16x8xbf16>
    %26 = vector.shape_cast %25 : vector<1x16x8xbf16> to vector<16x8xbf16>
    %cst_25 = arith.constant dense<0.000000e+00> : vector<112x8xf32>
    %27 = tpu.matmul %24, %26, %cst_25 {dimension_numbers = #tpu.dot_dimension_numbers<[1], [0], [0], [1], [0, 0, 1, 1], [], []>} : vector<112x16xbf16>, vector<16x8xbf16>, vector<112x8xf32> -> vector<112x8xf32>
    %28 = arith.addf %22, %27 : vector<112x8xf32>
    %c0_26 = arith.constant 0 : index
    %c17 = arith.constant 17 : index
    %c0_27 = arith.constant 0 : index
    %29 = vector.load %arg1[%c0_26, %c17, %c0_27] : memref<1x129x16xbf16, #tpu.memory_space<vmem>>, vector<1x112x16xbf16>
    %30 = vector.shape_cast %29 : vector<1x112x16xbf16> to vector<112x16xbf16>
    %c5 = arith.constant 5 : index
    %c0_28 = arith.constant 0 : index
    %c0_29 = arith.constant 0 : index
    %31 = vector.load %arg2[%c5, %c0_28, %c0_29] : memref<6x16x8xbf16, #tpu.memory_space<vmem>>, vector<1x16x8xbf16>
    %32 = vector.shape_cast %31 : vector<1x16x8xbf16> to vector<16x8xbf16>
    %cst_30 = arith.constant dense<0.000000e+00> : vector<112x8xf32>
    %33 = tpu.matmul %30, %32, %cst_30 {dimension_numbers = #tpu.dot_dimension_numbers<[1], [0], [0], [1], [0, 0, 1, 1], [], []>} : vector<112x16xbf16>, vector<16x8xbf16>, vector<112x8xf32> -> vector<112x8xf32>
    %34 = arith.addf %28, %33 : vector<112x8xf32>
    %c0_31 = arith.constant 0 : index
    %c0_32 = arith.constant 0 : index
    %35 = vector.load %arg3[%c0_31, %c0_32] : memref<1x8xf32, #tpu.memory_space<vmem>>, vector<1x8xf32>
    %36 = vector.broadcast %35 : vector<1x8xf32> to vector<112x8xf32>
    %37 = arith.addf %34, %36 : vector<112x8xf32>
    %cst_33 = arith.constant 0.000000e+00 : f32
    %38 = vector.broadcast %cst_33 : f32 to vector<112x8xf32>
    %39 = arith.maximumf %37, %38 : vector<112x8xf32>
    %40 = arith.truncf %39 : vector<112x8xf32> to vector<112x8xbf16>
    %c0_34 = arith.constant 0 : index
    %c0_35 = arith.constant 0 : index
    %c0_36 = arith.constant 0 : index
    %41 = vector.load %arg4[%c0_34, %c0_35, %c0_36] : memref<1x112x8xbf16, #tpu.memory_space<vmem>>, vector<1x112x8xbf16>
    %42 = vector.shape_cast %41 : vector<1x112x8xbf16> to vector<112x8xbf16>
    %43 = vector.shape_cast %40 : vector<112x8xbf16> to vector<1x112x8xbf16>
    tpu.vector_store %arg4[%c0_34, %c0_35, %c0_36], %43 {strides = array<i32>} : memref<1x112x8xbf16, #tpu.memory_space<vmem>>, vector<1x112x8xbf16>,
    return
  }
  func.func @transform_0(%arg0: i32) -> (i32, i32, i32) {
    %c0_i32 = arith.constant 0 : i32
    %c0_i32_0 = arith.constant 0 : i32
    %c0_i32_1 = arith.constant 0 : i32
    return %arg0, %c0_i32, %c0_i32_0 : i32, i32, i32
  }
  func.func @transform_1(%arg0: i32) -> (i32, i32, i32) {
    %c0_i32 = arith.constant 0 : i32
    %c0_i32_0 = arith.constant 0 : i32
    %c0_i32_1 = arith.constant 0 : i32
    %c0_i32_2 = arith.constant 0 : i32
    return %c0_i32, %c0_i32_0, %c0_i32_1 : i32, i32, i32
  }
  func.func @transform_2(%arg0: i32) -> (i32, i32) {
    %c0_i32 = arith.constant 0 : i32
    %c0_i32_0 = arith.constant 0 : i32
    %c0_i32_1 = arith.constant 0 : i32
    return %c0_i32, %c0_i32_0 : i32, i32
  }
  func.func @transform_3(%arg0: i32) -> (i32, i32, i32) {
    %c0_i32 = arith.constant 0 : i32
    %c0_i32_0 = arith.constant 0 : i32
    %c0_i32_1 = arith.constant 0 : i32
    return %arg0, %c0_i32, %c0_i32_0 : i32, i32, i32
  }
}

module attributes {stable_mosaic.version = 11 : i64} {
  func.func @kernel(%arg0: i32, %arg1: memref<1x326x8xbf16, #tpu.memory_space<vmem>>, %arg2: memref<9x8x8xbf16, #tpu.memory_space<vmem>>, %arg3: memref<1x8xf32, #tpu.memory_space<vmem>>, %arg4: memref<1x288x8xbf16, #tpu.memory_space<vmem>>) attributes {dimension_semantics = [#tpu.dimension_semantics<parallel>], iteration_bounds = array<i64: 2>, scalar_prefetch = 0 : i64, scratch_operands = 0 : i64, tpu.core_type = #tpu.core_type<tc>, window_params = [{transform_indices = @transform_0, window_bounds = array<i64: 1, 326, 8>}, {pipeline_mode = #tpu.pipeline_mode<synchronous>, transform_indices = @transform_1, window_bounds = array<i64: 9, 8, 8>}, {pipeline_mode = #tpu.pipeline_mode<synchronous>, transform_indices = @transform_2, window_bounds = array<i64: 1, 8>}, {transform_indices = @transform_3, window_bounds = array<i64: 1, 288, 8>}]} {
    %c0 = arith.constant 0 : index
    %c0_0 = arith.constant 0 : index
    %c0_1 = arith.constant 0 : index
    %0 = vector.load %arg1[%c0, %c0_0, %c0_1] : memref<1x326x8xbf16, #tpu.memory_space<vmem>>, vector<1x288x8xbf16>
    %1 = vector.shape_cast %0 : vector<1x288x8xbf16> to vector<288x8xbf16>
    %c0_2 = arith.constant 0 : index
    %c0_3 = arith.constant 0 : index
    %c0_4 = arith.constant 0 : index
    %2 = vector.load %arg2[%c0_2, %c0_3, %c0_4] : memref<9x8x8xbf16, #tpu.memory_space<vmem>>, vector<1x8x8xbf16>
    %3 = vector.shape_cast %2 : vector<1x8x8xbf16> to vector<8x8xbf16>
    %cst = arith.constant dense<0.000000e+00> : vector<288x8xf32>
    %4 = tpu.matmul %1, %3, %cst {dimension_numbers = #tpu.dot_dimension_numbers<[1], [0], [0], [1], [0, 0, 1, 1], [], []>} : vector<288x8xbf16>, vector<8x8xbf16>, vector<288x8xf32> -> vector<288x8xf32>
    %c0_5 = arith.constant 0 : index
    %c1 = arith.constant 1 : index
    %c0_6 = arith.constant 0 : index
    %5 = vector.load %arg1[%c0_5, %c1, %c0_6] : memref<1x326x8xbf16, #tpu.memory_space<vmem>>, vector<1x288x8xbf16>
    %6 = vector.shape_cast %5 : vector<1x288x8xbf16> to vector<288x8xbf16>
    %c1_7 = arith.constant 1 : index
    %c0_8 = arith.constant 0 : index
    %c0_9 = arith.constant 0 : index
    %7 = vector.load %arg2[%c1_7, %c0_8, %c0_9] : memref<9x8x8xbf16, #tpu.memory_space<vmem>>, vector<1x8x8xbf16>
    %8 = vector.shape_cast %7 : vector<1x8x8xbf16> to vector<8x8xbf16>
    %cst_10 = arith.constant dense<0.000000e+00> : vector<288x8xf32>
    %9 = tpu.matmul %6, %8, %cst_10 {dimension_numbers = #tpu.dot_dimension_numbers<[1], [0], [0], [1], [0, 0, 1, 1], [], []>} : vector<288x8xbf16>, vector<8x8xbf16>, vector<288x8xf32> -> vector<288x8xf32>
    %10 = arith.addf %4, %9 : vector<288x8xf32>
    %c0_11 = arith.constant 0 : index
    %c2 = arith.constant 2 : index
    %c0_12 = arith.constant 0 : index
    %11 = vector.load %arg1[%c0_11, %c2, %c0_12] : memref<1x326x8xbf16, #tpu.memory_space<vmem>>, vector<1x288x8xbf16>
    %12 = vector.shape_cast %11 : vector<1x288x8xbf16> to vector<288x8xbf16>
    %c2_13 = arith.constant 2 : index
    %c0_14 = arith.constant 0 : index
    %c0_15 = arith.constant 0 : index
    %13 = vector.load %arg2[%c2_13, %c0_14, %c0_15] : memref<9x8x8xbf16, #tpu.memory_space<vmem>>, vector<1x8x8xbf16>
    %14 = vector.shape_cast %13 : vector<1x8x8xbf16> to vector<8x8xbf16>
    %cst_16 = arith.constant dense<0.000000e+00> : vector<288x8xf32>
    %15 = tpu.matmul %12, %14, %cst_16 {dimension_numbers = #tpu.dot_dimension_numbers<[1], [0], [0], [1], [0, 0, 1, 1], [], []>} : vector<288x8xbf16>, vector<8x8xbf16>, vector<288x8xf32> -> vector<288x8xf32>
    %16 = arith.addf %10, %15 : vector<288x8xf32>
    %c0_17 = arith.constant 0 : index
    %c18 = arith.constant 18 : index
    %c0_18 = arith.constant 0 : index
    %17 = vector.load %arg1[%c0_17, %c18, %c0_18] : memref<1x326x8xbf16, #tpu.memory_space<vmem>>, vector<1x288x8xbf16>
    %18 = vector.shape_cast %17 : vector<1x288x8xbf16> to vector<288x8xbf16>
    %c3 = arith.constant 3 : index
    %c0_19 = arith.constant 0 : index
    %c0_20 = arith.constant 0 : index
    %19 = vector.load %arg2[%c3, %c0_19, %c0_20] : memref<9x8x8xbf16, #tpu.memory_space<vmem>>, vector<1x8x8xbf16>
    %20 = vector.shape_cast %19 : vector<1x8x8xbf16> to vector<8x8xbf16>
    %cst_21 = arith.constant dense<0.000000e+00> : vector<288x8xf32>
    %21 = tpu.matmul %18, %20, %cst_21 {dimension_numbers = #tpu.dot_dimension_numbers<[1], [0], [0], [1], [0, 0, 1, 1], [], []>} : vector<288x8xbf16>, vector<8x8xbf16>, vector<288x8xf32> -> vector<288x8xf32>
    %22 = arith.addf %16, %21 : vector<288x8xf32>
    %c0_22 = arith.constant 0 : index
    %c19 = arith.constant 19 : index
    %c0_23 = arith.constant 0 : index
    %23 = vector.load %arg1[%c0_22, %c19, %c0_23] : memref<1x326x8xbf16, #tpu.memory_space<vmem>>, vector<1x288x8xbf16>
    %24 = vector.shape_cast %23 : vector<1x288x8xbf16> to vector<288x8xbf16>
    %c4 = arith.constant 4 : index
    %c0_24 = arith.constant 0 : index
    %c0_25 = arith.constant 0 : index
    %25 = vector.load %arg2[%c4, %c0_24, %c0_25] : memref<9x8x8xbf16, #tpu.memory_space<vmem>>, vector<1x8x8xbf16>
    %26 = vector.shape_cast %25 : vector<1x8x8xbf16> to vector<8x8xbf16>
    %cst_26 = arith.constant dense<0.000000e+00> : vector<288x8xf32>
    %27 = tpu.matmul %24, %26, %cst_26 {dimension_numbers = #tpu.dot_dimension_numbers<[1], [0], [0], [1], [0, 0, 1, 1], [], []>} : vector<288x8xbf16>, vector<8x8xbf16>, vector<288x8xf32> -> vector<288x8xf32>
    %28 = arith.addf %22, %27 : vector<288x8xf32>
    %c0_27 = arith.constant 0 : index
    %c20 = arith.constant 20 : index
    %c0_28 = arith.constant 0 : index
    %29 = vector.load %arg1[%c0_27, %c20, %c0_28] : memref<1x326x8xbf16, #tpu.memory_space<vmem>>, vector<1x288x8xbf16>
    %30 = vector.shape_cast %29 : vector<1x288x8xbf16> to vector<288x8xbf16>
    %c5 = arith.constant 5 : index
    %c0_29 = arith.constant 0 : index
    %c0_30 = arith.constant 0 : index
    %31 = vector.load %arg2[%c5, %c0_29, %c0_30] : memref<9x8x8xbf16, #tpu.memory_space<vmem>>, vector<1x8x8xbf16>
    %32 = vector.shape_cast %31 : vector<1x8x8xbf16> to vector<8x8xbf16>
    %cst_31 = arith.constant dense<0.000000e+00> : vector<288x8xf32>
    %33 = tpu.matmul %30, %32, %cst_31 {dimension_numbers = #tpu.dot_dimension_numbers<[1], [0], [0], [1], [0, 0, 1, 1], [], []>} : vector<288x8xbf16>, vector<8x8xbf16>, vector<288x8xf32> -> vector<288x8xf32>
    %34 = arith.addf %28, %33 : vector<288x8xf32>
    %c0_32 = arith.constant 0 : index
    %c36 = arith.constant 36 : index
    %c0_33 = arith.constant 0 : index
    %35 = vector.load %arg1[%c0_32, %c36, %c0_33] : memref<1x326x8xbf16, #tpu.memory_space<vmem>>, vector<1x288x8xbf16>
    %36 = vector.shape_cast %35 : vector<1x288x8xbf16> to vector<288x8xbf16>
    %c6 = arith.constant 6 : index
    %c0_34 = arith.constant 0 : index
    %c0_35 = arith.constant 0 : index
    %37 = vector.load %arg2[%c6, %c0_34, %c0_35] : memref<9x8x8xbf16, #tpu.memory_space<vmem>>, vector<1x8x8xbf16>
    %38 = vector.shape_cast %37 : vector<1x8x8xbf16> to vector<8x8xbf16>
    %cst_36 = arith.constant dense<0.000000e+00> : vector<288x8xf32>
    %39 = tpu.matmul %36, %38, %cst_36 {dimension_numbers = #tpu.dot_dimension_numbers<[1], [0], [0], [1], [0, 0, 1, 1], [], []>} : vector<288x8xbf16>, vector<8x8xbf16>, vector<288x8xf32> -> vector<288x8xf32>
    %40 = arith.addf %34, %39 : vector<288x8xf32>
    %c0_37 = arith.constant 0 : index
    %c37 = arith.constant 37 : index
    %c0_38 = arith.constant 0 : index
    %41 = vector.load %arg1[%c0_37, %c37, %c0_38] : memref<1x326x8xbf16, #tpu.memory_space<vmem>>, vector<1x288x8xbf16>
    %42 = vector.shape_cast %41 : vector<1x288x8xbf16> to vector<288x8xbf16>
    %c7 = arith.constant 7 : index
    %c0_39 = arith.constant 0 : index
    %c0_40 = arith.constant 0 : index
    %43 = vector.load %arg2[%c7, %c0_39, %c0_40] : memref<9x8x8xbf16, #tpu.memory_space<vmem>>, vector<1x8x8xbf16>
    %44 = vector.shape_cast %43 : vector<1x8x8xbf16> to vector<8x8xbf16>
    %cst_41 = arith.constant dense<0.000000e+00> : vector<288x8xf32>
    %45 = tpu.matmul %42, %44, %cst_41 {dimension_numbers = #tpu.dot_dimension_numbers<[1], [0], [0], [1], [0, 0, 1, 1], [], []>} : vector<288x8xbf16>, vector<8x8xbf16>, vector<288x8xf32> -> vector<288x8xf32>
    %46 = arith.addf %40, %45 : vector<288x8xf32>
    %c0_42 = arith.constant 0 : index
    %c38 = arith.constant 38 : index
    %c0_43 = arith.constant 0 : index
    %47 = vector.load %arg1[%c0_42, %c38, %c0_43] : memref<1x326x8xbf16, #tpu.memory_space<vmem>>, vector<1x288x8xbf16>
    %48 = vector.shape_cast %47 : vector<1x288x8xbf16> to vector<288x8xbf16>
    %c8 = arith.constant 8 : index
    %c0_44 = arith.constant 0 : index
    %c0_45 = arith.constant 0 : index
    %49 = vector.load %arg2[%c8, %c0_44, %c0_45] : memref<9x8x8xbf16, #tpu.memory_space<vmem>>, vector<1x8x8xbf16>
    %50 = vector.shape_cast %49 : vector<1x8x8xbf16> to vector<8x8xbf16>
    %cst_46 = arith.constant dense<0.000000e+00> : vector<288x8xf32>
    %51 = tpu.matmul %48, %50, %cst_46 {dimension_numbers = #tpu.dot_dimension_numbers<[1], [0], [0], [1], [0, 0, 1, 1], [], []>} : vector<288x8xbf16>, vector<8x8xbf16>, vector<288x8xf32> -> vector<288x8xf32>
    %52 = arith.addf %46, %51 : vector<288x8xf32>
    %c0_47 = arith.constant 0 : index
    %c0_48 = arith.constant 0 : index
    %53 = vector.load %arg3[%c0_47, %c0_48] : memref<1x8xf32, #tpu.memory_space<vmem>>, vector<1x8xf32>
    %54 = vector.broadcast %53 : vector<1x8xf32> to vector<288x8xf32>
    %55 = arith.addf %52, %54 : vector<288x8xf32>
    %cst_49 = arith.constant 0.000000e+00 : f32
    %56 = vector.broadcast %cst_49 : f32 to vector<288x8xf32>
    %57 = arith.maximumf %55, %56 : vector<288x8xf32>
    %58 = arith.truncf %57 : vector<288x8xf32> to vector<288x8xbf16>
    %c0_50 = arith.constant 0 : index
    %c0_51 = arith.constant 0 : index
    %c0_52 = arith.constant 0 : index
    %59 = vector.load %arg4[%c0_50, %c0_51, %c0_52] : memref<1x288x8xbf16, #tpu.memory_space<vmem>>, vector<1x288x8xbf16>
    %60 = vector.shape_cast %59 : vector<1x288x8xbf16> to vector<288x8xbf16>
    %61 = vector.shape_cast %58 : vector<288x8xbf16> to vector<1x288x8xbf16>
    tpu.vector_store %arg4[%c0_50, %c0_51, %c0_52], %61 {strides = array<i32>} : memref<1x288x8xbf16, #tpu.memory_space<vmem>>, vector<1x288x8xbf16>,
    return
  }
  func.func @transform_0(%arg0: i32) -> (i32, i32, i32) {
    %c0_i32 = arith.constant 0 : i32
    %c0_i32_0 = arith.constant 0 : i32
    %c0_i32_1 = arith.constant 0 : i32
    return %arg0, %c0_i32, %c0_i32_0 : i32, i32, i32
  }
  func.func @transform_1(%arg0: i32) -> (i32, i32, i32) {
    %c0_i32 = arith.constant 0 : i32
    %c0_i32_0 = arith.constant 0 : i32
    %c0_i32_1 = arith.constant 0 : i32
    %c0_i32_2 = arith.constant 0 : i32
    return %c0_i32, %c0_i32_0, %c0_i32_1 : i32, i32, i32
  }
  func.func @transform_2(%arg0: i32) -> (i32, i32) {
    %c0_i32 = arith.constant 0 : i32
    %c0_i32_0 = arith.constant 0 : i32
    %c0_i32_1 = arith.constant 0 : i32
    return %c0_i32, %c0_i32_0 : i32, i32
  }
  func.func @transform_3(%arg0: i32) -> (i32, i32, i32) {
    %c0_i32 = arith.constant 0 : i32
    %c0_i32_0 = arith.constant 0 : i32
    %c0_i32_1 = arith.constant 0 : i32
    return %arg0, %c0_i32, %c0_i32_0 : i32, i32, i32
  }
}

</mosaic_0001>

<bundles_post_ra>
// kernel: inception_d.9
= control target key start
LH: loop header
LB: loop body
LE: loop exit
PB: predicated region body
PF: predicated region fallthrough
CT: control target
= control target key end

     0   :  { %s692_s6 = smov 0   ;;  %s895_s0 = inlined_call_operand.vmem [shape: f32[2,16,16,4], index: 0, kind: input, shape index: {}]   ;;  %s896_s1 = inlined_call_operand.vmem [shape: f32[2,7,7,4], index: 1, kind: output, shape index: {}]  }
   0x1 LB: > { %s572_s7 = sadd.s32 4294967295, %s680_s6   ;;  %p576_p0 = scmp.ge.s32.totalorder %s680_s6, 1  ;;  %s680_s6 = sphi %s692_s6, %s11_s6  }
   0x2   : > { %p87_p1 = scmp.lt.s32.totalorder %s680_s6, 3 }
   0x4   : > { %p88_p2 = pnand %p576_p0, %p87_p1 }
   0x5   : > { %p107_p3 = scmp.lt.s32.totalorder (!%p88_p2), %s572_s7, 1  ;;  %vm129_vm0 = vcmask (!%p88_p2), 31744   ;;  %vm137_vm1 = vcmask (!%p88_p2), 24576  }
   0x6   : > { %91 = sbr.rel (%p88_p2) target bundleno = 113 (0x71), region = 24 }
   0xd   : > { %s898_s7 = smov (!%p107_p3, %s572_s7), 1 }
   0xe   : > { %s664_s8 = sshll.u32 %s898_s7, 8  ;;  %s665_s12 = smul.u32 56, %s898_s7 }
   0xf   : > { %s706_s11 = scalar_lea.vmem %s895_s0, %s664_s8 }
  0x10   : > { %v117_v0 = vld [vmem:[%s706_s11] sm:$0xff]  ;;  %v580_v1 = vld [vmem:[%s706_s11 + $0x10] sm:$0xff]  ;;  %v118_v4 = vld [vmem:[%s706_s11 + $0x8] sm:$0xff]  ;;  %s726_s15 = scalar_lea.vmem %s896_s1, %s665_s12 }
  0x11   : > { %v582_v2 = vld [vmem:[%s706_s11 + $0x20] sm:$0xff]  ;;  %v122_v3 = vmax.f32 %v117_v0, %v580_v1  ;;  %v581_v5 = vld [vmem:[%s706_s11 + $0x18] sm:$0xff]  ;;  %v583_v6 = vld [vmem:[%s706_s11 + $0x28] sm:$0xff] }
  0x12   : > { %v123_v7 = vmax.f32 %v118_v4, %v581_v5  ;;  %v586_v10 = vld [vmem:[%s706_s11 + $0x30] sm:$0xff]  ;;  %v587_v12 = vld [vmem:[%s706_s11 + $0x38] sm:$0xff]  ;;  %v588_v13 = vld [vmem:[%s706_s11 + $0x40] sm:$0xff] }
  0x13   : > { %v127_v8 = vmax.f32 %v122_v3, %v582_v2  ;;  %v180_v11 = vmax.f32 %v582_v2, %v586_v10  ;;  %v181_v14 = vmax.f32 %v583_v6, %v587_v12  ;;  %v721_v15 = vld [vmem:[%s706_s11 + $0x48] sm:$0xff]  ;;  %v599_v28 = vld [vmem:[%s706_s11 + $0x50] sm:$0xff]  ;;  %v600_v53 = vld [vmem:[%s706_s11 + $0x58] sm:$0xff] }
  0x14   : > { %v128_v9 = vmax.f32 %v123_v7, %v583_v6  ;;  %v237_v52 = vmax.f32 %v588_v13, %v599_v28  ;;  %v742_v55 = vld [vmem:[%s706_s11 + $0x60] sm:$0xff]  ;;  %v238_v57 = vmax.f32 %v721_v15, %v600_v53  ;;  %v750_v58 = vld [vmem:[%s706_s11 + $0x68] sm:$0xff]  ;;  %v612_v7 = vld [vmem:[%s706_s11 + $0x70] sm:$0xff] }
  0x15   : > { %130 = vst.msk [vmem:[#allocation2] sm:$0xff] %vm129_vm0, %v127_v8  ;;  %v185_v19 = vmax.f32 %v180_v11, %v588_v13  ;;  %v186_v32 = vmax.f32 %v181_v14, %v721_v15 }
  0x16   : > { %131 = vst.msk [vmem:[#allocation2 + $0x8] sm:$0xff] %vm129_vm0, %v128_v9  ;;  %v242_v62 = vmax.f32 %v237_v52, %v742_v55  ;;  %v243_v11 = vmax.f32 %v238_v57, %v750_v58 }
  0x1c   : > { %v132_v16 = vld [vmem:[#allocation2] sm:$0x1]  ;;  %v133_v17 = vld [vmem:[#allocation2 + $0x1] sm:$0x1]  ;;  %v135_v18 = vld [vmem:[#allocation2 + $0x2] sm:$0x1] }
  0x1d   : > { %v139_v20 = vld [vmem:[#allocation2 + $0x2] sm:$0x1]  ;;  %v140_v21 = vld [vmem:[#allocation2 + $0x3] sm:$0x1]  ;;  %v142_v22 = vld [vmem:[#allocation2 + $0x4] sm:$0x1]  ;;  %v134_v23 = vmax.f32 %v132_v16, %v133_v17 }
  0x1e   : > { %v145_v24 = vld [vmem:[#allocation2 + $0x4] sm:$0x1]  ;;  %v146_v25 = vld [vmem:[#allocation2 + $0x5] sm:$0x1]  ;;  %v148_v26 = vld [vmem:[#allocation2 + $0x6] sm:$0x1]  ;;  %v141_v27 = vmax.f32 %v139_v20, %v140_v21 }
  0x1f   : > { %v151_v29 = vld [vmem:[#allocation2 + $0x6] sm:$0x1]  ;;  %v152_v30 = vld [vmem:[#allocation2 + $0x7] sm:$0x1]  ;;  %v154_v31 = vld [vmem:[#allocation2 + $0x8] sm:$0x1]  ;;  %v136_v33 = vmax.f32 %v134_v23, %v135_v18  ;;  %v147_v34 = vmax.f32 %v145_v24, %v146_v25 }
  0x20   : > { %v157_v35 = vld [vmem:[#allocation2 + $0x8] sm:$0x1]  ;;  %v158_v36 = vld [vmem:[#allocation2 + $0x9] sm:$0x1]  ;;  %v160_v37 = vld [vmem:[#allocation2 + $0xa] sm:$0x1]  ;;  %v143_v38 = vmax.f32 %v141_v27, %v142_v22  ;;  %v153_v39 = vmax.f32 %v151_v29, %v152_v30 }
  0x21   : > { %187 = vst.msk [vmem:[#allocation2] sm:$0xff] %vm129_vm0, %v185_v19  ;;  %v163_v40 = vld [vmem:[#allocation2 + $0xa] sm:$0x1]  ;;  %v164_v41 = vld [vmem:[#allocation2 + $0xb] sm:$0x1]  ;;  %v149_v43 = vmax.f32 %v147_v34, %v148_v26  ;;  %v159_v44 = vmax.f32 %v157_v35, %v158_v36  ;;  %v770_v34 = vld [vmem:[%s706_s11 + $0x80] sm:$0xff] }
  0x22   : > { %v166_v42 = vld [vmem:[#allocation2 + $0xc] sm:$0x1]  ;;  %138 = vst.msk [vmem:[%s726_s15] sm:$0x1] %vm137_vm1, %v136_v33  ;;  %v170_v46 = vld [vmem:[#allocation2 + $0xd] sm:$0x1]  ;;  %v155_v48 = vmax.f32 %v153_v39, %v154_v31  ;;  %v165_v49 = vmax.f32 %v163_v40, %v164_v41  ;;  %v294_v31 = vmax.f32 %v742_v55, %v612_v7 }
  0x23   : > { %v169_v45 = vld [vmem:[#allocation2 + $0xc] sm:$0x1]  ;;  %v172_v47 = vld [vmem:[#allocation2 + $0xe] sm:$0x1]  ;;  %144 = vst.msk [vmem:[%s726_s15 + $0x1] sm:$0x1] %vm137_vm1, %v143_v38  ;;  %v161_v50 = vmax.f32 %v159_v44, %v160_v37 }
  0x24   : > { %188 = vst.msk [vmem:[#allocation2 + $0x8] sm:$0xff] %vm129_vm0, %v186_v32  ;;  %v171_v51 = vmax.f32 %v169_v45, %v170_v46  ;;  %v167_v54 = vmax.f32 %v165_v49, %v166_v42  ;;  %v613_v32 = vld [vmem:[%s706_s11 + $0x78] sm:$0xff]  ;;  %v778_v37 = vld [vmem:[%s706_s11 + $0x88] sm:$0xff]  ;;  %v299_v41 = vmax.f32 %v294_v31, %v770_v34 }
  0x25   : > { %150 = vst.msk [vmem:[%s726_s15 + $0x2] sm:$0x1] %vm137_vm1, %v149_v43  ;;  %156 = vst.msk [vmem:[%s726_s15 + $0x3] sm:$0x1] %vm137_vm1, %v155_v48  ;;  %v295_v36 = vmax.f32 %v750_v58, %v613_v32 }
  0x26   : > { %162 = vst.msk [vmem:[%s726_s15 + $0x4] sm:$0x1] %vm137_vm1, %v161_v50  ;;  %v173_v56 = vmax.f32 %v171_v51, %v172_v47  ;;  %168 = vst.msk [vmem:[%s726_s15 + $0x5] sm:$0x1] %vm137_vm1, %v167_v54  ;;  %v625_v50 = vld [vmem:[%s706_s11 + $0x90] sm:$0xff] }
  0x27   : > { %v300_v54 = vmax.f32 %v295_v36, %v778_v37 }
  0x28   : > { %v189_v59 = vld [vmem:[#allocation2] sm:$0x1]  ;;  %v190_v60 = vld [vmem:[#allocation2 + $0x1] sm:$0x1]  ;;  %v192_v61 = vld [vmem:[#allocation2 + $0x2] sm:$0x1] }
  0x29   : > { %174 = vst.msk [vmem:[%s726_s15 + $0x6] sm:$0x1] %vm137_vm1, %v173_v56  ;;  %v196_v63 = vld [vmem:[#allocation2 + $0x2] sm:$0x1]  ;;  %v197_v0 = vld [vmem:[#allocation2 + $0x3] sm:$0x1]  ;;  %v191_v2 = vmax.f32 %v189_v59, %v190_v60 }
  0x2a   : > { %v199_v1 = vld [vmem:[#allocation2 + $0x4] sm:$0x1]  ;;  %v203_v4 = vld [vmem:[#allocation2 + $0x5] sm:$0x1]  ;;  %v205_v5 = vld [vmem:[#allocation2 + $0x6] sm:$0x1]  ;;  %v198_v6 = vmax.f32 %v196_v63, %v197_v0 }
  0x2b   : > { %v202_v3 = vld [vmem:[#allocation2 + $0x4] sm:$0x1]  ;;  %v208_v8 = vld [vmem:[#allocation2 + $0x6] sm:$0x1]  ;;  %v209_v9 = vld [vmem:[#allocation2 + $0x7] sm:$0x1]  ;;  %v193_v12 = vmax.f32 %v191_v2, %v192_v61 }
  0x2c   : > { %v211_v10 = vld [vmem:[#allocation2 + $0x8] sm:$0x1]  ;;  %v204_v13 = vmax.f32 %v202_v3, %v203_v4  ;;  %v215_v15 = vld [vmem:[#allocation2 + $0x9] sm:$0x1]  ;;  %v217_v16 = vld [vmem:[#allocation2 + $0xa] sm:$0x1]  ;;  %v200_v17 = vmax.f32 %v198_v6, %v199_v1  ;;  %v210_v18 = vmax.f32 %v208_v8, %v209_v9 }
  0x2d   : > { %v214_v14 = vld [vmem:[#allocation2 + $0x8] sm:$0x1]  ;;  %244 = vst.msk [vmem:[#allocation2] sm:$0xff] %vm129_vm0, %v242_v62  ;;  %v220_v19 = vld [vmem:[#allocation2 + $0xa] sm:$0x1] }
  0x2e   : > { %v221_v20 = vld [vmem:[#allocation2 + $0xb] sm:$0x1]  ;;  %v223_v21 = vld [vmem:[#allocation2 + $0xc] sm:$0x1]  ;;  %590 = vst.msk [vmem:[%s726_s15 + $0x8] sm:$0x1] %vm137_vm1, %v193_v12  ;;  %v206_v22 = vmax.f32 %v204_v13, %v205_v5  ;;  %v216_v23 = vmax.f32 %v214_v14, %v215_v15  ;;  %v212_v27 = vmax.f32 %v210_v18, %v211_v10  ;;  %v351_v10 = vmax.f32 %v770_v34, %v625_v50 }
  0x2f   : > { %v226_v24 = vld [vmem:[#allocation2 + $0xc] sm:$0x1]  ;;  %v227_v25 = vld [vmem:[#allocation2 + $0xd] sm:$0x1]  ;;  %v229_v26 = vld [vmem:[#allocation2 + $0xe] sm:$0x1]  ;;  %v222_v28 = vmax.f32 %v220_v19, %v221_v20 }
  0x30   : > { %591 = vst.msk [vmem:[%s726_s15 + $0x9] sm:$0x1] %vm137_vm1, %v200_v17  ;;  %592 = vst.msk [vmem:[%s726_s15 + $0xa] sm:$0x1] %vm137_vm1, %v206_v22  ;;  %v218_v29 = vmax.f32 %v216_v23, %v217_v16  ;;  %v228_v30 = vmax.f32 %v226_v24, %v227_v25  ;;  %v798_v13 = vld [vmem:[%s706_s11 + $0xa0] sm:$0xff]  ;;  %v806_v16 = vld [vmem:[%s706_s11 + $0xa8] sm:$0xff] }
  0x31   : > { %245 = vst.msk [vmem:[#allocation2 + $0x8] sm:$0xff] %vm129_vm0, %v243_v11  ;;  %v224_v33 = vmax.f32 %v222_v28, %v223_v21  ;;  %v626_v11 = vld [vmem:[%s706_s11 + $0x98] sm:$0xff]  ;;  %v356_v20 = vmax.f32 %v351_v10, %v798_v13 }
  0x32   : > { %593 = vst.msk [vmem:[%s726_s15 + $0xb] sm:$0x1] %vm137_vm1, %v212_v27  ;;  %594 = vst.msk [vmem:[%s726_s15 + $0xc] sm:$0x1] %vm137_vm1, %v218_v29  ;;  %v230_v35 = vmax.f32 %v228_v30, %v229_v26  ;;  %v352_v15 = vmax.f32 %v778_v37, %v626_v11  ;;  %v638_v29 = vld [vmem:[%s706_s11 + $0xb0] sm:$0xff] }
  0x33   : > { %595 = vst.msk [vmem:[%s726_s15 + $0xd] sm:$0x1] %vm137_vm1, %v224_v33 }
  0x34   : > { %v246_v38 = vld [vmem:[#allocation2] sm:$0x1]  ;;  %v247_v39 = vld [vmem:[#allocation2 + $0x1] sm:$0x1]  ;;  %v249_v40 = vld [vmem:[#allocation2 + $0x2] sm:$0x1]  ;;  %v357_v33 = vmax.f32 %v352_v15, %v806_v16 }
  0x35   : > { %596 = vst.msk [vmem:[%s726_s15 + $0xe] sm:$0x1] %vm137_vm1, %v230_v35  ;;  %v253_v42 = vld [vmem:[#allocation2 + $0x2] sm:$0x1]  ;;  %v254_v43 = vld [vmem:[#allocation2 + $0x3] sm:$0x1]  ;;  %v248_v45 = vmax.f32 %v246_v38, %v247_v39 }
  0x36   : > { %v256_v44 = vld [vmem:[#allocation2 + $0x4] sm:$0x1]  ;;  %v260_v47 = vld [vmem:[#allocation2 + $0x5] sm:$0x1]  ;;  %v262_v48 = vld [vmem:[#allocation2 + $0x6] sm:$0x1]  ;;  %v255_v49 = vmax.f32 %v253_v42, %v254_v43 }
  0x37   : > { %v259_v46 = vld [vmem:[#allocation2 + $0x4] sm:$0x1]  ;;  %v265_v51 = vld [vmem:[#allocation2 + $0x6] sm:$0x1]  ;;  %v266_v52 = vld [vmem:[#allocation2 + $0x7] sm:$0x1]  ;;  %v250_v55 = vmax.f32 %v248_v45, %v249_v40 }
  0x38   : > { %v268_v53 = vld [vmem:[#allocation2 + $0x8] sm:$0x1]  ;;  %v261_v56 = vmax.f32 %v259_v46, %v260_v47  ;;  %v272_v58 = vld [vmem:[#allocation2 + $0x9] sm:$0x1]  ;;  %v274_v59 = vld [vmem:[#allocation2 + $0xa] sm:$0x1]  ;;  %v257_v60 = vmax.f32 %v255_v49, %v256_v44  ;;  %v267_v61 = vmax.f32 %v265_v51, %v266_v52 }
  0x39   : > { %v271_v57 = vld [vmem:[#allocation2 + $0x8] sm:$0x1]  ;;  %301 = vst.msk [vmem:[#allocation2] sm:$0xff] %vm129_vm0, %v299_v41  ;;  %v277_v62 = vld [vmem:[#allocation2 + $0xa] sm:$0x1] }
  0x3a   : > { %v278_v63 = vld [vmem:[#allocation2 + $0xb] sm:$0x1]  ;;  %v280_v0 = vld [vmem:[#allocation2 + $0xc] sm:$0x1]  ;;  %603 = vst.msk [vmem:[%s726_s15 + $0x10] sm:$0x1] %vm137_vm1, %v250_v55  ;;  %v263_v1 = vmax.f32 %v261_v56, %v262_v48  ;;  %v273_v2 = vmax.f32 %v271_v57, %v272_v58  ;;  %v269_v6 = vmax.f32 %v267_v61, %v268_v53  ;;  %v408_v53 = vmax.f32 %v798_v13, %v638_v29 }
  0x3b   : > { %v283_v3 = vld [vmem:[#allocation2 + $0xc] sm:$0x1]  ;;  %v284_v4 = vld [vmem:[#allocation2 + $0xd] sm:$0x1]  ;;  %v286_v5 = vld [vmem:[#allocation2 + $0xe] sm:$0x1]  ;;  %v279_v7 = vmax.f32 %v277_v62, %v278_v63 }
  0x3c   : > { %604 = vst.msk [vmem:[%s726_s15 + $0x11] sm:$0x1] %vm137_vm1, %v257_v60  ;;  %605 = vst.msk [vmem:[%s726_s15 + $0x12] sm:$0x1] %vm137_vm1, %v263_v1  ;;  %v275_v8 = vmax.f32 %v273_v2, %v274_v59  ;;  %v285_v9 = vmax.f32 %v283_v3, %v284_v4  ;;  %v826_v56 = vld [vmem:[%s706_s11 + $0xc0] sm:$0xff]  ;;  %v834_v59 = vld [vmem:[%s706_s11 + $0xc8] sm:$0xff] }
  0x3d   : > { %302 = vst.msk [vmem:[#allocation2 + $0x8] sm:$0xff] %vm129_vm0, %v300_v54  ;;  %v281_v12 = vmax.f32 %v279_v7, %v280_v0  ;;  %v639_v54 = vld [vmem:[%s706_s11 + $0xb8] sm:$0xff]  ;;  %v413_v63 = vmax.f32 %v408_v53, %v826_v56 }
  0x3e   : > { %606 = vst.msk [vmem:[%s726_s15 + $0x13] sm:$0x1] %vm137_vm1, %v269_v6  ;;  %607 = vst.msk [vmem:[%s726_s15 + $0x14] sm:$0x1] %vm137_vm1, %v275_v8  ;;  %v287_v14 = vmax.f32 %v285_v9, %v286_v5  ;;  %v409_v58 = vmax.f32 %v806_v16, %v639_v54  ;;  %v651_v8 = vld [vmem:[%s706_s11 + $0xd0] sm:$0xff] }
  0x3f   : > { %608 = vst.msk [vmem:[%s726_s15 + $0x15] sm:$0x1] %vm137_vm1, %v281_v12 }
  0x40   : > { %v303_v17 = vld [vmem:[#allocation2] sm:$0x1]  ;;  %v304_v18 = vld [vmem:[#allocation2 + $0x1] sm:$0x1]  ;;  %v306_v19 = vld [vmem:[#allocation2 + $0x2] sm:$0x1]  ;;  %v414_v12 = vmax.f32 %v409_v58, %v834_v59 }
  0x41   : > { %609 = vst.msk [vmem:[%s726_s15 + $0x16] sm:$0x1] %vm137_vm1, %v287_v14  ;;  %v310_v21 = vld [vmem:[#allocation2 + $0x2] sm:$0x1]  ;;  %v311_v22 = vld [vmem:[#allocation2 + $0x3] sm:$0x1]  ;;  %v305_v24 = vmax.f32 %v303_v17, %v304_v18 }
  0x42   : > { %v313_v23 = vld [vmem:[#allocation2 + $0x4] sm:$0x1]  ;;  %v317_v26 = vld [vmem:[#allocation2 + $0x5] sm:$0x1]  ;;  %v319_v27 = vld [vmem:[#allocation2 + $0x6] sm:$0x1]  ;;  %v312_v28 = vmax.f32 %v310_v21, %v311_v22 }
  0x43   : > { %v316_v25 = vld [vmem:[#allocation2 + $0x4] sm:$0x1]  ;;  %v322_v30 = vld [vmem:[#allocation2 + $0x6] sm:$0x1]  ;;  %v323_v31 = vld [vmem:[#allocation2 + $0x7] sm:$0x1]  ;;  %v307_v34 = vmax.f32 %v305_v24, %v306_v19 }
  0x44   : > { %v325_v32 = vld [vmem:[#allocation2 + $0x8] sm:$0x1]  ;;  %v318_v35 = vmax.f32 %v316_v25, %v317_v26  ;;  %v329_v37 = vld [vmem:[#allocation2 + $0x9] sm:$0x1]  ;;  %v331_v38 = vld [vmem:[#allocation2 + $0xa] sm:$0x1]  ;;  %v314_v39 = vmax.f32 %v312_v28, %v313_v23  ;;  %v324_v40 = vmax.f32 %v322_v30, %v323_v31 }
  0x45   : > { %v328_v36 = vld [vmem:[#allocation2 + $0x8] sm:$0x1]  ;;  %358 = vst.msk [vmem:[#allocation2] sm:$0xff] %vm129_vm0, %v356_v20  ;;  %v334_v41 = vld [vmem:[#allocation2 + $0xa] sm:$0x1] }
  0x46   : > { %v335_v42 = vld [vmem:[#allocation2 + $0xb] sm:$0x1]  ;;  %v337_v43 = vld [vmem:[#allocation2 + $0xc] sm:$0x1]  ;;  %616 = vst.msk [vmem:[%s726_s15 + $0x18] sm:$0x1] %vm137_vm1, %v307_v34  ;;  %v320_v44 = vmax.f32 %v318_v35, %v319_v27  ;;  %v330_v45 = vmax.f32 %v328_v36, %v329_v37  ;;  %v326_v49 = vmax.f32 %v324_v40, %v325_v32  ;;  %v465_v32 = vmax.f32 %v826_v56, %v651_v8 }
  0x47   : > { %v340_v46 = vld [vmem:[#allocation2 + $0xc] sm:$0x1]  ;;  %v341_v47 = vld [vmem:[#allocation2 + $0xd] sm:$0x1]  ;;  %v343_v48 = vld [vmem:[#allocation2 + $0xe] sm:$0x1]  ;;  %v336_v50 = vmax.f32 %v334_v41, %v335_v42 }
  0x48   : > { %617 = vst.msk [vmem:[%s726_s15 + $0x19] sm:$0x1] %vm137_vm1, %v314_v39  ;;  %618 = vst.msk [vmem:[%s726_s15 + $0x1a] sm:$0x1] %vm137_vm1, %v320_v44  ;;  %v332_v51 = vmax.f32 %v330_v45, %v331_v38  ;;  %v342_v52 = vmax.f32 %v340_v46, %v341_v47  ;;  %v653_v35 = vld [vmem:[%s706_s11 + $0xe0] sm:$0xff]  ;;  %v654_v38 = vld [vmem:[%s706_s11 + $0xe8] sm:$0xff] }
  0x49   : > { %359 = vst.msk [vmem:[#allocation2 + $0x8] sm:$0xff] %vm129_vm0, %v357_v33  ;;  %v338_v55 = vmax.f32 %v336_v50, %v337_v43  ;;  %v652_v33 = vld [vmem:[%s706_s11 + $0xd8] sm:$0xff]  ;;  %v470_v42 = vmax.f32 %v465_v32, %v653_v35 }
  0x4a   : > { %619 = vst.msk [vmem:[%s726_s15 + $0x1b] sm:$0x1] %vm137_vm1, %v326_v49  ;;  %620 = vst.msk [vmem:[%s726_s15 + $0x1c] sm:$0x1] %vm137_vm1, %v332_v51  ;;  %v344_v57 = vmax.f32 %v342_v52, %v343_v48  ;;  %v466_v37 = vmax.f32 %v834_v59, %v652_v33 }
  0x4b   : > { %621 = vst.msk [vmem:[%s726_s15 + $0x1d] sm:$0x1] %vm137_vm1, %v338_v55 }
  0x4c   : > { %v360_v60 = vld [vmem:[#allocation2] sm:$0x1]  ;;  %v361_v61 = vld [vmem:[#allocation2 + $0x1] sm:$0x1]  ;;  %v363_v62 = vld [vmem:[#allocation2 + $0x2] sm:$0x1]  ;;  %v471_v54 = vmax.f32 %v466_v37, %v654_v38 }
  0x4d   : > { %622 = vst.msk [vmem:[%s726_s15 + $0x1e] sm:$0x1] %vm137_vm1, %v344_v57  ;;  %v367_v0 = vld [vmem:[#allocation2 + $0x2] sm:$0x1]  ;;  %v368_v1 = vld [vmem:[#allocation2 + $0x3] sm:$0x1]  ;;  %v362_v3 = vmax.f32 %v360_v60, %v361_v61 }
  0x4e   : > { %v370_v2 = vld [vmem:[#allocation2 + $0x4] sm:$0x1]  ;;  %v374_v5 = vld [vmem:[#allocation2 + $0x5] sm:$0x1]  ;;  %v376_v6 = vld [vmem:[#allocation2 + $0x6] sm:$0x1]  ;;  %v369_v7 = vmax.f32 %v367_v0, %v368_v1 }
  0x4f   : > { %v373_v4 = vld [vmem:[#allocation2 + $0x4] sm:$0x1]  ;;  %v379_v9 = vld [vmem:[#allocation2 + $0x6] sm:$0x1]  ;;  %v380_v10 = vld [vmem:[#allocation2 + $0x7] sm:$0x1]  ;;  %v364_v13 = vmax.f32 %v362_v3, %v363_v62 }
  0x50   : > { %v382_v11 = vld [vmem:[#allocation2 + $0x8] sm:$0x1]  ;;  %v375_v14 = vmax.f32 %v373_v4, %v374_v5  ;;  %v386_v16 = vld [vmem:[#allocation2 + $0x9] sm:$0x1]  ;;  %v388_v17 = vld [vmem:[#allocation2 + $0xa] sm:$0x1]  ;;  %v371_v18 = vmax.f32 %v369_v7, %v370_v2  ;;  %v381_v19 = vmax.f32 %v379_v9, %v380_v10 }
  0x51   : > { %v385_v15 = vld [vmem:[#allocation2 + $0x8] sm:$0x1]  ;;  %415 = vst.msk [vmem:[#allocation2] sm:$0xff] %vm129_vm0, %v413_v63  ;;  %v391_v20 = vld [vmem:[#allocation2 + $0xa] sm:$0x1] }
  0x52   : > { %v392_v21 = vld [vmem:[#allocation2 + $0xb] sm:$0x1]  ;;  %v394_v22 = vld [vmem:[#allocation2 + $0xc] sm:$0x1]  ;;  %629 = vst.msk [vmem:[%s726_s15 + $0x20] sm:$0x1] %vm137_vm1, %v364_v13  ;;  %v377_v23 = vmax.f32 %v375_v14, %v376_v6  ;;  %v387_v24 = vmax.f32 %v385_v15, %v386_v16  ;;  %v383_v28 = vmax.f32 %v381_v19, %v382_v11 }
  0x53   : > { %v397_v25 = vld [vmem:[#allocation2 + $0xc] sm:$0x1]  ;;  %v398_v26 = vld [vmem:[#allocation2 + $0xd] sm:$0x1]  ;;  %v400_v27 = vld [vmem:[#allocation2 + $0xe] sm:$0x1]  ;;  %v393_v29 = vmax.f32 %v391_v20, %v392_v21 }
  0x54   : > { %630 = vst.msk [vmem:[%s726_s15 + $0x21] sm:$0x1] %vm137_vm1, %v371_v18  ;;  %631 = vst.msk [vmem:[%s726_s15 + $0x22] sm:$0x1] %vm137_vm1, %v377_v23  ;;  %v389_v30 = vmax.f32 %v387_v24, %v388_v17  ;;  %v399_v31 = vmax.f32 %v397_v25, %v398_v26 }
  0x55   : > { %416 = vst.msk [vmem:[#allocation2 + $0x8] sm:$0xff] %vm129_vm0, %v414_v12  ;;  %v395_v34 = vmax.f32 %v393_v29, %v394_v22 }
  0x56   : > { %632 = vst.msk [vmem:[%s726_s15 + $0x23] sm:$0x1] %vm137_vm1, %v383_v28  ;;  %633 = vst.msk [vmem:[%s726_s15 + $0x24] sm:$0x1] %vm137_vm1, %v389_v30  ;;  %v401_v36 = vmax.f32 %v399_v31, %v400_v27 }
  0x57   : > { %634 = vst.msk [vmem:[%s726_s15 + $0x25] sm:$0x1] %vm137_vm1, %v395_v34 }
  0x58   : > { %v417_v39 = vld [vmem:[#allocation2] sm:$0x1]  ;;  %v418_v40 = vld [vmem:[#allocation2 + $0x1] sm:$0x1]  ;;  %v420_v41 = vld [vmem:[#allocation2 + $0x2] sm:$0x1] }
  0x59   : > { %635 = vst.msk [vmem:[%s726_s15 + $0x26] sm:$0x1] %vm137_vm1, %v401_v36  ;;  %v424_v43 = vld [vmem:[#allocation2 + $0x2] sm:$0x1]  ;;  %v425_v44 = vld [vmem:[#allocation2 + $0x3] sm:$0x1]  ;;  %v419_v46 = vmax.f32 %v417_v39, %v418_v40 }
  0x5a   : > { %v427_v45 = vld [vmem:[#allocation2 + $0x4] sm:$0x1]  ;;  %v431_v48 = vld [vmem:[#allocation2 + $0x5] sm:$0x1]  ;;  %v433_v49 = vld [vmem:[#allocation2 + $0x6] sm:$0x1]  ;;  %v426_v50 = vmax.f32 %v424_v43, %v425_v44 }
  0x5b   : > { %v430_v47 = vld [vmem:[#allocation2 + $0x4] sm:$0x1]  ;;  %v436_v51 = vld [vmem:[#allocation2 + $0x6] sm:$0x1]  ;;  %v437_v52 = vld [vmem:[#allocation2 + $0x7] sm:$0x1]  ;;  %v421_v55 = vmax.f32 %v419_v46, %v420_v41 }
  0x5c   : > { %v439_v53 = vld [vmem:[#allocation2 + $0x8] sm:$0x1]  ;;  %v432_v56 = vmax.f32 %v430_v47, %v431_v48  ;;  %v443_v58 = vld [vmem:[#allocation2 + $0x9] sm:$0x1]  ;;  %v445_v59 = vld [vmem:[#allocation2 + $0xa] sm:$0x1]  ;;  %v428_v60 = vmax.f32 %v426_v50, %v427_v45  ;;  %v438_v61 = vmax.f32 %v436_v51, %v437_v52 }
  0x5d   : > { %v442_v57 = vld [vmem:[#allocation2 + $0x8] sm:$0x1]  ;;  %472 = vst.msk [vmem:[#allocation2] sm:$0xff] %vm129_vm0, %v470_v42  ;;  %v448_v62 = vld [vmem:[#allocation2 + $0xa] sm:$0x1] }
  0x5e   : > { %v449_v63 = vld [vmem:[#allocation2 + $0xb] sm:$0x1]  ;;  %v451_v0 = vld [vmem:[#allocation2 + $0xc] sm:$0x1]  ;;  %642 = vst.msk [vmem:[%s726_s15 + $0x28] sm:$0x1] %vm137_vm1, %v421_v55  ;;  %v434_v1 = vmax.f32 %v432_v56, %v433_v49  ;;  %v444_v2 = vmax.f32 %v442_v57, %v443_v58  ;;  %v440_v6 = vmax.f32 %v438_v61, %v439_v53 }
  0x5f   : > { %v454_v3 = vld [vmem:[#allocation2 + $0xc] sm:$0x1]  ;;  %v455_v4 = vld [vmem:[#allocation2 + $0xd] sm:$0x1]  ;;  %v457_v5 = vld [vmem:[#allocation2 + $0xe] sm:$0x1]  ;;  %v450_v7 = vmax.f32 %v448_v62, %v449_v63 }
  0x60   : > { %643 = vst.msk [vmem:[%s726_s15 + $0x29] sm:$0x1] %vm137_vm1, %v428_v60  ;;  %644 = vst.msk [vmem:[%s726_s15 + $0x2a] sm:$0x1] %vm137_vm1, %v434_v1  ;;  %v446_v8 = vmax.f32 %v444_v2, %v445_v59  ;;  %v456_v9 = vmax.f32 %v454_v3, %v455_v4 }
  0x61   : > { %473 = vst.msk [vmem:[#allocation2 + $0x8] sm:$0xff] %vm129_vm0, %v471_v54  ;;  %v452_v10 = vmax.f32 %v450_v7, %v451_v0 }
  0x62   : > { %645 = vst.msk [vmem:[%s726_s15 + $0x2b] sm:$0x1] %vm137_vm1, %v440_v6  ;;  %646 = vst.msk [vmem:[%s726_s15 + $0x2c] sm:$0x1] %vm137_vm1, %v446_v8  ;;  %v458_v11 = vmax.f32 %v456_v9, %v457_v5 }
  0x63   : > { %647 = vst.msk [vmem:[%s726_s15 + $0x2d] sm:$0x1] %vm137_vm1, %v452_v10 }
  0x64   : > { %648 = vst.msk [vmem:[%s726_s15 + $0x2e] sm:$0x1] %vm137_vm1, %v458_v11  ;;  %v474_v12 = vld [vmem:[#allocation2] sm:$0x1]  ;;  %v475_v13 = vld [vmem:[#allocation2 + $0x1] sm:$0x1] }
  0x65   : > { %v476_v14 = vmax.f32 %v474_v12, %v475_v13  ;;  %v481_v15 = vld [vmem:[#allocation2 + $0x2] sm:$0x1]  ;;  %v482_v16 = vld [vmem:[#allocation2 + $0x3] sm:$0x1]  ;;  %v487_v19 = vld [vmem:[#allocation2 + $0x4] sm:$0x1] }
  0x66   : > { %v477_v17 = vld [vmem:[#allocation2 + $0x2] sm:$0x1]  ;;  %v483_v18 = vmax.f32 %v481_v15, %v482_v16  ;;  %v488_v20 = vld [vmem:[#allocation2 + $0x5] sm:$0x1]  ;;  %v484_v22 = vld [vmem:[#allocation2 + $0x4] sm:$0x1] }
  0x67   : > { %v478_v21 = vmax.f32 %v476_v14, %v477_v17  ;;  %v489_v23 = vmax.f32 %v487_v19, %v488_v20  ;;  %v493_v24 = vld [vmem:[#allocation2 + $0x6] sm:$0x1]  ;;  %v494_v25 = vld [vmem:[#allocation2 + $0x7] sm:$0x1] }
  0x68   : > { %v485_v26 = vmax.f32 %v483_v18, %v484_v22  ;;  %v490_v27 = vld [vmem:[#allocation2 + $0x6] sm:$0x1]  ;;  %v495_v28 = vmax.f32 %v493_v24, %v494_v25  ;;  %v499_v29 = vld [vmem:[#allocation2 + $0x8] sm:$0x1]  ;;  %v500_v30 = vld [vmem:[#allocation2 + $0x9] sm:$0x1] }
  0x69   : > { %655 = vst.msk [vmem:[%s726_s15 + $0x30] sm:$0x1] %vm137_vm1, %v478_v21  ;;  %v491_v31 = vmax.f32 %v489_v23, %v490_v27  ;;  %v496_v32 = vld [vmem:[#allocation2 + $0x8] sm:$0x1]  ;;  %v501_v33 = vmax.f32 %v499_v29, %v500_v30  ;;  %v505_v34 = vld [vmem:[#allocation2 + $0xa] sm:$0x1] }
  0x6a   : > { %v506_v35 = vld [vmem:[#allocation2 + $0xb] sm:$0x1]  ;;  %656 = vst.msk [vmem:[%s726_s15 + $0x31] sm:$0x1] %vm137_vm1, %v485_v26  ;;  %v497_v36 = vmax.f32 %v495_v28, %v496_v32  ;;  %v502_v37 = vld [vmem:[#allocation2 + $0xa] sm:$0x1] }
  0x6b   : > { %v507_v38 = vmax.f32 %v505_v34, %v506_v35  ;;  %v511_v39 = vld [vmem:[#allocation2 + $0xc] sm:$0x1]  ;;  %v512_v40 = vld [vmem:[#allocation2 + $0xd] sm:$0x1]  ;;  %657 = vst.msk [vmem:[%s726_s15 + $0x32] sm:$0x1] %vm137_vm1, %v491_v31  ;;  %v503_v41 = vmax.f32 %v501_v33, %v502_v37 }
  0x6c   : > { %v508_v42 = vld [vmem:[#allocation2 + $0xc] sm:$0x1]  ;;  %v513_v43 = vmax.f32 %v511_v39, %v512_v40  ;;  %658 = vst.msk [vmem:[%s726_s15 + $0x33] sm:$0x1] %vm137_vm1, %v497_v36  ;;  %v514_v45 = vld [vmem:[#allocation2 + $0xe] sm:$0x1] }
  0x6d   : > { %v509_v44 = vmax.f32 %v507_v38, %v508_v42  ;;  %659 = vst.msk [vmem:[%s726_s15 + $0x34] sm:$0x1] %vm137_vm1, %v503_v41 }
  0x6e   : > { %v515_v46 = vmax.f32 %v513_v43, %v514_v45 }
  0x6f   : > { %660 = vst.msk [vmem:[%s726_s15 + $0x35] sm:$0x1] %vm137_vm1, %v509_v44 }
  0x70   : > { %661 = vst.msk [vmem:[%s726_s15 + $0x36] sm:$0x1] %vm137_vm1, %v515_v46 }
  0x71 PF: > { %s11_s6 = sadd.s32 1, %s680_s6  }
  0x72   : > { %p8_p4 = scmp.ge.s32.totalorder %s11_s6, 4  }
  0x74   :  { %10 = sbr.rel (!%p8_p4) target bundleno = 1 (0x1), region = 74 }

// kernel: inception_d.5
= control target key start
LH: loop header
LB: loop body
LE: loop exit
PB: predicated region body
PF: predicated region fallthrough
CT: control target
= control target key end

     0   :  { %vm344_vm0 = vcmask 1041408   ;;  %vm247_vm1 = vcmask 31744   ;;  %s1860_s1 = inlined_call_operand.vmem [shape: bf16[4,128], index: 1, kind: input, shape index: {}]   ;;  %s1861_s0 = inlined_call_operand.vmem [shape: bf16[512,4], index: 0, kind: input, shape index: {}]   ;;  %s1862_s2 = inlined_call_operand.vmem [shape: f32[1,128], index: 2, kind: input, shape index: {}]   ;;  %s1863_s3 = inlined_call_operand.vmem [shape: bf16[512,128], index: 3, kind: output, shape index: {}]  }
   0x1   :  { %v79_v0 = vld [vmem:[%s1860_s1] sm:$0x3]  ;;  %v1514_v4 = vld [vmem:[%s1861_s0 + $0x8] sm:$0xff]   ;;  %v1516_v6 = vld [vmem:[%s1861_s0 + $0x10] sm:$0xff]  }
   0x2   :  { %1510 = vmatprep.subr.msk.bf16.mxu0 %vm344_vm0, %v79_v0  ;;  %1511 = vmatprep.subr.msk.bf16.mxu1 %vm344_vm0, %v79_v0  ;;  %v346_v1 = vsel %vm344_vm0, %v79_v0, 0  ;;  %v1512_v2 = vld [vmem:[%s1861_s0] sm:$0xff]   ;;  %v1515_v5 = vld [vmem:[%s1861_s0 + $0x88] sm:$0xff]   ;;  %v1517_v7 = vld [vmem:[%s1861_s0 + $0x90] sm:$0xff]  }
   0x3   :  { %1443 = vmatpush3.bf16.msra.mxu0 %v346_v1  ;;  %1509 = vmatpush3.bf16.msra.mxu1 %v346_v1  ;;  %v1513_v3 = vld [vmem:[%s1861_s0 + $0x80] sm:$0xff]   ;;  %v1518_v8 = vld [vmem:[%s1861_s0 + $0x18] sm:$0xff]   ;;  %v1522_v12 = vld [vmem:[%s1861_s0 + $0x28] sm:$0xff]  }
   0x4   :  { %1444 = vmatprep.mubr.msk.bf16.mxu0 %vm247_vm1, %v1512_v2  ;;  %1476 = vmatprep.mubr.msk.bf16.mxu1 %vm247_vm1, %v1513_v3  ;;  %v1519_v9 = vld [vmem:[%s1861_s0 + $0x98] sm:$0xff]   ;;  %v1520_v10 = vld [vmem:[%s1861_s0 + $0x20] sm:$0xff]   ;;  %v1523_v13 = vld [vmem:[%s1861_s0 + $0xa8] sm:$0xff]  }
   0x5   :  { %v1521_v11 = vld [vmem:[%s1861_s0 + $0xa0] sm:$0xff]   ;;  %v1524_v14 = vld [vmem:[%s1861_s0 + $0x30] sm:$0xff]   ;;  %v1526_v16 = vld [vmem:[%s1861_s0 + $0x38] sm:$0xff]  }
   0x6   :  { %1445 = vmatmul.mubr.msk.bf16.vlgmr.msra.gmra.mrb[0].mxu0 %vm247_vm1, %v1514_v4  ;;  %1477 = vmatmul.mubr.msk.bf16.vlgmr.msra.gmra.mrb[0].mxu1 %vm247_vm1, %v1515_v5  ;;  %v1525_v15 = vld [vmem:[%s1861_s0 + $0xb0] sm:$0xff]   ;;  %v1527_v17 = vld [vmem:[%s1861_s0 + $0xb8] sm:$0xff]   ;;  %v1528_v18 = vld [vmem:[%s1861_s0 + $0x40] sm:$0xff]  }
   0x7   :  { %1448 = vmatprep.mubr.msk.bf16.mxu0 %vm247_vm1, %v1516_v6  ;;  %1480 = vmatprep.mubr.msk.bf16.mxu1 %vm247_vm1, %v1517_v7  ;;  %v1529_v19 = vld [vmem:[%s1861_s0 + $0xc0] sm:$0xff]   ;;  %v1530_v20 = vld [vmem:[%s1861_s0 + $0x48] sm:$0xff]   ;;  %v1532_v22 = vld [vmem:[%s1861_s0 + $0x50] sm:$0xff]  }
   0x8   :  { %v1531_v21 = vld [vmem:[%s1861_s0 + $0xc8] sm:$0xff]   ;;  %v1533_v23 = vld [vmem:[%s1861_s0 + $0xd0] sm:$0xff]   ;;  %v1534_v24 = vld [vmem:[%s1861_s0 + $0x58] sm:$0xff]  }
   0x9   :  { %v1535_v25 = vld [vmem:[%s1861_s0 + $0xd8] sm:$0xff]   ;;  %v1536_v26 = vld [vmem:[%s1861_s0 + $0x60] sm:$0xff]   ;;  %v1538_v28 = vld [vmem:[%s1861_s0 + $0x68] sm:$0xff]  }
   0xa   :  { %v1537_v27 = vld [vmem:[%s1861_s0 + $0xe0] sm:$0xff]   ;;  %v1539_v29 = vld [vmem:[%s1861_s0 + $0xe8] sm:$0xff]   ;;  %v1540_v30 = vld [vmem:[%s1861_s0 + $0x70] sm:$0xff]  }
   0xb   :  { %v1541_v31 = vld [vmem:[%s1861_s0 + $0xf0] sm:$0xff]   ;;  %v1542_v32 = vld [vmem:[%s1861_s0 + $0x78] sm:$0xff]   ;;  %v1698_v34 = vld [vmem:[%s1862_s2] ss:$0 sm:$0xff] }
   0xc   :  { %v1543_v33 = vld [vmem:[%s1861_s0 + $0xf8] sm:$0xff]  }
   0xe   :  { %1449 = vmatmul.mubr.msk.bf16.gmra.mrb[4].mxu0 %vm247_vm1, %v1518_v8  ;;  %1481 = vmatmul.mubr.msk.bf16.gmra.mrb[4].mxu1 %vm247_vm1, %v1519_v9 }
   0xf   :  { %1452 = vmatprep.mubr.msk.bf16.mxu0 %vm247_vm1, %v1520_v10  ;;  %1484 = vmatprep.mubr.msk.bf16.mxu1 %vm247_vm1, %v1521_v11 }
  0x16   :  { %1453 = vmatmul.mubr.msk.bf16.gmra.mrb[8].mxu0 %vm247_vm1, %v1522_v12  ;;  %1485 = vmatmul.mubr.msk.bf16.gmra.mrb[8].mxu1 %vm247_vm1, %v1523_v13 }
  0x17   :  { %1456 = vmatprep.mubr.msk.bf16.mxu0 %vm247_vm1, %v1524_v14  ;;  %1488 = vmatprep.mubr.msk.bf16.mxu1 %vm247_vm1, %v1525_v15 }
  0x1e   :  { %1457 = vmatmul.mubr.msk.bf16.gmra.mrb[12].mxu0 %vm247_vm1, %v1526_v16  ;;  %1489 = vmatmul.mubr.msk.bf16.gmra.mrb[12].mxu1 %vm247_vm1, %v1527_v17 }
  0x1f   :  { %1460 = vmatprep.mubr.msk.bf16.mxu0 %vm247_vm1, %v1528_v18  ;;  %1492 = vmatprep.mubr.msk.bf16.mxu1 %vm247_vm1, %v1529_v19 }
  0x26   :  { %1461 = vmatmul.mubr.msk.bf16.gmra.mrb[16].mxu0 %vm247_vm1, %v1530_v20  ;;  %1493 = vmatmul.mubr.msk.bf16.gmra.mrb[16].mxu1 %vm247_vm1, %v1531_v21 }
  0x27   :  { %1464 = vmatprep.mubr.msk.bf16.mxu0 %vm247_vm1, %v1532_v22  ;;  %1496 = vmatprep.mubr.msk.bf16.mxu1 %vm247_vm1, %v1533_v23 }
  0x2e   :  { %1465 = vmatmul.mubr.msk.bf16.gmra.mrb[20].mxu0 %vm247_vm1, %v1534_v24  ;;  %1497 = vmatmul.mubr.msk.bf16.gmra.mrb[20].mxu1 %vm247_vm1, %v1535_v25 }
  0x2f   :  { %1468 = vmatprep.mubr.msk.bf16.mxu0 %vm247_vm1, %v1536_v26  ;;  %1500 = vmatprep.mubr.msk.bf16.mxu1 %vm247_vm1, %v1537_v27 }
  0x36   :  { %1469 = vmatmul.mubr.msk.bf16.gmra.mrb[24].mxu0 %vm247_vm1, %v1538_v28  ;;  %1501 = vmatmul.mubr.msk.bf16.gmra.mrb[24].mxu1 %vm247_vm1, %v1539_v29 }
  0x37   :  { %1472 = vmatprep.mubr.msk.bf16.mxu0 %vm247_vm1, %v1540_v30  ;;  %1504 = vmatprep.mubr.msk.bf16.mxu1 %vm247_vm1, %v1541_v31 }
  0x3e   :  { %1473 = vmatmul.mubr.msk.bf16.gmra.mrb[28].mxu0 %vm247_vm1, %v1542_v32  ;;  %1505 = vmatmul.mubr.msk.bf16.gmra.mrb[28].mxu1 %vm247_vm1, %v1543_v33 }
  0xd9   :  { %v1446_v35 = vpop.f32.mrb[0].mxu0  ;;  %v1478_v37 = vpop.f32.mrb[0].mxu1 }
  0xda   :  { %v391_v36 = vadd.f32 %v1446_v35, %v1698_v34  ;;  %v382_v38 = vpop.f32.mrb[1].mxu0  ;;  %v519_v39 = vadd.f32 %v1478_v37, %v1698_v34  ;;  %v510_v41 = vpop.f32.mrb[1].mxu1 }
  0xdb   :  { %v383_v40 = vadd.f32 %v1698_v34, %v382_v38  ;;  %v1447_v42 = vpop.f32.mrb[2].mxu0  ;;  %v511_v43 = vadd.f32 %v1698_v34, %v510_v41  ;;  %v1479_v45 = vpop.f32.mrb[2].mxu1 }
  0xdc   :  { %v394_v44 = vadd.f32 %v1447_v42, %v1698_v34  ;;  %v385_v46 = vpop.f32.mrb[3].mxu0  ;;  %v522_v47 = vadd.f32 %v1479_v45, %v1698_v34  ;;  %v513_v49 = vpop.f32.mrb[3].mxu1  ;;  %v639_v50 = vmax.f32 %v391_v36, 0.0  ;;  %v671_v53 = vmax.f32 %v519_v39, 0.0 }
  0xdd   :  { %v386_v48 = vadd.f32 %v1698_v34, %v385_v46  ;;  %v514_v52 = vadd.f32 %v1698_v34, %v513_v49  ;;  %v637_v54 = vmax.f32 %v383_v40, 0.0  ;;  %v669_v57 = vmax.f32 %v511_v43, 0.0 }
  0xde   :  { %v640_v51 = vmax.f32 %v394_v44, 0.0  ;;  %v672_v55 = vmax.f32 %v522_v47, 0.0 }
  0xdf   :  { %v638_v56 = vmax.f32 %v386_v48, 0.0  ;;  %v670_v59 = vmax.f32 %v514_v52, 0.0 }
  0xe0   :  { %v1226_v58 = vpack.c.bf16 %v640_v51, %v639_v50  ;;  %v1306_v60 = vpack.c.bf16 %v672_v55, %v671_v53 }
  0xe1   :  { %v1221_v61 = vpack.c.bf16 %v638_v56, %v637_v54  ;;  %v1450_v62 = vpop.f32.mrb[4].mxu0  ;;  %v1301_v63 = vpack.c.bf16 %v670_v59, %v669_v57  ;;  %v1482_v1 = vpop.f32.mrb[4].mxu1 }
  0xe2   :  { %1378 = vst [vmem:[%s1863_s3 + $0x8] sm:$0xff] %v1226_v58   ;;  %v407_v0 = vadd.f32 %v1450_v62, %v1698_v34  ;;  %v398_v2 = vpop.f32.mrb[5].mxu0  ;;  %1394 = vst [vmem:[%s1863_s3 + $0x88] sm:$0xff] %v1306_v60   ;;  %v535_v3 = vadd.f32 %v1482_v1, %v1698_v34  ;;  %v526_v5 = vpop.f32.mrb[5].mxu1 }
  0xe3   :  { %1222 = vst [vmem:[%s1863_s3] sm:$0xff] %v1221_v61   ;;  %v399_v4 = vadd.f32 %v1698_v34, %v398_v2  ;;  %v1451_v6 = vpop.f32.mrb[6].mxu0  ;;  %1393 = vst [vmem:[%s1863_s3 + $0x80] sm:$0xff] %v1301_v63   ;;  %v527_v7 = vadd.f32 %v1698_v34, %v526_v5  ;;  %v1483_v9 = vpop.f32.mrb[6].mxu1 }
  0xe4   :  { %v410_v8 = vadd.f32 %v1451_v6, %v1698_v34  ;;  %v401_v10 = vpop.f32.mrb[7].mxu0  ;;  %v538_v11 = vadd.f32 %v1483_v9, %v1698_v34  ;;  %v529_v13 = vpop.f32.mrb[7].mxu1  ;;  %v643_v14 = vmax.f32 %v407_v0, 0.0  ;;  %v675_v17 = vmax.f32 %v535_v3, 0.0 }
  0xe5   :  { %v402_v12 = vadd.f32 %v1698_v34, %v401_v10  ;;  %v530_v16 = vadd.f32 %v1698_v34, %v529_v13  ;;  %v641_v18 = vmax.f32 %v399_v4, 0.0  ;;  %v673_v21 = vmax.f32 %v527_v7, 0.0 }
  0xe6   :  { %v644_v15 = vmax.f32 %v410_v8, 0.0  ;;  %v676_v19 = vmax.f32 %v538_v11, 0.0 }
  0xe7   :  { %v642_v20 = vmax.f32 %v402_v12, 0.0  ;;  %v674_v23 = vmax.f32 %v530_v16, 0.0 }
  0xe8   :  { %v1236_v22 = vpack.c.bf16 %v644_v15, %v643_v14  ;;  %v1316_v24 = vpack.c.bf16 %v676_v19, %v675_v17 }
  0xe9   :  { %v1231_v25 = vpack.c.bf16 %v642_v20, %v641_v18  ;;  %v1454_v26 = vpop.f32.mrb[8].mxu0  ;;  %v1311_v27 = vpack.c.bf16 %v674_v23, %v673_v21  ;;  %v1486_v29 = vpop.f32.mrb[8].mxu1 }
  0xea   :  { %1380 = vst [vmem:[%s1863_s3 + $0x18] sm:$0xff] %v1236_v22   ;;  %v423_v28 = vadd.f32 %v1454_v26, %v1698_v34  ;;  %v414_v30 = vpop.f32.mrb[9].mxu0  ;;  %1396 = vst [vmem:[%s1863_s3 + $0x98] sm:$0xff] %v1316_v24   ;;  %v551_v31 = vadd.f32 %v1486_v29, %v1698_v34  ;;  %v542_v33 = vpop.f32.mrb[9].mxu1 }
  0xeb   :  { %1379 = vst [vmem:[%s1863_s3 + $0x10] sm:$0xff] %v1231_v25   ;;  %v415_v32 = vadd.f32 %v1698_v34, %v414_v30  ;;  %v1455_v35 = vpop.f32.mrb[10].mxu0  ;;  %1395 = vst [vmem:[%s1863_s3 + $0x90] sm:$0xff] %v1311_v27   ;;  %v543_v36 = vadd.f32 %v1698_v34, %v542_v33  ;;  %v1487_v38 = vpop.f32.mrb[10].mxu1 }
  0xec   :  { %v426_v37 = vadd.f32 %v1455_v35, %v1698_v34  ;;  %v417_v39 = vpop.f32.mrb[11].mxu0  ;;  %v554_v40 = vadd.f32 %v1487_v38, %v1698_v34  ;;  %v545_v42 = vpop.f32.mrb[11].mxu1  ;;  %v647_v43 = vmax.f32 %v423_v28, 0.0  ;;  %v679_v46 = vmax.f32 %v551_v31, 0.0 }
  0xed   :  { %v418_v41 = vadd.f32 %v1698_v34, %v417_v39  ;;  %v546_v45 = vadd.f32 %v1698_v34, %v545_v42  ;;  %v645_v47 = vmax.f32 %v415_v32, 0.0  ;;  %v677_v50 = vmax.f32 %v543_v36, 0.0 }
  0xee   :  { %v648_v44 = vmax.f32 %v426_v37, 0.0  ;;  %v680_v48 = vmax.f32 %v554_v40, 0.0 }
  0xef   :  { %v646_v49 = vmax.f32 %v418_v41, 0.0  ;;  %v678_v52 = vmax.f32 %v546_v45, 0.0 }
  0xf0   :  { %v1246_v51 = vpack.c.bf16 %v648_v44, %v647_v43  ;;  %v1326_v53 = vpack.c.bf16 %v680_v48, %v679_v46 }
  0xf1   :  { %v1241_v54 = vpack.c.bf16 %v646_v49, %v645_v47  ;;  %v1458_v55 = vpop.f32.mrb[12].mxu0  ;;  %v1321_v56 = vpack.c.bf16 %v678_v52, %v677_v50  ;;  %v1490_v58 = vpop.f32.mrb[12].mxu1 }
  0xf2   :  { %1382 = vst [vmem:[%s1863_s3 + $0x28] sm:$0xff] %v1246_v51   ;;  %v439_v57 = vadd.f32 %v1458_v55, %v1698_v34  ;;  %v430_v59 = vpop.f32.mrb[13].mxu0  ;;  %1398 = vst [vmem:[%s1863_s3 + $0xa8] sm:$0xff] %v1326_v53   ;;  %v567_v60 = vadd.f32 %v1490_v58, %v1698_v34  ;;  %v558_v62 = vpop.f32.mrb[13].mxu1 }
  0xf3   :  { %1381 = vst [vmem:[%s1863_s3 + $0x20] sm:$0xff] %v1241_v54   ;;  %v431_v61 = vadd.f32 %v1698_v34, %v430_v59  ;;  %v1459_v63 = vpop.f32.mrb[14].mxu0  ;;  %1397 = vst [vmem:[%s1863_s3 + $0xa0] sm:$0xff] %v1321_v56   ;;  %v559_v0 = vadd.f32 %v1698_v34, %v558_v62  ;;  %v1491_v2 = vpop.f32.mrb[14].mxu1 }
  0xf4   :  { %v442_v1 = vadd.f32 %v1459_v63, %v1698_v34  ;;  %v433_v3 = vpop.f32.mrb[15].mxu0  ;;  %v570_v4 = vadd.f32 %v1491_v2, %v1698_v34  ;;  %v561_v6 = vpop.f32.mrb[15].mxu1  ;;  %v651_v7 = vmax.f32 %v439_v57, 0.0  ;;  %v683_v10 = vmax.f32 %v567_v60, 0.0 }
  0xf5   :  { %v434_v5 = vadd.f32 %v1698_v34, %v433_v3  ;;  %v562_v9 = vadd.f32 %v1698_v34, %v561_v6  ;;  %v649_v11 = vmax.f32 %v431_v61, 0.0  ;;  %v681_v14 = vmax.f32 %v559_v0, 0.0 }
  0xf6   :  { %v652_v8 = vmax.f32 %v442_v1, 0.0  ;;  %v684_v12 = vmax.f32 %v570_v4, 0.0 }
  0xf7   :  { %v650_v13 = vmax.f32 %v434_v5, 0.0  ;;  %v682_v16 = vmax.f32 %v562_v9, 0.0 }
  0xf8   :  { %v1256_v15 = vpack.c.bf16 %v652_v8, %v651_v7  ;;  %v1336_v17 = vpack.c.bf16 %v684_v12, %v683_v10 }
  0xf9   :  { %v1251_v18 = vpack.c.bf16 %v650_v13, %v649_v11  ;;  %v1462_v19 = vpop.f32.mrb[16].mxu0  ;;  %v1331_v20 = vpack.c.bf16 %v682_v16, %v681_v14  ;;  %v1494_v22 = vpop.f32.mrb[16].mxu1 }
  0xfa   :  { %1384 = vst [vmem:[%s1863_s3 + $0x38] sm:$0xff] %v1256_v15   ;;  %v455_v21 = vadd.f32 %v1462_v19, %v1698_v34  ;;  %v446_v23 = vpop.f32.mrb[17].mxu0  ;;  %1400 = vst [vmem:[%s1863_s3 + $0xb8] sm:$0xff] %v1336_v17   ;;  %v583_v24 = vadd.f32 %v1494_v22, %v1698_v34  ;;  %v574_v26 = vpop.f32.mrb[17].mxu1 }
  0xfb   :  { %1383 = vst [vmem:[%s1863_s3 + $0x30] sm:$0xff] %v1251_v18   ;;  %v447_v25 = vadd.f32 %v1698_v34, %v446_v23  ;;  %v1463_v27 = vpop.f32.mrb[18].mxu0  ;;  %1399 = vst [vmem:[%s1863_s3 + $0xb0] sm:$0xff] %v1331_v20   ;;  %v575_v28 = vadd.f32 %v1698_v34, %v574_v26  ;;  %v1495_v30 = vpop.f32.mrb[18].mxu1 }
  0xfc   :  { %v458_v29 = vadd.f32 %v1463_v27, %v1698_v34  ;;  %v449_v31 = vpop.f32.mrb[19].mxu0  ;;  %v586_v32 = vadd.f32 %v1495_v30, %v1698_v34  ;;  %v577_v35 = vpop.f32.mrb[19].mxu1  ;;  %v655_v36 = vmax.f32 %v455_v21, 0.0  ;;  %v687_v39 = vmax.f32 %v583_v24, 0.0 }
  0xfd   :  { %v450_v33 = vadd.f32 %v1698_v34, %v449_v31  ;;  %v578_v38 = vadd.f32 %v1698_v34, %v577_v35  ;;  %v653_v40 = vmax.f32 %v447_v25, 0.0  ;;  %v685_v43 = vmax.f32 %v575_v28, 0.0 }
  0xfe   :  { %v656_v37 = vmax.f32 %v458_v29, 0.0  ;;  %v688_v41 = vmax.f32 %v586_v32, 0.0 }
  0xff   :  { %v654_v42 = vmax.f32 %v450_v33, 0.0  ;;  %v686_v45 = vmax.f32 %v578_v38, 0.0 }
 0x100   :  { %v1266_v44 = vpack.c.bf16 %v656_v37, %v655_v36  ;;  %v1346_v46 = vpack.c.bf16 %v688_v41, %v687_v39 }
 0x101   :  { %v1261_v47 = vpack.c.bf16 %v654_v42, %v653_v40  ;;  %v1466_v48 = vpop.f32.mrb[20].mxu0  ;;  %v1341_v49 = vpack.c.bf16 %v686_v45, %v685_v43  ;;  %v1498_v51 = vpop.f32.mrb[20].mxu1 }
 0x102   :  { %1386 = vst [vmem:[%s1863_s3 + $0x48] sm:$0xff] %v1266_v44   ;;  %v471_v50 = vadd.f32 %v1466_v48, %v1698_v34  ;;  %v462_v52 = vpop.f32.mrb[21].mxu0  ;;  %1402 = vst [vmem:[%s1863_s3 + $0xc8] sm:$0xff] %v1346_v46   ;;  %v599_v53 = vadd.f32 %v1498_v51, %v1698_v34  ;;  %v590_v55 = vpop.f32.mrb[21].mxu1 }
 0x103   :  { %1385 = vst [vmem:[%s1863_s3 + $0x40] sm:$0xff] %v1261_v47   ;;  %v463_v54 = vadd.f32 %v1698_v34, %v462_v52  ;;  %v1467_v56 = vpop.f32.mrb[22].mxu0  ;;  %1401 = vst [vmem:[%s1863_s3 + $0xc0] sm:$0xff] %v1341_v49   ;;  %v591_v57 = vadd.f32 %v1698_v34, %v590_v55  ;;  %v1499_v59 = vpop.f32.mrb[22].mxu1 }
 0x104   :  { %v474_v58 = vadd.f32 %v1467_v56, %v1698_v34  ;;  %v465_v60 = vpop.f32.mrb[23].mxu0  ;;  %v602_v61 = vadd.f32 %v1499_v59, %v1698_v34  ;;  %v593_v63 = vpop.f32.mrb[23].mxu1  ;;  %v659_v0 = vmax.f32 %v471_v50, 0.0  ;;  %v691_v3 = vmax.f32 %v599_v53, 0.0 }
 0x105   :  { %v466_v62 = vadd.f32 %v1698_v34, %v465_v60  ;;  %v594_v2 = vadd.f32 %v1698_v34, %v593_v63  ;;  %v657_v4 = vmax.f32 %v463_v54, 0.0  ;;  %v689_v7 = vmax.f32 %v591_v57, 0.0 }
 0x106   :  { %v660_v1 = vmax.f32 %v474_v58, 0.0  ;;  %v692_v5 = vmax.f32 %v602_v61, 0.0 }
 0x107   :  { %v658_v6 = vmax.f32 %v466_v62, 0.0  ;;  %v690_v9 = vmax.f32 %v594_v2, 0.0 }
 0x108   :  { %v1276_v8 = vpack.c.bf16 %v660_v1, %v659_v0  ;;  %v1356_v10 = vpack.c.bf16 %v692_v5, %v691_v3 }
 0x109   :  { %v1271_v11 = vpack.c.bf16 %v658_v6, %v657_v4  ;;  %v1470_v12 = vpop.f32.mrb[24].mxu0  ;;  %v1351_v13 = vpack.c.bf16 %v690_v9, %v689_v7  ;;  %v1502_v15 = vpop.f32.mrb[24].mxu1 }
 0x10a   :  { %1388 = vst [vmem:[%s1863_s3 + $0x58] sm:$0xff] %v1276_v8   ;;  %v487_v14 = vadd.f32 %v1470_v12, %v1698_v34  ;;  %v478_v16 = vpop.f32.mrb[25].mxu0  ;;  %1404 = vst [vmem:[%s1863_s3 + $0xd8] sm:$0xff] %v1356_v10   ;;  %v615_v17 = vadd.f32 %v1502_v15, %v1698_v34  ;;  %v606_v19 = vpop.f32.mrb[25].mxu1 }
 0x10b   :  { %1387 = vst [vmem:[%s1863_s3 + $0x50] sm:$0xff] %v1271_v11   ;;  %v479_v18 = vadd.f32 %v1698_v34, %v478_v16  ;;  %v1471_v20 = vpop.f32.mrb[26].mxu0  ;;  %1403 = vst [vmem:[%s1863_s3 + $0xd0] sm:$0xff] %v1351_v13   ;;  %v607_v21 = vadd.f32 %v1698_v34, %v606_v19  ;;  %v1503_v23 = vpop.f32.mrb[26].mxu1 }
 0x10c   :  { %v490_v22 = vadd.f32 %v1471_v20, %v1698_v34  ;;  %v481_v24 = vpop.f32.mrb[27].mxu0  ;;  %v618_v25 = vadd.f32 %v1503_v23, %v1698_v34  ;;  %v609_v27 = vpop.f32.mrb[27].mxu1  ;;  %v663_v28 = vmax.f32 %v487_v14, 0.0  ;;  %v695_v31 = vmax.f32 %v615_v17, 0.0 }
 0x10d   :  { %v482_v26 = vadd.f32 %v1698_v34, %v481_v24  ;;  %v610_v30 = vadd.f32 %v1698_v34, %v609_v27  ;;  %v661_v32 = vmax.f32 %v479_v18, 0.0  ;;  %v693_v36 = vmax.f32 %v607_v21, 0.0 }
 0x10e   :  { %v664_v29 = vmax.f32 %v490_v22, 0.0  ;;  %v696_v33 = vmax.f32 %v618_v25, 0.0 }
 0x10f   :  { %v662_v35 = vmax.f32 %v482_v26, 0.0  ;;  %v694_v38 = vmax.f32 %v610_v30, 0.0 }
 0x110   :  { %v1286_v37 = vpack.c.bf16 %v664_v29, %v663_v28  ;;  %v1366_v39 = vpack.c.bf16 %v696_v33, %v695_v31 }
 0x111   :  { %v1281_v40 = vpack.c.bf16 %v662_v35, %v661_v32  ;;  %v1474_v41 = vpop.f32.mrb[28].mxu0  ;;  %v1361_v42 = vpack.c.bf16 %v694_v38, %v693_v36  ;;  %v1506_v44 = vpop.f32.mrb[28].mxu1 }
 0x112   :  { %1390 = vst [vmem:[%s1863_s3 + $0x68] sm:$0xff] %v1286_v37   ;;  %v503_v43 = vadd.f32 %v1474_v41, %v1698_v34  ;;  %v494_v45 = vpop.f32.mrb[29].mxu0  ;;  %1406 = vst [vmem:[%s1863_s3 + $0xe8] sm:$0xff] %v1366_v39   ;;  %v631_v46 = vadd.f32 %v1506_v44, %v1698_v34  ;;  %v622_v48 = vpop.f32.mrb[29].mxu1 }
 0x113   :  { %1389 = vst [vmem:[%s1863_s3 + $0x60] sm:$0xff] %v1281_v40   ;;  %v495_v47 = vadd.f32 %v1698_v34, %v494_v45  ;;  %v1475_v49 = vpop.f32.mrb[30].mxu0  ;;  %1405 = vst [vmem:[%s1863_s3 + $0xe0] sm:$0xff] %v1361_v42   ;;  %v623_v50 = vadd.f32 %v1698_v34, %v622_v48  ;;  %v1507_v52 = vpop.f32.mrb[30].mxu1 }
 0x114   :  { %v506_v51 = vadd.f32 %v1475_v49, %v1698_v34  ;;  %v497_v53 = vpop.f32.mrb[31].mxu0  ;;  %v634_v54 = vadd.f32 %v1507_v52, %v1698_v34  ;;  %v625_v56 = vpop.f32.mrb[31].mxu1  ;;  %v667_v57 = vmax.f32 %v503_v43, 0.0  ;;  %v699_v60 = vmax.f32 %v631_v46, 0.0 }
 0x115   :  { %v498_v55 = vadd.f32 %v1698_v34, %v497_v53  ;;  %v626_v59 = vadd.f32 %v1698_v34, %v625_v56  ;;  %v665_v61 = vmax.f32 %v495_v47, 0.0  ;;  %v697_v0 = vmax.f32 %v623_v50, 0.0 }
 0x116   :  { %v668_v58 = vmax.f32 %v506_v51, 0.0  ;;  %v700_v62 = vmax.f32 %v634_v54, 0.0 }
 0x117   :  { %v666_v63 = vmax.f32 %v498_v55, 0.0  ;;  %v698_v2 = vmax.f32 %v626_v59, 0.0 }
 0x118   :  { %v1296_v1 = vpack.c.bf16 %v668_v58, %v667_v57  ;;  %v1376_v3 = vpack.c.bf16 %v700_v62, %v699_v60 }
 0x119   :  { %v1291_v4 = vpack.c.bf16 %v666_v63, %v665_v61  ;;  %v1371_v5 = vpack.c.bf16 %v698_v2, %v697_v0 }
 0x11a   :  { %1392 = vst [vmem:[%s1863_s3 + $0x78] sm:$0xff] %v1296_v1   ;;  %1408 = vst [vmem:[%s1863_s3 + $0xf8] sm:$0xff] %v1376_v3  }
 0x11b   :  { %1391 = vst [vmem:[%s1863_s3 + $0x70] sm:$0xff] %v1291_v4   ;;  %1407 = vst [vmem:[%s1863_s3 + $0xf0] sm:$0xff] %v1371_v5  }

// kernel: inception_d.6
= control target key start
LH: loop header
LB: loop body
LE: loop exit
PB: predicated region body
PF: predicated region fallthrough
CT: control target
= control target key end

     0   :  { %s1904_s12 = smov 0   ;;  %s2473_s0 = inlined_call_operand.vmem [shape: bf16[2,129,16], index: 0, kind: input, shape index: {}]   ;;  %s2474_s1 = inlined_call_operand.vmem [shape: bf16[6,16,8], index: 1, kind: input, shape index: {}]   ;;  %s2475_s2 = inlined_call_operand.vmem [shape: f32[1,8], index: 2, kind: input, shape index: {}]   ;;  %s2476_s3 = inlined_call_operand.vmem [shape: bf16[2,112,8], index: 3, kind: output, shape index: {}]  }
   0x1 LB: > { %s1456_s13 = sadd.s32 4294967295, %s1880_s12   ;;  %p1460_p0 = scmp.ge.s32.totalorder %s1880_s12, 1  ;;  %s1880_s12 = sphi %s1904_s12, %s13_s12  }
   0x2   : > { %p137_p1 = scmp.lt.s32.totalorder %s1880_s12, 3 }
   0x4   : > { %p138_p2 = pnand %p1460_p0, %p137_p1 }
   0x5   : > { %v1830_v0 = vld [vmem:[%s2474_s1 + $0x8] sm:$0xff] (!%p138_p2)   ;;  %v1882_v1 = vmov (!%p138_p2), 0.0   ;;  %v1831_v2 = vld [vmem:[%s2474_s1] sm:$0xff] (!%p138_p2)   ;;  %vm1883_vm0 = vmmov (!%p138_p2), 0   ;;  %p161_p3 = scmp.lt.s32.totalorder (!%p138_p2), %s1456_s13, 1  ;;  %vm297_vm1 = vcmask (!%p138_p2), 130048  }
   0x6   : > { %141 = sbr.rel (%p138_p2) target bundleno = 412 (0x19c), region = 32  ;;  %1638 = vmatprep.subr.bf16.mxu0 (!%p138_p2), %v1882_v1  ;;  %1668 = vmatprep.subr.bf16.mxu1 (!%p138_p2), %v1882_v1  ;;  %v1836_v3 = vld [vmem:[%s2474_s1 + $0x18] sm:$0xff] (!%p138_p2)   ;;  %vm230_vm2 = vsmask.f32 (!%p138_p2), 7424  ;;  %v1835_v20 = vld [vmem:[%s2474_s1 + $0x10] sm:$0xff] (!%p138_p2)   ;;  %vm1386_vm3 = vcmask (!%p138_p2), 60416  }
   0x7   : > { %1639 = vmatpush3.bf16.msra.mxu0 (!%p138_p2), %v1830_v0  ;;  %1670 = vmatprep.mubr.msk.bf16.mxu1 (!%p138_p2), %vm1883_vm0, %v1882_v1 }
   0x8   : > { %1669 = vmatpush3.bf16.msra.mxu1 (!%p138_p2), %v1831_v2  ;;  %1640 = vmatprep.mubr.msk.bf16.mxu0 (!%p138_p2), %vm1883_vm0, %v1882_v1 }
   0x9   : > { %1698 = vmatprep.subr.bf16.mxu0 (!%p138_p2), %v1882_v1  ;;  %1728 = vmatprep.subr.bf16.mxu1 (!%p138_p2), %v1882_v1 }
   0xd   : > { %s2481_s13 = smov (!%p161_p3, %s1456_s13), 1 }
   0xe   : > { %s1818_s18 = smul.u32 68, %s2481_s13 }
   0xf   : > { %s1819_s5 = smul.u32 56, %s2481_s13 }
  0x10   : > { %s1932_s21 = scalar_lea.vmem %s2473_s0, %s1818_s18 }
  0x11   : > { %v172_v4 = vld [vmem:[%s1932_s21] sm:$0xf]  ;;  %v1939_v5 = vld [vmem:[%s1932_s21 + $0x4] sm:$0xf]  ;;  %v1942_v6 = vld [vmem:[%s1932_s21 + $0x8] sm:$0xf]  ;;  %s2416_s8 = scalar_lea.vmem %s2476_s3, %s1819_s5 }
  0x12   : > { %v1945_v7 = vld [vmem:[%s1932_s21 + $0xc] sm:$0xf]  ;;  %v1465_v8 = vcombine.low %v172_v4, %v1939_v5  ;;  %v1949_v9 = vld [vmem:[%s1932_s21 + $0x10] sm:$0xf]  ;;  %v1952_v10 = vld [vmem:[%s1932_s21 + $0x14] sm:$0xf] }
  0x13   : > { %v1466_v11 = vcombine.low %v1942_v6, %v1945_v7  ;;  %v1959_v14 = vcombine.low %v1949_v9, %v1952_v10  ;;  %v1962_v15 = vld [vmem:[%s1932_s21 + $0x18] sm:$0xf]  ;;  %v1965_v16 = vld [vmem:[%s1932_s21 + $0x1c] sm:$0xf]  ;;  %v1979_v25 = vld [vmem:[%s1932_s21 + $0x20] sm:$0xf] }
  0x14   : > { %1671 = vmatmul.mubr.msk.bf16.vlgmr.msra.gmra.mrb[0].mxu1 %vm297_vm1, %v1465_v8  ;;  %v232_v12 = vshrl.u32 %v1465_v8, 16  ;;  %v234_v13 = vshll.u32 %v1465_v8, 16  ;;  %v1975_v21 = vcombine.low %v1962_v15, %v1965_v16  ;;  %v1982_v26 = vld [vmem:[%s1932_s21 + $0x24] sm:$0xf]  ;;  %v1986_v28 = vld [vmem:[%s1932_s21 + $0x28] sm:$0xf] }
  0x15   : > { %v239_v17 = vshll.u32 %v1466_v11, 16  ;;  %1729 = vmatpush3.bf16.msra.mxu1 %v1836_v3  ;;  %1674 = vmatprep.mubr.msk.bf16.mxu1 %vm1883_vm0, %v1882_v1  ;;  %v243_v23 = vshrl.u32 %v1466_v11, 16  ;;  %v247_v24 = vshll.u32 %v1959_v14, 16  ;;  %v1989_v29 = vld [vmem:[%s1932_s21 + $0x2c] sm:$0xf]  ;;  %v1995_v31 = vcombine.low %v1979_v25, %v1982_v26 }
  0x16   : > { %v236_v18 = vrot.slane %v234_v13, 1  ;;  %1788 = vmatprep.subr.bf16.mxu1 %v1882_v1  ;;  %v255_v30 = vshll.u32 %v1975_v21, 16  ;;  %v1998_v32 = vld [vmem:[%s1932_s21 + $0x14] sm:$0xf]  ;;  %v2001_v33 = vld [vmem:[%s1932_s21 + $0x18] sm:$0xf]  ;;  %v2015_v39 = vcombine.low %v1986_v28, %v1989_v29 }
  0x17   : > { %v241_v19 = vrot.slane %v239_v17, 1  ;;  %v249_v35 = vrot.slane %v247_v24, 1  ;;  %v2006_v36 = vld [vmem:[%s1932_s21 + $0x1c] sm:$0xf]  ;;  %v2009_v37 = vld [vmem:[%s1932_s21 + $0x20] sm:$0xf]  ;;  %v1510_v41 = vcombine.low %v1998_v32, %v2001_v33 }
  0x18   : > { %v237_v22 = vor.u32 %v236_v18, %v232_v12  ;;  %v251_v38 = vshrl.u32 %v1959_v14, 16  ;;  %v259_v40 = vshrl.u32 %v1975_v21, 16  ;;  %v1511_v42 = vcombine.low %v2006_v36, %v2009_v37  ;;  %v2026_v43 = vld [vmem:[%s1932_s21 + $0x24] sm:$0xf]  ;;  %v2029_v44 = vld [vmem:[%s1932_s21 + $0x28] sm:$0xf] }
  0x19   : > { %v245_v34 = vor.u32 %v243_v23, %v241_v19  ;;  %v257_v45 = vrot.slane %v255_v30, 1  ;;  %v263_v46 = vshll.u32 %v1995_v31, 16  ;;  %v2033_v47 = vld [vmem:[%s1932_s21 + $0x2c] sm:$0xf]  ;;  %v2036_v48 = vld [vmem:[%s1932_s21 + $0x30] sm:$0xf]  ;;  %v1512_v56 = vcombine.low %v2026_v43, %v2029_v44 }
  0x1a   : > { %v242_v27 = vsel %vm230_vm2, %v237_v22, %v241_v19  ;;  %v267_v50 = vshrl.u32 %v1995_v31, 16  ;;  %v732_v51 = vshll.u32 %v1510_v41, 16  ;;  %v736_v52 = vshrl.u32 %v1510_v41, 16  ;;  %v2044_v57 = vld [vmem:[%s1932_s21 + $0x34] sm:$0xf]  ;;  %v1862_v23 = vld [vmem:[%s1932_s21 + $0x18] sm:$0xff]  }
  0x1b   : > { %1641 = vmatmul.mubr.msk.bf16.vlgmr.msra.gmra.mrb[0].mxu0 %vm297_vm1, %v242_v27  ;;  %v250_v49 = vsel %vm230_vm2, %v245_v34, %v249_v35  ;;  %v253_v53 = vor.u32 %v251_v38, %v249_v35  ;;  %v271_v54 = vshll.u32 %v2015_v39, 16  ;;  %v740_v55 = vshll.u32 %v1511_v42, 16  ;;  %v2047_v58 = vld [vmem:[%s1932_s21 + $0x38] sm:$0xf]  ;;  %v1860_v17 = vld [vmem:[%s1932_s21 + $0x10] sm:$0xff]  }
  0x1c   : > { %1699 = vmatpush3.bf16.msra.mxu0 %v1835_v20  ;;  %1644 = vmatprep.mubr.msk.bf16.mxu0 %vm1883_vm0, %v1882_v1  ;;  %v261_v59 = vor.u32 %v259_v40, %v257_v45  ;;  %v2049_v60 = vrot.slane %v732_v51, 1  ;;  %v744_v61 = vshrl.u32 %v1511_v42, 16  ;;  %v1513_v62 = vcombine.low %v2033_v47, %v2036_v48  ;;  %v1857_v63 = vld [vmem:[%s1932_s21 + $0x3c] ss:$0 sps:$4 sm:$0x11]  }
  0x1d   : > { %1675 = vmatmul.mubr.msk.bf16.gmra.mrb[4].mxu1 %vm297_vm1, %v1466_v11  ;;  %1758 = vmatprep.subr.bf16.mxu0 %v1882_v1  ;;  %v2055_v0 = vrot.slane %v263_v46, 1  ;;  %v742_v2 = vrot.slane %v740_v55, 1  ;;  %v748_v3 = vshll.u32 %v1512_v56, 16  ;;  %v752_v4 = vshrl.u32 %v1512_v56, 16  ;;  %v2058_v8 = vld [vmem:[%s1932_s21 + $0x38] sm:$0xf] }
  0x1e   : > { %1678 = vmatprep.mubr.msk.bf16.mxu1 %vm1883_vm0, %v1882_v1  ;;  %v1859_v11 = vld [vmem:[%s1932_s21 + $0x8] sm:$0xff]   ;;  %v738_v12 = vor.u32 %v736_v52, %v2049_v60  ;;  %v756_v13 = vshll.u32 %v1513_v62, 16  ;;  %v2068_v18 = vld [vmem:[%s1932_s21 + $0x34] sm:$0xf]  ;;  %v1514_v22 = vcombine.low %v2044_v57, %v2047_v58  ;;  %v258_v24 = vsel %vm230_vm2, %v253_v53, %v257_v45  ;;  %v1864_v45 = vld [vmem:[%s1932_s21 + $0x20] sm:$0xff]  }
  0x1f   : > { %v746_v19 = vor.u32 %v744_v61, %v742_v2  ;;  %v750_v20 = vrot.slane %v748_v3, 1  ;;  %v760_v34 = vshrl.u32 %v1513_v62, 16  ;;  %v2082_v35 = vld [vmem:[%s1932_s21 + $0x8] sm:$0xf]  ;;  %v2085_v38 = vld [vmem:[%s1932_s21 + $0xc] sm:$0xf]  ;;  %v1497_v52 = vcombine.low %v2068_v18, %v2058_v8 }
  0x20   : > { %v2077_v27 = vsel %vm230_vm2, %v738_v12, %v742_v2  ;;  %v758_v30 = vrot.slane %v756_v13, 1  ;;  %v764_v42 = vshll.u32 %v1514_v22, 16  ;;  %v772_v51 = vshll.u32 %v1857_v63, 16  ;;  %v2101_v63 = vld [vmem:[%s1932_s21 + $0x10] sm:$0xf] }
  0x21   : > { %v2088_v40 = vsel %vm230_vm2, %v746_v19, %v750_v20  ;;  %v754_v41 = vor.u32 %v752_v4, %v750_v20  ;;  %v1106_v56 = vshrl.u32 %v1859_v11, 16  ;;  %v1113_v62 = vshll.u32 %v1860_v17, 16  ;;  %v1866_v4 = vld [vmem:[%s1932_s21 + $0x28] sm:$0xff]  }
  0x22   : > { %v762_v46 = vor.u32 %v760_v34, %v758_v30  ;;  %v766_v55 = vrot.slane %v764_v42, 1  ;;  %v774_v61 = vrot.slane %v772_v51, 1  ;;  %v1526_v2 = vcombine.low %v2082_v35, %v2085_v38  ;;  %v1868_v34 = vld [vmem:[%s1932_s21 + $0x30] sm:$0xff]  }
  0x23   : > { %1645 = vmatmul.mubr.msk.bf16.gmra.mrb[4].mxu0 %vm297_vm1, %v250_v49  ;;  %v768_v49 = vshrl.u32 %v1514_v22, 16  ;;  %v2094_v53 = vsel %vm230_vm2, %v754_v41, %v758_v30  ;;  %v1117_v3 = vshrl.u32 %v1860_v17, 16  ;;  %v1121_v20 = vshll.u32 %v1862_v23, 16 }
  0x24   : > { %1648 = vmatprep.mubr.msk.bf16.mxu0 %vm1883_vm0, %v1882_v1  ;;  %v2104_v12 = vsel %vm230_vm2, %v762_v46, %v766_v55  ;;  %v1527_v22 = vcombine.low %v2101_v63, %v1998_v32  ;;  %v1125_v17 = vshrl.u32 %v1862_v23, 16  ;;  %v1129_v30 = vshll.u32 %v1864_v45, 16 }
  0x25   : > { %1679 = vmatmul.mubr.msk.bf16.gmra.mrb[8].mxu1 %vm297_vm1, %v1959_v14  ;;  %v266_v14 = vsel %vm230_vm2, %v261_v59, %v2055_v0  ;;  %v1108_v59 = vshll.u32 %v1859_v11, 16  ;;  %v770_v13 = vor.u32 %v768_v49, %v766_v55  ;;  %v1115_v11 = vrot.slane %v1113_v62, 1  ;;  %v1870_v49 = vld [vmem:[%s1932_s21 + $0x38] sm:$0xff]  }
  0x26   : > { %1682 = vmatprep.mubr.msk.bf16.mxu1 %vm1883_vm0, %v1882_v1  ;;  %v1123_v42 = vrot.slane %v1121_v20, 1  ;;  %v1131_v23 = vrot.slane %v1129_v30, 1  ;;  %v1133_v55 = vshrl.u32 %v1864_v45, 16  ;;  %v1153_v30 = vshll.u32 %v1870_v49, 16 }
  0x27   : > { %v1110_v19 = vrot.slane %v1108_v59, 1  ;;  %v1119_v51 = vor.u32 %v1117_v3, %v1115_v11  ;;  %v1137_v59 = vshll.u32 %v1866_v4, 16  ;;  %v1145_v3 = vshll.u32 %v1868_v34, 16 }
  0x28   : > { %v1135_v20 = vor.u32 %v1133_v55, %v1131_v23  ;;  %v1872_v55 = vld [vmem:[%s1932_s21 + $0x40] ss:$0 sps:$4 sm:$0x11]  }
  0x29   : > { %v1111_v41 = vor.u32 %v1110_v19, %v1106_v56  ;;  %v1141_v56 = vshrl.u32 %v1866_v4, 16  ;;  %v2130_v19 = vsel %vm230_vm2, %v1119_v51, %v1123_v42  ;;  %v1139_v46 = vrot.slane %v1137_v59, 1 }
  0x2a   : > { %v273_v51 = vrot.slane %v271_v54, 1  ;;  %v1161_v54 = vshll.u32 %v1872_v55, 16 }
  0x2b   : > { %1649 = vmatmul.mubr.msk.bf16.gmra.mrb[8].mxu0 %vm297_vm1, %v258_v24  ;;  %v2114_v24 = vsel %vm230_vm2, %v770_v13, %v774_v61  ;;  %v2122_v62 = vsel %vm230_vm2, %v1111_v41, %v1115_v11  ;;  %v2127_v13 = vld [vmem:[%s1932_s21 + $0x30] sm:$0xf]  ;;  %v1530_v11 = vcombine.low %v2029_v44, %v2033_v47  ;;  %v2138_v41 = vsel %vm230_vm2, %v1135_v20, %v1139_v46 }
  0x2c   : > { %1652 = vmatprep.mubr.msk.bf16.mxu0 %vm1883_vm0, %v1882_v1  ;;  %v1143_v4 = vor.u32 %v1141_v56, %v1139_v46  ;;  %v1147_v61 = vrot.slane %v1145_v3, 1  ;;  %v269_v46 = vor.u32 %v267_v50, %v2055_v0  ;;  %v2159_v56 = vld [vmem:[%s1932_s21 + $0x3c] sm:$0xf]  ;;  %v660_v0 = vld [vmem:[%s1932_s21 + $0x4] sm:$0xf] }
  0x2d   : > { %1683 = vmatmul.mubr.msk.bf16.gmra.mrb[12].mxu1 %vm297_vm1, %v1975_v21  ;;  %v1127_v21 = vor.u32 %v1125_v17, %v1123_v42  ;;  %v1149_v17 = vshrl.u32 %v1868_v34, 16  ;;  %v1531_v42 = vcombine.low %v2036_v48, %v2044_v57  ;;  %v1155_v34 = vrot.slane %v1153_v30, 1 }
  0x2e   : > { %1686 = vmatprep.mubr.msk.bf16.mxu1 %vm1883_vm0, %v1882_v1  ;;  %v2154_v59 = vsel %vm230_vm2, %v1143_v4, %v1147_v61  ;;  %v1508_v4 = vcombine.low %v660_v0, %v2082_v35 }
  0x2f   : > { %v2133_v45 = vsel %vm230_vm2, %v1127_v21, %v1131_v23  ;;  %v1471_v23 = vcombine.low %v2127_v13, %v2068_v18  ;;  %v1157_v21 = vshrl.u32 %v1870_v49, 16  ;;  %v274_v49 = vsel %vm230_vm2, %v269_v46, %v273_v51 }
  0x30   : > { %v1509_v46 = vcombine.low %v2085_v38, %v2101_v63 }
  0x31   : > { %v1159_v3 = vor.u32 %v1157_v21, %v1155_v34  ;;  %v719_v21 = vshll.u32 %v1508_v4, 16 }
  0x32   : > { %v724_v50 = vshll.u32 %v1509_v46, 16 }
  0x33   : > { %1653 = vmatmul.mubr.msk.bf16.gmra.mrb[12].mxu0 %vm297_vm1, %v266_v14  ;;  %v1151_v14 = vor.u32 %v1149_v17, %v1147_v61  ;;  %v1163_v61 = vrot.slane %v1161_v54, 1  ;;  %v279_v17 = vshll.u32 %v1471_v23, 16 }
  0x34   : > { %1656 = vmatprep.mubr.msk.bf16.mxu0 %vm1883_vm0, %v1882_v1 }
  0x35   : > { %1687 = vmatmul.mubr.msk.bf16.gmra.mrb[16].mxu1 %vm297_vm1, %v1995_v31  ;;  %v2164_v20 = vsel %vm230_vm2, %v1151_v14, %v1155_v34  ;;  %v275_v31 = vshrl.u32 %v2015_v39, 16  ;;  %v2172_v30 = vsel %vm230_vm2, %v1159_v3, %v1163_v61  ;;  %v281_v55 = vrot.slane %v279_v17, 1  ;;  %v1842_v14 = vld [vmem:[%s1932_s21 + $0x38] ss:$0 sps:$4 sm:$0x11]  }
  0x36   : > { %1690 = vmatprep.mubr.msk.bf16.mxu1 %vm1883_vm0, %v1882_v1  ;;  %v283_v3 = vshrl.u32 %v1471_v23, 16  ;;  %v287_v0 = vshll.u32 %v1842_v14, 16  ;;  %v717_v61 = vshrl.u32 %v1508_v4, 16  ;;  %v726_v17 = vrot.slane %v724_v50, 1  ;;  %v1846_v14 = vld [vmem:[%s2474_s1 + $0x28] sm:$0xff]  }
  0x37   : > { %v277_v34 = vor.u32 %v275_v31, %v273_v51  ;;  %v1491_v50 = vcombine.low %v1939_v5, %v1942_v6  ;;  %v1492_v5 = vcombine.low %v1945_v7, %v1949_v9  ;;  %v1493_v6 = vcombine.low %v1952_v10, %v1962_v15 }
  0x38   : > { %v289_v51 = vrot.slane %v287_v0, 1  ;;  %v1494_v7 = vcombine.low %v1965_v16, %v1979_v25  ;;  %v1495_v9 = vcombine.low %v1982_v26, %v1986_v28  ;;  %v1496_v10 = vcombine.low %v1989_v29, %v2127_v13 }
  0x39   : > { %v282_v54 = vsel %vm230_vm2, %v277_v34, %v281_v55  ;;  %v2477_v15 = vcombine.low %v2001_v33, %v2006_v36  ;;  %v2478_v16 = vcombine.low %v2009_v37, %v2026_v43  ;;  %v2479_v25 = vcombine.low %v2047_v58, %v2159_v56 }
  0x3b   : > { %1657 = vmatmul.mubr.msk.bf16.gmra.mrb[16].mxu0 %vm297_vm1, %v274_v49  ;;  %v721_v49 = vrot.slane %v719_v21, 1  ;;  %v728_v21 = vshrl.u32 %v1509_v46, 16 }
  0x3c   : > { %1660 = vmatprep.mubr.msk.bf16.mxu0 %vm1883_vm0, %v1882_v1 }
  0x3d   : > { %1691 = vmatmul.mubr.msk.bf16.gmra.mrb[20].mxu1 %vm297_vm1, %v2015_v39  ;;  %v285_v39 = vor.u32 %v283_v3, %v281_v55  ;;  %v722_v31 = vor.u32 %v721_v49, %v717_v61  ;;  %v1845_v55 = vld [vmem:[%s2474_s1 + $0x20] sm:$0xff]  }
  0x3e   : > { %1694 = vmatprep.mubr.msk.bf16.mxu1 %vm1883_vm0, %v1882_v1 }
  0x3f   : > { %v290_v34 = vsel %vm230_vm2, %v285_v39, %v289_v51  ;;  %v727_v4 = vsel %vm230_vm2, %v722_v31, %v726_v17 }
  0x43   : > { %1661 = vmatmul.mubr.msk.bf16.gmra.mrb[20].mxu0 %vm297_vm1, %v282_v54 }
  0x44   : > { %1664 = vmatprep.mubr.msk.bf16.mxu0 %vm1883_vm0, %v1882_v1 }
  0x45   : > { %1695 = vmatmul.mubr.msk.bf16.gmra.mrb[24].mxu1 %vm297_vm1, %v1471_v23  ;;  %v730_v23 = vor.u32 %v728_v21, %v726_v17 }
  0x46   : > { %1730 = vmatprep.mubr.msk.bf16.mxu1 %vm1883_vm0, %v1882_v1 }
  0x47   : > { %v735_v46 = vsel %vm230_vm2, %v730_v23, %v2049_v60 }
  0x4b   : > { %1665 = vmatmul.mubr.msk.bf16.gmra.mrb[24].mxu0 %vm297_vm1, %v290_v34 }
  0x4c   : > { %1700 = vmatprep.mubr.msk.bf16.mxu0 %vm1883_vm0, %v1882_v1 }
  0x4d   : > { %1731 = vmatmul.mubr.msk.bf16.vlgmr.msra.gmra.mrb[28].mxu1 %vm297_vm1, %v727_v4 }
  0x4e   : > { %1789 = vmatpush3.bf16.msra.mxu1 %v1846_v14  ;;  %1734 = vmatprep.mubr.msk.bf16.mxu1 %vm1883_vm0, %v1882_v1 }
  0x53   : > { %1701 = vmatmul.mubr.msk.bf16.vlgmr.msra.gmra.mrb[28].mxu0 %vm297_vm1, %v1491_v50 }
  0x54   : > { %1759 = vmatpush3.bf16.msra.mxu0 %v1845_v55  ;;  %1704 = vmatprep.mubr.msk.bf16.mxu0 %vm1883_vm0, %v1882_v1 }
  0x55   : > { %1735 = vmatmul.mubr.msk.bf16.gmra.mrb[32].mxu1 %vm297_vm1, %v735_v46 }
  0x56   : > { %1738 = vmatprep.mubr.msk.bf16.mxu1 %vm1883_vm0, %v1882_v1 }
  0x5b   : > { %1705 = vmatmul.mubr.msk.bf16.gmra.mrb[32].mxu0 %vm297_vm1, %v1492_v5 }
  0x5c   : > { %1708 = vmatprep.mubr.msk.bf16.mxu0 %vm1883_vm0, %v1882_v1 }
  0x5d   : > { %1739 = vmatmul.mubr.msk.bf16.gmra.mrb[36].mxu1 %vm297_vm1, %v2077_v27 }
  0x5e   : > { %1742 = vmatprep.mubr.msk.bf16.mxu1 %vm1883_vm0, %v1882_v1 }
  0x63   : > { %1709 = vmatmul.mubr.msk.bf16.gmra.mrb[36].mxu0 %vm297_vm1, %v1493_v6 }
  0x64   : > { %1712 = vmatprep.mubr.msk.bf16.mxu0 %vm1883_vm0, %v1882_v1 }
  0x65   : > { %1743 = vmatmul.mubr.msk.bf16.gmra.mrb[40].mxu1 %vm297_vm1, %v2088_v40 }
  0x66   : > { %1746 = vmatprep.mubr.msk.bf16.mxu1 %vm1883_vm0, %v1882_v1 }
  0x6b   : > { %1713 = vmatmul.mubr.msk.bf16.gmra.mrb[40].mxu0 %vm297_vm1, %v1494_v7 }
  0x6c   : > { %1716 = vmatprep.mubr.msk.bf16.mxu0 %vm1883_vm0, %v1882_v1 }
  0x6d   : > { %1747 = vmatmul.mubr.msk.bf16.gmra.mrb[44].mxu1 %vm297_vm1, %v2094_v53 }
  0x6e   : > { %1750 = vmatprep.mubr.msk.bf16.mxu1 %vm1883_vm0, %v1882_v1 }
  0x73   : > { %1717 = vmatmul.mubr.msk.bf16.gmra.mrb[44].mxu0 %vm297_vm1, %v1495_v9 }
  0x74   : > { %1720 = vmatprep.mubr.msk.bf16.mxu0 %vm1883_vm0, %v1882_v1 }
  0x75   : > { %1751 = vmatmul.mubr.msk.bf16.gmra.mrb[48].mxu1 %vm297_vm1, %v2104_v12 }
  0x76   : > { %1754 = vmatprep.mubr.msk.bf16.mxu1 %vm1883_vm0, %v1882_v1 }
  0x7b   : > { %1721 = vmatmul.mubr.msk.bf16.gmra.mrb[48].mxu0 %vm297_vm1, %v1496_v10 }
  0x7c   : > { %1724 = vmatprep.mubr.msk.bf16.mxu0 %vm1883_vm0, %v1882_v1 }
  0x7d   : > { %1755 = vmatmul.mubr.msk.bf16.gmra.mrb[52].mxu1 %vm297_vm1, %v2114_v24 }
  0x7e   : > { %1790 = vmatprep.mubr.msk.bf16.mxu1 %vm1883_vm0, %v1882_v1 }
  0x83   : > { %1725 = vmatmul.mubr.msk.bf16.gmra.mrb[52].mxu0 %vm297_vm1, %v1497_v52 }
  0x84   : > { %1760 = vmatprep.mubr.msk.bf16.mxu0 %vm1883_vm0, %v1882_v1 }
  0x85   : > { %1791 = vmatmul.mubr.msk.bf16.vlgmr.msra.gmra.mrb[56].mxu1 %vm297_vm1, %v2122_v62 }
  0x86   : > { %1794 = vmatprep.mubr.msk.bf16.mxu1 %vm1883_vm0, %v1882_v1 }
  0x8b   : > { %1761 = vmatmul.mubr.msk.bf16.vlgmr.msra.gmra.mrb[56].mxu0 %vm297_vm1, %v1526_v2 }
  0x8c   : > { %1764 = vmatprep.mubr.msk.bf16.mxu0 %vm1883_vm0, %v1882_v1 }
  0x8d   : > { %1795 = vmatmul.mubr.msk.bf16.gmra.mrb[60].mxu1 %vm297_vm1, %v2130_v19 }
  0x8e   : > { %1798 = vmatprep.mubr.msk.bf16.mxu1 %vm1883_vm0, %v1882_v1 }
  0x93   : > { %1765 = vmatmul.mubr.msk.bf16.gmra.mrb[60].mxu0 %vm297_vm1, %v1527_v22 }
  0x94   : > { %1768 = vmatprep.mubr.msk.bf16.mxu0 %vm1883_vm0, %v1882_v1 }
  0x95   : > { %1799 = vmatmul.mubr.msk.bf16.gmra.mrb[64].mxu1 %vm297_vm1, %v2133_v45 }
  0x96   : > { %1802 = vmatprep.mubr.msk.bf16.mxu1 %vm1883_vm0, %v1882_v1 }
  0x9b   : > { %1769 = vmatmul.mubr.msk.bf16.gmra.mrb[64].mxu0 %vm297_vm1, %v2477_v15 }
  0x9c   : > { %1772 = vmatprep.mubr.msk.bf16.mxu0 %vm1883_vm0, %v1882_v1 }
  0x9d   : > { %1803 = vmatmul.mubr.msk.bf16.gmra.mrb[68].mxu1 %vm297_vm1, %v2138_v41 }
  0x9e   : > { %1806 = vmatprep.mubr.msk.bf16.mxu1 %vm1883_vm0, %v1882_v1 }
  0xa3   : > { %1773 = vmatmul.mubr.msk.bf16.gmra.mrb[68].mxu0 %vm297_vm1, %v2478_v16 }
  0xa4   : > { %1776 = vmatprep.mubr.msk.bf16.mxu0 %vm1883_vm0, %v1882_v1 }
  0xa5   : > { %1807 = vmatmul.mubr.msk.bf16.gmra.mrb[72].mxu1 %vm297_vm1, %v2154_v59 }
  0xa6   : > { %1810 = vmatprep.mubr.msk.bf16.mxu1 %vm1883_vm0, %v1882_v1 }
  0xab   : > { %1777 = vmatmul.mubr.msk.bf16.gmra.mrb[72].mxu0 %vm297_vm1, %v1530_v11 }
  0xac   : > { %1780 = vmatprep.mubr.msk.bf16.mxu0 %vm1883_vm0, %v1882_v1 }
  0xad   : > { %1811 = vmatmul.mubr.msk.bf16.gmra.mrb[76].mxu1 %vm297_vm1, %v2164_v20 }
  0xae   : > { %1814 = vmatprep.mubr.msk.bf16.mxu1 %vm1883_vm0, %v1882_v1 }
  0xb3   : > { %1781 = vmatmul.mubr.msk.bf16.gmra.mrb[76].mxu0 %vm297_vm1, %v1531_v42 }
  0xb4   : > { %1784 = vmatprep.mubr.msk.bf16.mxu0 %vm1883_vm0, %v1882_v1 }
  0xb5   : > { %1815 = vmatmul.mubr.msk.bf16.gmra.mrb[80].mxu1 %vm297_vm1, %v2172_v30 }
  0xbb   : > { %1785 = vmatmul.mubr.msk.bf16.gmra.mrb[80].mxu0 %vm297_vm1, %v2479_v25 }
  0xe7   : > { %v462_v26 = vpop.f32.mrb[0].mxu1 }
  0xe8   : > { %v1672_v28 = vpop.f32.mrb[1].mxu1 }
  0xe9   : > { %v465_v29 = vpop.f32.mrb[2].mxu1 }
  0xea   : > { %v1673_v32 = vpop.f32.mrb[3].mxu1 }
  0xee   : > { %v353_v33 = vpop.f32.mrb[0].mxu0 }
  0xef   : > { %v2333_v36 = vadd.f32 %v462_v26, %v353_v33  ;;  %v1642_v37 = vpop.f32.mrb[1].mxu0 }
  0xf0   : > { %v356_v43 = vpop.f32.mrb[2].mxu0  ;;  %v470_v44 = vpop.f32.mrb[4].mxu1 }
  0xf1   : > { %v2335_v47 = vadd.f32 %v465_v29, %v356_v43  ;;  %v1643_v1 = vpop.f32.mrb[3].mxu0  ;;  %v1676_v48 = vpop.f32.mrb[5].mxu1 }
  0xf2   : > { %v473_v57 = vpop.f32.mrb[6].mxu1 }
  0xf3   : > { %v1677_v60 = vpop.f32.mrb[7].mxu1 }
  0xf6   : > { %v361_v8 = vpop.f32.mrb[4].mxu0 }
  0xf7   : > { %v2337_v58 = vadd.f32 %v470_v44, %v361_v8  ;;  %v1646_v18 = vpop.f32.mrb[5].mxu0 }
  0xf8   : > { %v364_v27 = vpop.f32.mrb[6].mxu0  ;;  %v478_v35 = vpop.f32.mrb[8].mxu1 }
  0xf9   : > { %v2339_v38 = vadd.f32 %v473_v57, %v364_v27  ;;  %v1647_v40 = vpop.f32.mrb[7].mxu0  ;;  %v1680_v52 = vpop.f32.mrb[9].mxu1 }
  0xfa   : > { %v481_v53 = vpop.f32.mrb[10].mxu1 }
  0xfb   : > { %v1681_v2 = vpop.f32.mrb[11].mxu1 }
  0xfe   : > { %v369_v63 = vpop.f32.mrb[8].mxu0 }
  0xff   : > { %v2341_v12 = vadd.f32 %v478_v35, %v369_v63  ;;  %v1650_v22 = vpop.f32.mrb[9].mxu0 }
 0x100   : > { %v372_v24 = vpop.f32.mrb[10].mxu0  ;;  %v486_v62 = vpop.f32.mrb[12].mxu1 }
 0x101   : > { %v2343_v13 = vadd.f32 %v481_v53, %v372_v24  ;;  %v1651_v19 = vpop.f32.mrb[11].mxu0  ;;  %v1684_v45 = vpop.f32.mrb[13].mxu1 }
 0x102   : > { %v489_v11 = vpop.f32.mrb[14].mxu1 }
 0x103   : > { %v1685_v41 = vpop.f32.mrb[15].mxu1 }
 0x106   : > { %v377_v42 = vpop.f32.mrb[12].mxu0 }
 0x107   : > { %v2345_v59 = vadd.f32 %v486_v62, %v377_v42  ;;  %v1654_v56 = vpop.f32.mrb[13].mxu0 }
 0x108   : > { %v380_v20 = vpop.f32.mrb[14].mxu0  ;;  %v494_v30 = vpop.f32.mrb[16].mxu1 }
 0x109   : > { %v2347_v54 = vadd.f32 %v489_v11, %v380_v20  ;;  %v1655_v3 = vpop.f32.mrb[15].mxu0  ;;  %v1688_v0 = vpop.f32.mrb[17].mxu1 }
 0x10a   : > { %v497_v61 = vpop.f32.mrb[18].mxu1 }
 0x10b   : > { %v1689_v49 = vpop.f32.mrb[19].mxu1 }
 0x10e   : > { %v385_v39 = vpop.f32.mrb[16].mxu0 }
 0x10f   : > { %v2349_v51 = vadd.f32 %v494_v30, %v385_v39  ;;  %v1658_v31 = vpop.f32.mrb[17].mxu0 }
 0x110   : > { %v388_v17 = vpop.f32.mrb[18].mxu0  ;;  %v502_v34 = vpop.f32.mrb[20].mxu1 }
 0x111   : > { %v2351_v4 = vadd.f32 %v497_v61, %v388_v17  ;;  %v1659_v14 = vpop.f32.mrb[19].mxu0  ;;  %v1692_v21 = vpop.f32.mrb[21].mxu1 }
 0x112   : > { %v505_v23 = vpop.f32.mrb[22].mxu1 }
 0x113   : > { %v1693_v50 = vpop.f32.mrb[23].mxu1 }
 0x116   : > { %v393_v55 = vpop.f32.mrb[20].mxu0 }
 0x117   : > { %v2353_v46 = vadd.f32 %v502_v34, %v393_v55  ;;  %v1662_v5 = vpop.f32.mrb[21].mxu0 }
 0x118   : > { %v396_v6 = vpop.f32.mrb[22].mxu0  ;;  %v510_v7 = vpop.f32.mrb[24].mxu1 }
 0x119   : > { %v2355_v9 = vadd.f32 %v505_v23, %v396_v6  ;;  %v1663_v10 = vpop.f32.mrb[23].mxu0  ;;  %v1696_v15 = vpop.f32.mrb[25].mxu1 }
 0x11a   : > { %v513_v16 = vpop.f32.mrb[26].mxu1 }
 0x11b   : > { %v1697_v25 = vpop.f32.mrb[27].mxu1 }
 0x11e   : > { %v401_v26 = vpop.f32.mrb[24].mxu0 }
 0x11f   : > { %v2357_v28 = vadd.f32 %v510_v7, %v401_v26  ;;  %v1666_v29 = vpop.f32.mrb[25].mxu0 }
 0x120   : > { %v404_v32 = vpop.f32.mrb[26].mxu0  ;;  %v837_v33 = vpop.f32.mrb[28].mxu1 }
 0x121   : > { %v2359_v37 = vadd.f32 %v513_v16, %v404_v32  ;;  %v1667_v43 = vpop.f32.mrb[27].mxu0  ;;  %v1732_v44 = vpop.f32.mrb[29].mxu1 }
 0x122   : > { %v840_v1 = vpop.f32.mrb[30].mxu1 }
 0x123   : > { %v1733_v48 = vpop.f32.mrb[31].mxu1 }
 0x126   : > { %v591_v57 = vpop.f32.mrb[28].mxu0 }
 0x127   : > { %v646_v60 = vadd.f32 %v591_v57, %v2333_v36  ;;  %v1702_v8 = vpop.f32.mrb[29].mxu0 }
 0x128   : > { %v594_v18 = vpop.f32.mrb[30].mxu0  ;;  %v845_v27 = vpop.f32.mrb[32].mxu1 }
 0x129   : > { %v647_v35 = vadd.f32 %v594_v18, %v2335_v47  ;;  %v1703_v40 = vpop.f32.mrb[31].mxu0  ;;  %v1736_v52 = vpop.f32.mrb[33].mxu1  ;;  %v2363_v53 = vadd.f32 %v837_v33, %v646_v60 }
 0x12a   : > { %v848_v2 = vpop.f32.mrb[34].mxu1 }
 0x12b   : > { %v1737_v63 = vpop.f32.mrb[35].mxu1  ;;  %v2365_v22 = vadd.f32 %v840_v1, %v647_v35 }
 0x12e   : > { %v599_v24 = vpop.f32.mrb[32].mxu0 }
 0x12f   : > { %v648_v62 = vadd.f32 %v599_v24, %v2337_v58  ;;  %v1706_v19 = vpop.f32.mrb[33].mxu0 }
 0x130   : > { %v602_v45 = vpop.f32.mrb[34].mxu0  ;;  %v853_v11 = vpop.f32.mrb[36].mxu1 }
 0x131   : > { %v649_v36 = vadd.f32 %v602_v45, %v2339_v38  ;;  %v1707_v41 = vpop.f32.mrb[35].mxu0  ;;  %v1740_v42 = vpop.f32.mrb[37].mxu1  ;;  %v2369_v56 = vadd.f32 %v845_v27, %v648_v62 }
 0x132   : > { %v856_v47 = vpop.f32.mrb[38].mxu1 }
 0x133   : > { %v1741_v20 = vpop.f32.mrb[39].mxu1  ;;  %v2371_v30 = vadd.f32 %v848_v2, %v649_v36 }
 0x136   : > { %v607_v3 = vpop.f32.mrb[36].mxu0 }
 0x137   : > { %v650_v0 = vadd.f32 %v607_v3, %v2341_v12  ;;  %v1710_v61 = vpop.f32.mrb[37].mxu0 }
 0x138   : > { %v610_v49 = vpop.f32.mrb[38].mxu0  ;;  %v861_v39 = vpop.f32.mrb[40].mxu1 }
 0x139   : > { %v651_v58 = vadd.f32 %v610_v49, %v2343_v13  ;;  %v1711_v31 = vpop.f32.mrb[39].mxu0  ;;  %v1744_v17 = vpop.f32.mrb[41].mxu1  ;;  %v2375_v34 = vadd.f32 %v853_v11, %v650_v0 }
 0x13a   : > { %v864_v38 = vpop.f32.mrb[42].mxu1 }
 0x13b   : > { %v1745_v14 = vpop.f32.mrb[43].mxu1  ;;  %v2377_v21 = vadd.f32 %v856_v47, %v651_v58 }
 0x13e   : > { %v615_v23 = vpop.f32.mrb[40].mxu0 }
 0x13f   : > { %v652_v50 = vadd.f32 %v615_v23, %v2345_v59  ;;  %v1714_v55 = vpop.f32.mrb[41].mxu0 }
 0x140   : > { %v618_v5 = vpop.f32.mrb[42].mxu0  ;;  %v869_v6 = vpop.f32.mrb[44].mxu1 }
 0x141   : > { %v653_v12 = vadd.f32 %v618_v5, %v2347_v54  ;;  %v1715_v7 = vpop.f32.mrb[43].mxu0  ;;  %v1748_v10 = vpop.f32.mrb[45].mxu1  ;;  %v2381_v15 = vadd.f32 %v861_v39, %v652_v50 }
 0x142   : > { %v872_v13 = vpop.f32.mrb[46].mxu1 }
 0x143   : > { %v1749_v16 = vpop.f32.mrb[47].mxu1  ;;  %v2383_v25 = vadd.f32 %v864_v38, %v653_v12 }
 0x146   : > { %v623_v26 = vpop.f32.mrb[44].mxu0 }
 0x147   : > { %v654_v29 = vadd.f32 %v623_v26, %v2349_v51  ;;  %v1718_v32 = vpop.f32.mrb[45].mxu0 }
 0x148   : > { %v626_v33 = vpop.f32.mrb[46].mxu0  ;;  %v877_v43 = vpop.f32.mrb[48].mxu1 }
 0x149   : > { %v655_v59 = vadd.f32 %v626_v33, %v2351_v4  ;;  %v1719_v44 = vpop.f32.mrb[47].mxu0  ;;  %v1752_v1 = vpop.f32.mrb[49].mxu1  ;;  %v2387_v48 = vadd.f32 %v869_v6, %v654_v29 }
 0x14a   : > { %v880_v54 = vpop.f32.mrb[50].mxu1 }
 0x14b   : > { %v1753_v57 = vpop.f32.mrb[51].mxu1  ;;  %v2389_v60 = vadd.f32 %v872_v13, %v655_v59 }
 0x14e   : > { %v631_v8 = vpop.f32.mrb[48].mxu0 }
 0x14f   : > { %v656_v18 = vadd.f32 %v631_v8, %v2353_v46  ;;  %v1722_v27 = vpop.f32.mrb[49].mxu0 }
 0x150   : > { %v634_v35 = vpop.f32.mrb[50].mxu0  ;;  %v885_v40 = vpop.f32.mrb[52].mxu1 }
 0x151   : > { %v657_v51 = vadd.f32 %v634_v35, %v2355_v9  ;;  %v1723_v52 = vpop.f32.mrb[51].mxu0  ;;  %v1756_v2 = vpop.f32.mrb[53].mxu1  ;;  %v2393_v63 = vadd.f32 %v877_v43, %v656_v18 }
 0x152   : > { %v888_v4 = vpop.f32.mrb[54].mxu1 }
 0x153   : > { %v1757_v24 = vpop.f32.mrb[55].mxu1  ;;  %v2395_v62 = vadd.f32 %v880_v54, %v657_v51 }
 0x156   : > { %v639_v19 = vpop.f32.mrb[52].mxu0 }
 0x157   : > { %v658_v45 = vadd.f32 %v639_v19, %v2357_v28  ;;  %v1726_v11 = vpop.f32.mrb[53].mxu0  ;;  %v2407_v28 = vld [vmem:[%s2475_s2] ss:$0 sm:$0xff] }
 0x158   : > { %v642_v36 = vpop.f32.mrb[54].mxu0  ;;  %v1226_v41 = vpop.f32.mrb[56].mxu1 }
 0x159   : > { %v659_v46 = vadd.f32 %v642_v36, %v2359_v37  ;;  %v1727_v42 = vpop.f32.mrb[55].mxu0  ;;  %v1792_v47 = vpop.f32.mrb[57].mxu1  ;;  %v2399_v9 = vadd.f32 %v885_v40, %v658_v45 }
 0x15a   : > { %v1229_v20 = vpop.f32.mrb[58].mxu1 }
 0x15b   : > { %v1793_v3 = vpop.f32.mrb[59].mxu1  ;;  %v2401_v0 = vadd.f32 %v888_v4, %v659_v46 }
 0x15e   : > { %v980_v61 = vpop.f32.mrb[56].mxu0 }
 0x15f   : > { %v1035_v49 = vadd.f32 %v980_v61, %v2363_v53  ;;  %v1762_v39 = vpop.f32.mrb[57].mxu0 }
 0x160   : > { %v983_v58 = vpop.f32.mrb[58].mxu0  ;;  %v1234_v37 = vpop.f32.mrb[60].mxu1 }
 0x161   : > { %v1281_v31 = vadd.f32 %v1226_v41, %v1035_v49  ;;  %v1036_v17 = vadd.f32 %v983_v58, %v2365_v22  ;;  %v1763_v38 = vpop.f32.mrb[59].mxu0  ;;  %v1796_v14 = vpop.f32.mrb[61].mxu1 }
 0x162   : > { %v1237_v23 = vpop.f32.mrb[62].mxu1 }
 0x163   : > { %v1302_v50 = vadd.f32 %v2407_v28, %v1281_v31  ;;  %v1282_v55 = vadd.f32 %v1229_v20, %v1036_v17  ;;  %v1797_v5 = vpop.f32.mrb[63].mxu1 }
 0x165   : > { %v1316_v53 = vmax.f32 %v1302_v50, 0.0  ;;  %v1303_v6 = vadd.f32 %v2407_v28, %v1282_v55 }
 0x166   : > { %v988_v22 = vpop.f32.mrb[60].mxu0 }
 0x167   : > { %v1576_v12 = vpack.c.bf16 %v1316_v53, %v1316_v53  ;;  %v1317_v7 = vmax.f32 %v1303_v6, 0.0  ;;  %v1037_v10 = vadd.f32 %v988_v22, %v2369_v56  ;;  %v1766_v13 = vpop.f32.mrb[61].mxu0 }
 0x168   : > { %v991_v16 = vpop.f32.mrb[62].mxu0  ;;  %v1242_v26 = vpop.f32.mrb[64].mxu1 }
 0x169   : > { %1387 = vst.msk [vmem:[%s2416_s8] sm:$0xf] %vm1386_vm3, %v1576_v12  ;;  %v1577_v29 = vpack.c.bf16 %v1317_v7, %v1317_v7  ;;  %v1283_v32 = vadd.f32 %v1234_v37, %v1037_v10  ;;  %v1038_v33 = vadd.f32 %v991_v16, %v2371_v30  ;;  %v1767_v43 = vpop.f32.mrb[63].mxu0  ;;  %v1800_v59 = vpop.f32.mrb[65].mxu1 }
 0x16a   : > { %v1245_v44 = vpop.f32.mrb[66].mxu1 }
 0x16b   : > { %1388 = vst.msk [vmem:[%s2416_s8 + $0x4] sm:$0xf] %vm1386_vm3, %v1577_v29  ;;  %v1304_v1 = vadd.f32 %v2407_v28, %v1283_v32  ;;  %v1284_v54 = vadd.f32 %v1237_v23, %v1038_v33  ;;  %v1801_v57 = vpop.f32.mrb[67].mxu1 }
 0x16d   : > { %v1318_v56 = vmax.f32 %v1304_v1, 0.0  ;;  %v1305_v8 = vadd.f32 %v2407_v28, %v1284_v54 }
 0x16e   : > { %v996_v18 = vpop.f32.mrb[64].mxu0 }
 0x16f   : > { %v1578_v27 = vpack.c.bf16 %v1318_v56, %v1318_v56  ;;  %v1319_v35 = vmax.f32 %v1305_v8, 0.0  ;;  %v1039_v40 = vadd.f32 %v996_v18, %v2375_v34  ;;  %v1770_v30 = vpop.f32.mrb[65].mxu0 }
 0x170   : > { %v999_v51 = vpop.f32.mrb[66].mxu0  ;;  %v1250_v52 = vpop.f32.mrb[68].mxu1 }
 0x171   : > { %1389 = vst.msk [vmem:[%s2416_s8 + $0x8] sm:$0xf] %vm1386_vm3, %v1578_v27  ;;  %v1579_v2 = vpack.c.bf16 %v1319_v35, %v1319_v35  ;;  %v1285_v4 = vadd.f32 %v1242_v26, %v1039_v40  ;;  %v1040_v24 = vadd.f32 %v999_v51, %v2377_v21  ;;  %v1771_v19 = vpop.f32.mrb[67].mxu0  ;;  %v1804_v45 = vpop.f32.mrb[69].mxu1 }
 0x172   : > { %v1253_v11 = vpop.f32.mrb[70].mxu1 }
 0x173   : > { %1390 = vst.msk [vmem:[%s2416_s8 + $0xc] sm:$0xf] %vm1386_vm3, %v1579_v2  ;;  %v1306_v36 = vadd.f32 %v2407_v28, %v1285_v4  ;;  %v1286_v41 = vadd.f32 %v1245_v44, %v1040_v24  ;;  %v1805_v46 = vpop.f32.mrb[71].mxu1 }
 0x175   : > { %v1320_v34 = vmax.f32 %v1306_v36, 0.0  ;;  %v1307_v42 = vadd.f32 %v2407_v28, %v1286_v41 }
 0x176   : > { %v1004_v47 = vpop.f32.mrb[68].mxu0 }
 0x177   : > { %v1580_v20 = vpack.c.bf16 %v1320_v34, %v1320_v34  ;;  %v1321_v3 = vmax.f32 %v1307_v42, 0.0  ;;  %v1041_v61 = vadd.f32 %v1004_v47, %v2381_v15  ;;  %v1774_v21 = vpop.f32.mrb[69].mxu0 }
 0x178   : > { %v1007_v49 = vpop.f32.mrb[70].mxu0  ;;  %v1258_v39 = vpop.f32.mrb[72].mxu1 }
 0x179   : > { %1391 = vst.msk [vmem:[%s2416_s8 + $0x10] sm:$0xf] %vm1386_vm3, %v1580_v20  ;;  %v1581_v58 = vpack.c.bf16 %v1321_v3, %v1321_v3  ;;  %v1287_v37 = vadd.f32 %v1250_v52, %v1041_v61  ;;  %v1042_v31 = vadd.f32 %v1007_v49, %v2383_v25  ;;  %v1775_v17 = vpop.f32.mrb[71].mxu0  ;;  %v1808_v38 = vpop.f32.mrb[73].mxu1 }
 0x17a   : > { %v1261_v14 = vpop.f32.mrb[74].mxu1 }
 0x17b   : > { %1392 = vst.msk [vmem:[%s2416_s8 + $0x14] sm:$0xf] %vm1386_vm3, %v1581_v58  ;;  %v1308_v23 = vadd.f32 %v2407_v28, %v1287_v37  ;;  %v1288_v50 = vadd.f32 %v1253_v11, %v1042_v31  ;;  %v1809_v55 = vpop.f32.mrb[75].mxu1 }
 0x17d   : > { %v1322_v15 = vmax.f32 %v1308_v23, 0.0  ;;  %v1309_v5 = vadd.f32 %v2407_v28, %v1288_v50 }
 0x17e   : > { %v1012_v53 = vpop.f32.mrb[72].mxu0 }
 0x17f   : > { %v1582_v6 = vpack.c.bf16 %v1322_v15, %v1322_v15  ;;  %v1323_v22 = vmax.f32 %v1309_v5, 0.0  ;;  %v1043_v12 = vadd.f32 %v1012_v53, %v2387_v48  ;;  %v1778_v25 = vpop.f32.mrb[73].mxu0 }
 0x180   : > { %v1015_v7 = vpop.f32.mrb[74].mxu0  ;;  %v1266_v10 = vpop.f32.mrb[76].mxu1 }
 0x181   : > { %1393 = vst.msk [vmem:[%s2416_s8 + $0x18] sm:$0xf] %vm1386_vm3, %v1582_v6  ;;  %v1583_v13 = vpack.c.bf16 %v1323_v22, %v1323_v22  ;;  %v1289_v16 = vadd.f32 %v1258_v39, %v1043_v12  ;;  %v1044_v26 = vadd.f32 %v1015_v7, %v2389_v60  ;;  %v1779_v29 = vpop.f32.mrb[75].mxu0  ;;  %v1812_v32 = vpop.f32.mrb[77].mxu1 }
 0x182   : > { %v1269_v33 = vpop.f32.mrb[78].mxu1 }
 0x183   : > { %1394 = vst.msk [vmem:[%s2416_s8 + $0x1c] sm:$0xf] %vm1386_vm3, %v1583_v13  ;;  %v1310_v43 = vadd.f32 %v2407_v28, %v1289_v16  ;;  %v1290_v59 = vadd.f32 %v1261_v14, %v1044_v26  ;;  %v1813_v44 = vpop.f32.mrb[79].mxu1 }
 0x185   : > { %v1324_v48 = vmax.f32 %v1310_v43, 0.0  ;;  %v1311_v1 = vadd.f32 %v2407_v28, %v1290_v59 }
 0x186   : > { %v1020_v54 = vpop.f32.mrb[76].mxu0 }
 0x187   : > { %v1584_v57 = vpack.c.bf16 %v1324_v48, %v1324_v48  ;;  %v1325_v56 = vmax.f32 %v1311_v1, 0.0  ;;  %v1045_v8 = vadd.f32 %v1020_v54, %v2393_v63  ;;  %v1782_v60 = vpop.f32.mrb[77].mxu0 }
 0x188   : > { %v1023_v18 = vpop.f32.mrb[78].mxu0  ;;  %v1274_v27 = vpop.f32.mrb[80].mxu1 }
 0x189   : > { %1395 = vst.msk [vmem:[%s2416_s8 + $0x20] sm:$0xf] %vm1386_vm3, %v1584_v57  ;;  %v1585_v35 = vpack.c.bf16 %v1325_v56, %v1325_v56  ;;  %v1291_v40 = vadd.f32 %v1266_v10, %v1045_v8  ;;  %v1046_v30 = vadd.f32 %v1023_v18, %v2395_v62  ;;  %v1783_v51 = vpop.f32.mrb[79].mxu0  ;;  %v1816_v52 = vpop.f32.mrb[81].mxu1 }
 0x18a   : > { %v1277_v2 = vpop.f32.mrb[82].mxu1 }
 0x18b   : > { %1396 = vst.msk [vmem:[%s2416_s8 + $0x24] sm:$0xf] %vm1386_vm3, %v1585_v35  ;;  %v1312_v4 = vadd.f32 %v2407_v28, %v1291_v40  ;;  %v1292_v24 = vadd.f32 %v1269_v33, %v1046_v30  ;;  %v1817_v63 = vpop.f32.mrb[83].mxu1 }
 0x18d   : > { %v1326_v19 = vmax.f32 %v1312_v4, 0.0  ;;  %v1313_v45 = vadd.f32 %v2407_v28, %v1292_v24 }
 0x18e   : > { %v1028_v11 = vpop.f32.mrb[80].mxu0 }
 0x18f   : > { %v1586_v36 = vpack.c.bf16 %v1326_v19, %v1326_v19  ;;  %v1327_v41 = vmax.f32 %v1313_v45, 0.0  ;;  %v1047_v62 = vadd.f32 %v1028_v11, %v2399_v9  ;;  %v1786_v46 = vpop.f32.mrb[81].mxu0 }
 0x190   : > { %v1031_v34 = vpop.f32.mrb[82].mxu0 }
 0x191   : > { %1397 = vst.msk [vmem:[%s2416_s8 + $0x28] sm:$0xf] %vm1386_vm3, %v1586_v36  ;;  %v1587_v42 = vpack.c.bf16 %v1327_v41, %v1327_v41  ;;  %v1293_v47 = vadd.f32 %v1274_v27, %v1047_v62  ;;  %v1048_v20 = vadd.f32 %v1031_v34, %v2401_v0  ;;  %v1787_v3 = vpop.f32.mrb[83].mxu0 }
 0x193   : > { %1398 = vst.msk [vmem:[%s2416_s8 + $0x2c] sm:$0xf] %vm1386_vm3, %v1587_v42  ;;  %v1314_v61 = vadd.f32 %v2407_v28, %v1293_v47  ;;  %v1294_v21 = vadd.f32 %v1277_v2, %v1048_v20 }
 0x195   : > { %v1328_v49 = vmax.f32 %v1314_v61, 0.0  ;;  %v1315_v39 = vadd.f32 %v2407_v28, %v1294_v21 }
 0x197   : > { %v1588_v58 = vpack.c.bf16 %v1328_v49, %v1328_v49  ;;  %v1329_v9 = vmax.f32 %v1315_v39, 0.0 }
 0x199   : > { %1399 = vst.msk [vmem:[%s2416_s8 + $0x30] sm:$0xf] %vm1386_vm3, %v1588_v58  ;;  %v1589_v37 = vpack.c.bf16 %v1329_v9, %v1329_v9 }
 0x19b   : > { %1400 = vst.msk [vmem:[%s2416_s8 + $0x34] sm:$0xf] %vm1386_vm3, %v1589_v37 }
 0x19c PF: > { %s13_s12 = sadd.s32 1, %s1880_s12  }
 0x19d   : > { %p10_p4 = scmp.ge.s32.totalorder %s13_s12, 4  }
 0x19f   :  { %12 = sbr.rel (!%p10_p4) target bundleno = 1 (0x1), region = 67 }

// kernel: inception_d.7
= control target key start
LH: loop header
LB: loop body
LE: loop exit
PB: predicated region body
PF: predicated region fallthrough
CT: control target
= control target key end

     0   :  { %s5173_s12 = smov 0   ;;  %s6142_s0 = inlined_call_operand.vmem [shape: bf16[2,326,8], index: 0, kind: input, shape index: {}]   ;;  %s6143_s1 = inlined_call_operand.vmem [shape: bf16[9,8,8], index: 1, kind: input, shape index: {}]   ;;  %s6144_s2 = inlined_call_operand.vmem [shape: f32[1,8], index: 2, kind: input, shape index: {}]   ;;  %s6145_s3 = inlined_call_operand.vmem [shape: bf16[2,288,8], index: 3, kind: output, shape index: {}]  }
   0x1 LB: > { %s3935_s13 = sadd.s32 4294967295, %s5151_s12   ;;  %p3939_p0 = scmp.ge.s32.totalorder %s5151_s12, 1  ;;  %s5151_s12 = sphi %s5173_s12, %s13_s12  }
   0x2   : > { %p137_p1 = scmp.lt.s32.totalorder %s5151_s12, 3 }
   0x4   : > { %p138_p2 = pnand %p3939_p0, %p137_p1 }
   0x5   : > { %vm509_vm0 = vcmask (!%p138_p2), 1043456   ;;  %v4056_v0 = vld [vmem:[%s6143_s1 + $0x10] sm:$0xf] (!%p138_p2)  ;;  %v3942_v1 = vld [vmem:[%s6143_s1 + $0x4] sm:$0xf] (!%p138_p2)  ;;  %p161_p3 = scmp.lt.s32.totalorder (!%p138_p2), %s3935_s13, 1 }
   0x6   : > { %141 = sbr.rel (%p138_p2) target bundleno = 575 (0x23f), region = 32  ;;  %5056 = vmatprep.subr.msk.bf16.mxu0 (!%p138_p2), %vm509_vm0, %v4056_v0  ;;  %5052 = vmatprep.subr.msk.bf16.mxu1 (!%p138_p2), %vm509_vm0, %v3942_v1  ;;  %v5190_v2 = vsel (!%p138_p2), %vm509_vm0, %v4056_v0, 0  ;;  %v511_v3 = vsel (!%p138_p2), %vm509_vm0, %v3942_v1, 0  ;;  %v4076_v4 = vld [vmem:[%s6143_s1 + $0x14] sm:$0xf] (!%p138_p2)  ;;  %vm454_vm2 = vcmask (!%p138_p2), 64512  }
   0x7   : > { %4573 = vmatpush3.bf16.msra.mxu0 (!%p138_p2), %v5190_v2  ;;  %4421 = vmatpush3.bf16.msra.mxu1 (!%p138_p2), %v511_v3  ;;  %v208_v5 = vld [vmem:[%s6143_s1] sm:$0xf] (!%p138_p2)  ;;  %vm305_vm1 = vsmask.f32 (!%p138_p2), 7424  ;;  %v5211_v6 = vsel (!%p138_p2), %vm509_vm0, %v4076_v4, 0  ;;  %vm2112_vm4 = vcmask (!%p138_p2), 1045504  }
   0x8   : > { %5058 = vmatprep.subr.msk.bf16.mxu0 (!%p138_p2), %vm509_vm0, %v4076_v4  ;;  %5053 = vmatprep.subr.msk.bf16.mxu1 (!%p138_p2), %vm509_vm0, %v208_v5  ;;  %vm1665_vm3 = vsmask.f32 (!%p138_p2), 6400  ;;  %v727_v12 = vsel (!%p138_p2), %vm509_vm0, %v208_v5, 0  ;;  %v5259_v39 = vld [vmem:[%s6143_s1 + $0x8] sm:$0xf] (!%p138_p2)  ;;  %vm912_vm5 = vcmask (!%p138_p2), 1046528  }
   0x9   : > { %v5293_v1 = vld [vmem:[%s6143_s1 + $0x18] sm:$0xf] (!%p138_p2)  ;;  %vm2865_vm6 = vsmask.f32 (!%p138_p2), 5376  ;;  %vm3312_vm7 = vcmask (!%p138_p2), 1044480   ;;  %vm3843_vm8 = vcmask (!%p138_p2), 60416  }
   0xd   : > { %s6147_s13 = smov (!%p161_p3, %s3935_s13), 1 }
   0xe   : > { %s5062_s22 = smul.u32 164, %s6147_s13 }
   0xf   : > { %s5063_s15 = smul.u32 144, %s6147_s13 }
  0x10   : > { %s5208_s25 = scalar_lea.vmem %s6142_s0, %s5062_s22 }
  0x11   : > { %v172_v7 = vld [vmem:[%s5208_s25] sm:$0xf]  ;;  %v5215_v8 = vld [vmem:[%s5208_s25 + $0x4] sm:$0xf]  ;;  %v5221_v10 = vld [vmem:[%s5208_s25 + $0x8] sm:$0xff]   ;;  %s6021_s18 = scalar_lea.vmem %s6145_s3, %s5063_s15 }
  0x12   : > { %v5218_v9 = vcombine.low %v172_v7, %v5215_v8  ;;  %v1220_v11 = vld [vmem:[%s5208_s25 + $0x8] sm:$0xe]  ;;  %v5226_v13 = vld [vmem:[%s5208_s25 + $0xc] sm:$0xf]  ;;  %v314_v16 = vshll.u32 %v5221_v10, 16  ;;  %v318_v17 = vshrl.u32 %v5221_v10, 16 }
  0x13   : > { %v5233_v18 = vld [vmem:[%s5208_s25 + $0x10] sm:$0xff]   ;;  %v5239_v20 = vcombine.low %v1220_v11, %v5226_v13  ;;  %v5247_v28 = vld [vmem:[%s5208_s25 + $0x18] sm:$0xff]   ;;  %v5253_v34 = vld [vmem:[%s5208_s25 + $0x20] sm:$0xff]  }
  0x14   : > { %v307_v14 = vshrl.u32 %v5218_v9, 16  ;;  %v309_v15 = vshll.u32 %v5218_v9, 16  ;;  %v5236_v19 = vld [vmem:[%s5208_s25 + $0x10] sm:$0xff]   ;;  %v316_v22 = vrot.slane %v314_v16, 1  ;;  %v1675_v23 = vshrl.u32 %v5233_v18, 16  ;;  %v5250_v33 = vld [vmem:[%s5208_s25 + $0x18] sm:$0xff]  }
  0x15   : > { %v1678_v24 = vshll.u32 %v5233_v18, 16  ;;  %v1667_v25 = vshrl.u32 %v5239_v20, 16  ;;  %v1670_v26 = vshll.u32 %v5239_v20, 16  ;;  %v322_v27 = vshll.u32 %v5236_v19, 16  ;;  %v5268_v48 = vld [vmem:[%s5208_s25 + $0x20] sm:$0xff]   ;;  %v5271_v49 = vld [vmem:[%s5208_s25 + $0x28] sm:$0xff]  }
  0x16   : > { %v311_v21 = vrot.slane %v309_v15, 1  ;;  %v320_v30 = vor.u32 %v318_v17, %v316_v22  ;;  %v1677_v31 = vrot.slane %v1675_v23, 1  ;;  %v1684_v38 = vshrl.u32 %v5247_v28, 16  ;;  %v5277_v54 = vld [vmem:[%s5208_s25 + $0x28] sm:$0xff]   ;;  %v5283_v59 = vld [vmem:[%s5208_s25 + $0x30] sm:$0xff]   ;;  %v5307_v23 = vld [vmem:[%s5208_s25 + $0x38] sm:$0xff]  }
  0x17   : > { %v1680_v32 = vrot.slane %v1678_v24, 2  ;;  %v1669_v35 = vrot.slane %v1667_v25, 1  ;;  %v1672_v36 = vrot.slane %v1670_v26, 2  ;;  %v324_v37 = vrot.slane %v322_v27, 1  ;;  %v5288_v0 = vld [vmem:[%s5208_s25 + $0x30] sm:$0xff]  }
  0x18   : > { %v312_v29 = vor.u32 %v311_v21, %v307_v14  ;;  %v1687_v42 = vshll.u32 %v5247_v28, 16  ;;  %v326_v43 = vshrl.u32 %v5236_v19, 16  ;;  %v1686_v46 = vrot.slane %v1684_v38, 1 }
  0x19   : > { %v1681_v41 = vor.u32 %v1680_v32, %v1677_v31  ;;  %v1673_v44 = vor.u32 %v1672_v36, %v1669_v35  ;;  %v325_v45 = vsel %vm305_vm1, %v320_v30, %v324_v37  ;;  %v330_v47 = vshll.u32 %v5250_v33, 16  ;;  %v5316_v35 = vld [vmem:[%s5208_s25 + $0x38] sm:$0xff]  }
  0x1a   : > { %v317_v40 = vsel %vm305_vm1, %v312_v29, %v316_v22  ;;  %v1689_v50 = vrot.slane %v1687_v42, 2  ;;  %v328_v51 = vor.u32 %v326_v43, %v324_v37  ;;  %v1693_v52 = vshrl.u32 %v5253_v34, 16 }
  0x1b   : > { %4422 = vmatprep.mubr.msk.bf16.mxu1 %vm454_vm2, %v317_v40  ;;  %v1696_v53 = vshll.u32 %v5253_v34, 16  ;;  %v1682_v55 = vsel %vm1665_vm3, %v1673_v44, %v1681_v41  ;;  %v332_v56 = vrot.slane %v330_v47, 1  ;;  %v334_v57 = vshrl.u32 %v5250_v33, 16  ;;  %v5327_v44 = vld [vmem:[%s5208_s25 + $0x40] sm:$0xff]  }
  0x1c   : > { %4423 = vmatmul.mubr.msk.bf16.vlgmr.msra.gmra.mrb[0].mxu1 %vm454_vm2, %v325_v45  ;;  %v338_v58 = vshll.u32 %v5268_v48, 16  ;;  %4574 = vmatprep.mubr.msk.bf16.mxu0 %vm454_vm2, %v1682_v55  ;;  %v1690_v60 = vor.u32 %v1689_v50, %v1686_v46  ;;  %v1695_v61 = vrot.slane %v1693_v52, 1  ;;  %v1702_v63 = vshrl.u32 %v5271_v49, 16 }
  0x1d   : > { %4459 = vmatpush3.bf16.msra.mxu1 %v727_v12  ;;  %v1698_v62 = vrot.slane %v1696_v53, 2  ;;  %v333_v3 = vsel %vm305_vm1, %v328_v51, %v332_v56  ;;  %v336_v4 = vor.u32 %v334_v57, %v332_v56  ;;  %v1705_v7 = vshll.u32 %v5271_v49, 16  ;;  %v5332_v51 = vld [vmem:[%s5208_s25 + $0x40] sm:$0xff]  }
  0x1e   : > { %5054 = vmatprep.subr.msk.bf16.mxu1 %vm509_vm0, %v5259_v39  ;;  %v340_v5 = vrot.slane %v338_v58, 1  ;;  %v1691_v11 = vsel %vm1665_vm3, %v1681_v41, %v1690_v60  ;;  %4426 = vmatprep.mubr.msk.bf16.mxu1 %vm454_vm2, %v333_v3  ;;  %v1704_v14 = vrot.slane %v1702_v63, 1  ;;  %v342_v15 = vshrl.u32 %v5268_v48, 16  ;;  %v5343_v63 = vld [vmem:[%s5208_s25 + $0x48] sm:$0xff]  }
  0x1f   : > { %v1699_v12 = vor.u32 %v1698_v62, %v1695_v61  ;;  %4575 = vmatmul.mubr.msk.bf16.vlgmr.msra.gmra.mrb[0].mxu0 %vm454_vm2, %v1691_v11  ;;  %v1707_v17 = vrot.slane %v1705_v7, 2  ;;  %v346_v21 = vshll.u32 %v5277_v54, 16  ;;  %v1711_v22 = vshrl.u32 %v5283_v59, 16  ;;  %v5340_v62 = vld [vmem:[%s5208_s25 + $0x48] sm:$0xff]  }
  0x20   : > { %v341_v16 = vsel %vm305_vm1, %v336_v4, %v340_v5  ;;  %4611 = vmatpush3.bf16.msra.mxu0 %v5211_v6  ;;  %v344_v25 = vor.u32 %v342_v15, %v340_v5  ;;  %v1714_v26 = vshll.u32 %v5283_v59, 16  ;;  %v350_v27 = vshrl.u32 %v5277_v54, 16 }
  0x21   : > { %v1700_v24 = vsel %vm1665_vm3, %v1690_v60, %v1699_v12  ;;  %v1708_v29 = vor.u32 %v1707_v17, %v1704_v14  ;;  %v348_v30 = vrot.slane %v346_v21, 1  ;;  %v1713_v31 = vrot.slane %v1711_v22, 1  ;;  %5059 = vmatprep.subr.msk.bf16.mxu0 %vm509_vm0, %v5293_v1  ;;  %v5352_v14 = vld [vmem:[%s5208_s25 + $0x50] sm:$0xff]  }
  0x22   : > { %4578 = vmatprep.mubr.msk.bf16.mxu0 %vm454_vm2, %v1700_v24  ;;  %v354_v32 = vshll.u32 %v5288_v0, 16  ;;  %v1716_v6 = vrot.slane %v1714_v26, 2  ;;  %v1720_v36 = vshrl.u32 %v5307_v23, 16  ;;  %v1723_v37 = vshll.u32 %v5307_v23, 16 }
  0x23   : > { %v358_v38 = vshrl.u32 %v5288_v0, 16  ;;  %v1709_v40 = vsel %vm1665_vm3, %v1699_v12, %v1708_v29  ;;  %v349_v41 = vsel %vm305_vm1, %v344_v25, %v348_v30  ;;  %v352_v42 = vor.u32 %v350_v27, %v348_v30  ;;  %v5360_v25 = vld [vmem:[%s5208_s25 + $0x50] sm:$0xff]  }
  0x24   : > { %4427 = vmatmul.mubr.msk.bf16.gmra.mrb[4].mxu1 %vm454_vm2, %v341_v16  ;;  %v356_v43 = vrot.slane %v354_v32, 1  ;;  %v1717_v45 = vor.u32 %v1716_v6, %v1713_v31  ;;  %v1722_v46 = vrot.slane %v1720_v36, 1  ;;  %v1725_v47 = vrot.slane %v1723_v37, 2 }
  0x25   : > { %4430 = vmatprep.mubr.msk.bf16.mxu1 %vm454_vm2, %v349_v41  ;;  %v362_v50 = vshll.u32 %v5316_v35, 16  ;;  %v1729_v55 = vshrl.u32 %v5327_v44, 16  ;;  %v1732_v56 = vshll.u32 %v5327_v44, 16  ;;  %v366_v61 = vshrl.u32 %v5316_v35, 16  ;;  %v5370_v41 = vld [vmem:[%s5208_s25 + $0x58] sm:$0xff]  }
  0x26   : > { %v357_v52 = vsel %vm305_vm1, %v352_v42, %v356_v43  ;;  %v360_v53 = vor.u32 %v358_v38, %v356_v43  ;;  %v1718_v57 = vsel %vm1665_vm3, %v1708_v29, %v1717_v45  ;;  %v1726_v58 = vor.u32 %v1725_v47, %v1722_v46  ;;  %v5365_v29 = vld [vmem:[%s5208_s25 + $0x58] sm:$0xff]  }
  0x27   : > { %v364_v60 = vrot.slane %v362_v50, 1  ;;  %4579 = vmatmul.mubr.msk.bf16.gmra.mrb[4].mxu0 %vm454_vm2, %v1709_v40  ;;  %v1731_v3 = vrot.slane %v1729_v55, 1  ;;  %v1734_v4 = vrot.slane %v1732_v56, 2  ;;  %v370_v5 = vshll.u32 %v5332_v51, 16 }
  0x28   : > { %v374_v7 = vshrl.u32 %v5332_v51, 16  ;;  %4582 = vmatprep.mubr.msk.bf16.mxu0 %vm454_vm2, %v1718_v57  ;;  %v1738_v12 = vshrl.u32 %v5340_v62, 16  ;;  %v1741_v16 = vshll.u32 %v5340_v62, 16  ;;  %v378_v17 = vshll.u32 %v5343_v63, 16  ;;  %v2106_v57 = vld [vmem:[%s5208_s25 + $0x8] sm:$0xc] }
  0x29   : > { %v365_v11 = vsel %vm305_vm1, %v360_v53, %v364_v60  ;;  %v1735_v15 = vor.u32 %v1734_v4, %v1731_v3  ;;  %v372_v21 = vrot.slane %v370_v5, 1  ;;  %v1747_v22 = vshrl.u32 %v5352_v14, 16 }
  0x2a   : > { %v1750_v24 = vshll.u32 %v5352_v14, 16  ;;  %v1727_v26 = vsel %vm1665_vm3, %v1717_v45, %v1726_v58  ;;  %v368_v27 = vor.u32 %v366_v61, %v364_v60  ;;  %v1740_v30 = vrot.slane %v1738_v12, 1 }
  0x2b   : > { %v1743_v31 = vrot.slane %v1741_v16, 2  ;;  %v376_v32 = vor.u32 %v374_v7, %v372_v21  ;;  %v380_v6 = vrot.slane %v378_v17, 1  ;;  %v1736_v36 = vsel %vm1665_vm3, %v1726_v58, %v1735_v15  ;;  %v5384_v58 = vld [vmem:[%s5208_s25 + $0x60] sm:$0xff]  }
  0x2c   : > { %4431 = vmatmul.mubr.msk.bf16.gmra.mrb[8].mxu1 %vm454_vm2, %v357_v52  ;;  %v1749_v37 = vrot.slane %v1747_v22, 1  ;;  %v1752_v38 = vrot.slane %v1750_v24, 2  ;;  %v386_v40 = vshll.u32 %v5360_v25, 16  ;;  %v373_v42 = vsel %vm305_vm1, %v368_v27, %v372_v21 }
  0x2d   : > { %4434 = vmatprep.mubr.msk.bf16.mxu1 %vm454_vm2, %v365_v11  ;;  %v382_v43 = vshrl.u32 %v5343_v63, 16  ;;  %v1756_v45 = vshrl.u32 %v5365_v29, 16  ;;  %v1759_v46 = vshll.u32 %v5365_v29, 16  ;;  %v1744_v47 = vor.u32 %v1743_v31, %v1740_v30  ;;  %v5389_v11 = vld [vmem:[%s5208_s25 + $0x68] sm:$0xff]  }
  0x2e   : > { %v381_v50 = vsel %vm305_vm1, %v376_v32, %v380_v6  ;;  %v390_v52 = vshrl.u32 %v5360_v25, 16  ;;  %v394_v53 = vshll.u32 %v5370_v41, 16  ;;  %v1753_v55 = vor.u32 %v1752_v38, %v1749_v37  ;;  %v5406_v32 = vld [vmem:[%s5208_s25 + $0x70] sm:$0xff]  }
  0x2f   : > { %4583 = vmatmul.mubr.msk.bf16.gmra.mrb[8].mxu0 %vm454_vm2, %v1727_v26  ;;  %v388_v56 = vrot.slane %v386_v40, 1  ;;  %v384_v60 = vor.u32 %v382_v43, %v380_v6  ;;  %v1758_v61 = vrot.slane %v1756_v45, 1  ;;  %v1761_v3 = vrot.slane %v1759_v46, 2  ;;  %v5412_v40 = vld [vmem:[%s5208_s25 + $0x78] sm:$0xff]  }
  0x30   : > { %4586 = vmatprep.mubr.msk.bf16.mxu0 %vm454_vm2, %v1736_v36  ;;  %v1745_v4 = vsel %vm1665_vm3, %v1735_v15, %v1744_v47  ;;  %v396_v7 = vrot.slane %v394_v53, 1  ;;  %v1754_v12 = vsel %vm1665_vm3, %v1744_v47, %v1753_v55  ;;  %v4077_v16 = vcombine.low %v2106_v57, %v5226_v13 }
  0x31   : > { %v392_v5 = vor.u32 %v390_v52, %v388_v56  ;;  %v402_v17 = vshll.u32 %v5384_v58, 16  ;;  %v389_v21 = vsel %vm305_vm1, %v384_v60, %v388_v56  ;;  %v398_v22 = vshrl.u32 %v5370_v41, 16  ;;  %v5427_v56 = vld [vmem:[%s5208_s25 + $0x80] sm:$0xff]  }
  0x32   : > { %v5398_v15 = vor.u32 %v1761_v3, %v1758_v61  ;;  %v406_v26 = vshrl.u32 %v5384_v58, 16  ;;  %v410_v27 = vshll.u32 %v5389_v11, 16  ;;  %v2113_v13 = vrot.slane %v4077_v16, 2 }
  0x33   : > { %v397_v24 = vsel %vm305_vm1, %v392_v5, %v396_v7  ;;  %v2114_v30 = vrot.slane %v5233_v18, 2  ;;  %v404_v31 = vrot.slane %v402_v17, 1  ;;  %v400_v6 = vor.u32 %v398_v22, %v396_v7 }
  0x34   : > { %4435 = vmatmul.mubr.msk.bf16.gmra.mrb[12].mxu1 %vm454_vm2, %v373_v42  ;;  %v1763_v36 = vsel %vm1665_vm3, %v1753_v55, %v5398_v15  ;;  %v412_v38 = vrot.slane %v410_v27, 1  ;;  %v418_v18 = vshll.u32 %v5406_v32, 16  ;;  %v2116_v45 = vrot.slane %v5247_v28, 2  ;;  %v5457_v27 = vld [vmem:[%s5208_s25 + $0x90] ss:$0 sps:$4 sm:$0x11]  }
  0x35   : > { %4438 = vmatprep.mubr.msk.bf16.mxu1 %vm454_vm2, %v381_v50  ;;  %v408_v37 = vor.u32 %v406_v26, %v404_v31  ;;  %v2115_v42 = vsel %vm2112_vm4, %v2113_v13, %v2114_v30  ;;  %v405_v43 = vsel %vm305_vm1, %v400_v6, %v404_v31  ;;  %v414_v46 = vshrl.u32 %v5389_v11, 16 }
  0x36   : > { %v422_v50 = vshrl.u32 %v5406_v32, 16  ;;  %v426_v52 = vshll.u32 %v5412_v40, 16  ;;  %v2118_v53 = vrot.slane %v5253_v34, 2  ;;  %v420_v55 = vrot.slane %v418_v18, 1  ;;  %v5440_v34 = vld [vmem:[%s6143_s1 + $0x1c] sm:$0xf] }
  0x37   : > { %4587 = vmatmul.mubr.msk.bf16.gmra.mrb[12].mxu0 %vm454_vm2, %v1745_v4  ;;  %v413_v47 = vsel %vm305_vm1, %v408_v37, %v412_v38  ;;  %v2644_v28 = vsel %vm509_vm0, %v5293_v1, 0  ;;  %v416_v57 = vor.u32 %v414_v46, %v412_v38  ;;  %v2117_v60 = vsel %vm2112_vm4, %v2114_v30, %v2116_v45  ;;  %v5434_v4 = vld [vmem:[%s5208_s25 + $0x88] sm:$0xff]  }
  0x38   : > { %4590 = vmatprep.mubr.msk.bf16.mxu0 %vm454_vm2, %v1754_v12  ;;  %v424_v61 = vor.u32 %v422_v50, %v420_v55  ;;  %v428_v3 = vrot.slane %v426_v52, 1  ;;  %v2119_v5 = vsel %vm2112_vm4, %v2116_v45, %v2118_v53  ;;  %v434_v7 = vshll.u32 %v5427_v56, 16 }
  0x39   : > { %v421_v1 = vsel %vm305_vm1, %v416_v57, %v420_v55  ;;  %v2120_v12 = vrot.slane %v5271_v49, 2  ;;  %v430_v16 = vshrl.u32 %v5412_v40, 16  ;;  %v442_v22 = vshll.u32 %v5434_v4, 16  ;;  %v5484_v55 = vld [vmem:[%s5208_s25 + $0x60] sm:$0xff]   ;;  %v5503_v57 = vld [vmem:[%s5208_s25 + $0x68] sm:$0xff]  }
  0x3a   : > { %v429_v17 = vsel %vm305_vm1, %v424_v61, %v428_v3  ;;  %v436_v26 = vrot.slane %v434_v7, 1  ;;  %v450_v37 = vshll.u32 %v5457_v27, 16  ;;  %v2124_v38 = vrot.slane %v5307_v23, 2  ;;  %v5521_v7 = vld [vmem:[%s5208_s25 + $0x78] sm:$0xff]  }
  0x3b   : > { %v432_v49 = vor.u32 %v430_v16, %v428_v3  ;;  %v2121_v13 = vsel %vm2112_vm4, %v2118_v53, %v2120_v12  ;;  %v444_v31 = vrot.slane %v442_v22, 1  ;;  %v2126_v18 = vrot.slane %v5327_v44, 2  ;;  %v5537_v22 = vld [vmem:[%s5208_s25 + $0x88] sm:$0xff]  }
  0x3c   : > { %4439 = vmatmul.mubr.msk.bf16.gmra.mrb[16].mxu1 %vm454_vm2, %v389_v21  ;;  %v438_v21 = vshrl.u32 %v5427_v56, 16  ;;  %v452_v45 = vrot.slane %v450_v37, 1  ;;  %v2128_v23 = vrot.slane %v5340_v62, 2  ;;  %v2130_v44 = vrot.slane %v5352_v14, 2 }
  0x3d   : > { %4442 = vmatprep.mubr.msk.bf16.mxu1 %vm454_vm2, %v397_v24  ;;  %v2122_v24 = vrot.slane %v5283_v59, 2  ;;  %v437_v59 = vsel %vm305_vm1, %v432_v49, %v436_v26  ;;  %v2132_v62 = vrot.slane %v5365_v29, 2  ;;  %v1005_v14 = vsel %vm509_vm0, %v5259_v39, 0 }
  0x3e   : > { %v440_v30 = vor.u32 %v438_v21, %v436_v26  ;;  %v2129_v52 = vsel %vm2112_vm4, %v2126_v18, %v2128_v23  ;;  %v2131_v53 = vsel %vm2112_vm4, %v2128_v23, %v2130_v44  ;;  %v2136_v61 = vrot.slane %v5503_v57, 2  ;;  %v5541_v26 = vld [vmem:[%s5208_s25 + $0x90] sm:$0xff]  }
  0x3f   : > { %4591 = vmatmul.mubr.msk.bf16.gmra.mrb[16].mxu0 %vm454_vm2, %v1763_v36  ;;  %v2123_v6 = vsel %vm2112_vm4, %v2120_v12, %v2122_v24  ;;  %v446_v36 = vshrl.u32 %v5434_v4, 16  ;;  %v2125_v46 = vsel %vm2112_vm4, %v2122_v24, %v2124_v38  ;;  %v2133_v29 = vsel %vm2112_vm4, %v2130_v44, %v2132_v62  ;;  %v5525_v12 = vld [vmem:[%s5208_s25 + $0x80] sm:$0xff]  }
  0x40   : > { %4612 = vmatprep.mubr.msk.bf16.mxu0 %vm454_vm2, %v2115_v42  ;;  %v445_v42 = vsel %vm305_vm1, %v440_v30, %v444_v31  ;;  %v2140_v16 = vrot.slane %v5521_v7, 2  ;;  %v2144_v49 = vrot.slane %v5537_v22, 2  ;;  %v2420_v30 = vld [vmem:[%s5208_s25 + $0x10] sm:$0xc] }
  0x44   : > { %4443 = vmatmul.mubr.msk.bf16.gmra.mrb[20].mxu1 %vm454_vm2, %v405_v43  ;;  %v448_v43 = vor.u32 %v446_v36, %v444_v31  ;;  %v5551_v31 = vld [vmem:[%s5208_s25 + $0x14] sm:$0xf] }
  0x45   : > { %4446 = vmatprep.mubr.msk.bf16.mxu1 %vm454_vm2, %v413_v47  ;;  %v2127_v47 = vsel %vm2112_vm4, %v2124_v38, %v2126_v18  ;;  %v5561_v37 = vcombine.low %v2420_v30, %v5551_v31  ;;  %v5564_v38 = vld [vmem:[%s5208_s25 + $0x18] sm:$0xff]  }
  0x46   : > { %v453_v50 = vsel %vm305_vm1, %v448_v43, %v452_v45  ;;  %v2553_v43 = vrot.slane %v5564_v38, 2 }
  0x47   : > { %4613 = vmatmul.mubr.msk.bf16.vlgmr.msra.gmra.mrb[0].mxu0 %vm454_vm2, %v2117_v60  ;;  %v5509_v60 = vld [vmem:[%s5208_s25 + $0x70] sm:$0xff]   ;;  %v2552_v18 = vrot.slane %v5561_v37, 2 }
  0x48   : > { %4649 = vmatpush3.bf16.msra.mxu0 %v2644_v28  ;;  %4616 = vmatprep.mubr.msk.bf16.mxu0 %vm454_vm2, %v2119_v5  ;;  %v2134_v28 = vrot.slane %v5484_v55, 2  ;;  %v2138_v3 = vrot.slane %v5509_v60, 2 }
  0x49   : > { %5060 = vmatprep.subr.msk.bf16.mxu0 %vm509_vm0, %v5440_v34 }
  0x4a   : > { %v2135_v39 = vsel %vm2112_vm4, %v2132_v62, %v2134_v28  ;;  %v2137_v5 = vsel %vm2112_vm4, %v2134_v28, %v2136_v61  ;;  %v2141_v21 = vsel %vm2112_vm4, %v2138_v3, %v2140_v16  ;;  %v3091_v62 = vsel %vm509_vm0, %v5440_v34, 0  ;;  %v5599_v28 = vld [vmem:[%s5208_s25 + $0x38] sm:$0xff]  }
  0x4c   : > { %4447 = vmatmul.mubr.msk.bf16.gmra.mrb[24].mxu1 %vm454_vm2, %v421_v1  ;;  %v2139_v1 = vsel %vm2112_vm4, %v2136_v61, %v2138_v3  ;;  %v2561_v61 = vrot.slane %v5599_v28, 2  ;;  %v5618_v3 = vld [vmem:[%s5208_s25 + $0x40] sm:$0xff]  }
  0x4d   : > { %4450 = vmatprep.mubr.msk.bf16.mxu1 %vm454_vm2, %v429_v17  ;;  %v2142_v17 = vrot.slane %v5525_v12, 2 }
  0x4f   : > { %4617 = vmatmul.mubr.msk.bf16.gmra.mrb[4].mxu0 %vm454_vm2, %v2121_v13  ;;  %v2143_v24 = vsel %vm2112_vm4, %v2140_v16, %v2142_v17  ;;  %v2146_v13 = vrot.slane %v5541_v26, 2  ;;  %v906_v16 = vld [vmem:[%s5208_s25] sm:$0xe] }
  0x50   : > { %4620 = vmatprep.mubr.msk.bf16.mxu0 %vm454_vm2, %v2123_v6  ;;  %v2145_v6 = vsel %vm2112_vm4, %v2142_v17, %v2144_v49  ;;  %v2563_v17 = vrot.slane %v5618_v3, 2 }
  0x51   : > { %v2147_v36 = vsel %vm2112_vm4, %v2144_v49, %v2146_v13 }
  0x52   : > { %v2564_v49 = vsel %vm2112_vm4, %v2561_v61, %v2563_v17 }
  0x54   : > { %4451 = vmatmul.mubr.msk.bf16.gmra.mrb[28].mxu1 %vm454_vm2, %v437_v59  ;;  %v5557_v59 = vld [vmem:[%s5208_s25 + $0x98] ss:$0 sps:$4 sm:$0x33]  }
  0x55   : > { %4454 = vmatprep.mubr.msk.bf16.mxu1 %vm454_vm2, %v445_v42  ;;  %v2148_v42 = vrot.slane %v5557_v59, 2 }
  0x57   : > { %4621 = vmatmul.mubr.msk.bf16.gmra.mrb[8].mxu0 %vm454_vm2, %v2125_v46  ;;  %v2149_v45 = vsel %vm2112_vm4, %v2146_v13, %v2148_v42  ;;  %v5577_v46 = vld [vmem:[%s5208_s25 + $0x20] sm:$0xff]   ;;  %v5636_v13 = vld [vmem:[%s5208_s25 + $0x50] sm:$0xff]  }
  0x58   : > { %4624 = vmatprep.mubr.msk.bf16.mxu0 %vm454_vm2, %v2127_v47  ;;  %v2554_v47 = vsel %vm2112_vm4, %v2552_v18, %v2553_v43  ;;  %v2555_v23 = vrot.slane %v5577_v46, 2  ;;  %v2567_v42 = vrot.slane %v5636_v13, 2 }
  0x5c   : > { %4455 = vmatmul.mubr.msk.bf16.gmra.mrb[32].mxu1 %vm454_vm2, %v453_v50  ;;  %v5581_v50 = vld [vmem:[%s5208_s25 + $0x28] sm:$0xff]  }
  0x5d   : > { %4460 = vmatprep.mubr.msk.bf16.mxu1 %vm454_vm2, %v5218_v9  ;;  %v5495_v9 = vld [vmem:[%s6143_s1 + $0xc] sm:$0xf]  ;;  %v2557_v44 = vrot.slane %v5581_v50, 2 }
  0x5f   : > { %4625 = vmatmul.mubr.msk.bf16.gmra.mrb[12].mxu0 %vm454_vm2, %v2129_v52  ;;  %v2556_v52 = vsel %vm2112_vm4, %v2553_v43, %v2555_v23 }
  0x60   : > { %4628 = vmatprep.mubr.msk.bf16.mxu0 %vm454_vm2, %v2131_v53  ;;  %v5593_v53 = vld [vmem:[%s5208_s25 + $0x30] sm:$0xff]  }
  0x64   : > { %4461 = vmatmul.mubr.msk.bf16.vlgmr.msra.gmra.mrb[0].mxu1 %vm454_vm2, %v5221_v10 }
  0x65   : > { %4464 = vmatprep.mubr.msk.bf16.mxu1 %vm454_vm2, %v5236_v19  ;;  %4497 = vmatpush3.bf16.msra.mxu1 %v1005_v14  ;;  %v2558_v14 = vsel %vm2112_vm4, %v2555_v23, %v2557_v44  ;;  %v918_v23 = vrot.slane %v5250_v33, 1 }
  0x66   : > { %5055 = vmatprep.subr.msk.bf16.mxu1 %vm509_vm0, %v5495_v9 }
  0x67   : > { %4629 = vmatmul.mubr.msk.bf16.gmra.mrb[16].mxu0 %vm454_vm2, %v2133_v29  ;;  %v5604_v29 = vld [vmem:[%s6143_s1 + $0x20] sm:$0xf] }
  0x68   : > { %4632 = vmatprep.mubr.msk.bf16.mxu0 %vm454_vm2, %v2135_v39  ;;  %v2559_v39 = vrot.slane %v5593_v53, 2 }
  0x6a   : > { %v2560_v34 = vsel %vm2112_vm4, %v2557_v44, %v2559_v39 }
  0x6c   : > { %4465 = vmatmul.mubr.msk.bf16.gmra.mrb[4].mxu1 %vm454_vm2, %v5250_v33 }
  0x6d   : > { %4468 = vmatprep.mubr.msk.bf16.mxu1 %vm454_vm2, %v5268_v48 }
  0x6f   : > { %4633 = vmatmul.mubr.msk.bf16.gmra.mrb[20].mxu0 %vm454_vm2, %v2137_v5  ;;  %v2562_v5 = vsel %vm2112_vm4, %v2559_v39, %v2561_v61  ;;  %v1444_v39 = vsel %vm509_vm0, %v5495_v9, 0  ;;  %v920_v61 = vrot.slane %v5268_v48, 1  ;;  %v5134_v9 = vld [vmem:[%s6143_s1 + $0x10] sm:$0xf] }
  0x70   : > { %4636 = vmatprep.mubr.msk.bf16.mxu0 %vm454_vm2, %v2139_v1  ;;  %v5622_v1 = vld [vmem:[%s5208_s25 + $0x48] sm:$0xff]  }
  0x71   : > { %v921_v48 = vsel %vm912_vm5, %v918_v23, %v920_v61 }
  0x74   : > { %4469 = vmatmul.mubr.msk.bf16.gmra.mrb[8].mxu1 %vm454_vm2, %v5277_v54 }
  0x75   : > { %4472 = vmatprep.mubr.msk.bf16.mxu1 %vm454_vm2, %v5288_v0 }
  0x77   : > { %4637 = vmatmul.mubr.msk.bf16.gmra.mrb[24].mxu0 %vm454_vm2, %v2141_v21  ;;  %v3999_v21 = vcombine.low %v906_v16, %v5215_v8  ;;  %v5641_v8 = vld [vmem:[%s5208_s25 + $0x58] sm:$0xff]   ;;  %v922_v16 = vrot.slane %v5277_v54, 1 }
  0x78   : > { %4640 = vmatprep.mubr.msk.bf16.mxu0 %vm454_vm2, %v2143_v24  ;;  %v2565_v24 = vrot.slane %v5622_v1, 2  ;;  %v2569_v43 = vrot.slane %v5641_v8, 2 }
  0x79   : > { %v913_v30 = vrot.slane %v3999_v21, 1  ;;  %v5683_v21 = vld [vmem:[%s5208_s25 + $0x78] sm:$0xff]   ;;  %v923_v54 = vsel %vm912_vm5, %v920_v61, %v922_v16 }
  0x7a   : > { %v2570_v44 = vsel %vm2112_vm4, %v2567_v42, %v2569_v43 }
  0x7c   : > { %4473 = vmatmul.mubr.msk.bf16.gmra.mrb[12].mxu1 %vm454_vm2, %v5316_v35 }
  0x7d   : > { %4476 = vmatprep.mubr.msk.bf16.mxu1 %vm454_vm2, %v5332_v51 }
  0x7f   : > { %4641 = vmatmul.mubr.msk.bf16.gmra.mrb[28].mxu0 %vm454_vm2, %v2145_v6  ;;  %v914_v6 = vrot.slane %v5221_v10, 1  ;;  %v916_v10 = vrot.slane %v5236_v19, 1 }
  0x80   : > { %4644 = vmatprep.mubr.msk.bf16.mxu0 %vm454_vm2, %v2147_v36  ;;  %v2566_v36 = vsel %vm2112_vm4, %v2563_v17, %v2565_v24 }
  0x81   : > { %v915_v18 = vsel %vm912_vm5, %v913_v30, %v914_v6  ;;  %v924_v30 = vrot.slane %v5288_v0, 1 }
  0x84   : > { %4477 = vmatmul.mubr.msk.bf16.gmra.mrb[16].mxu1 %vm454_vm2, %v5343_v63 }
  0x85   : > { %4480 = vmatprep.mubr.msk.bf16.mxu1 %vm454_vm2, %v5360_v25 }
  0x87   : > { %4645 = vmatmul.mubr.msk.bf16.gmra.mrb[32].mxu0 %vm454_vm2, %v2149_v45  ;;  %v2568_v45 = vsel %vm2112_vm4, %v2565_v24, %v2567_v42  ;;  %v926_v42 = vrot.slane %v5316_v35, 1  ;;  %v928_v35 = vrot.slane %v5332_v51, 1 }
  0x88   : > { %4650 = vmatprep.mubr.msk.bf16.mxu0 %vm454_vm2, %v2554_v47  ;;  %v5654_v47 = vld [vmem:[%s5208_s25 + $0x60] sm:$0xff]  }
  0x89   : > { %v2571_v19 = vrot.slane %v5654_v47, 2 }
  0x8c   : > { %4481 = vmatmul.mubr.msk.bf16.gmra.mrb[20].mxu1 %vm454_vm2, %v5370_v41 }
  0x8d   : > { %4484 = vmatprep.mubr.msk.bf16.mxu1 %vm454_vm2, %v5384_v58 }
  0x8f   : > { %4651 = vmatmul.mubr.msk.bf16.vlgmr.msra.gmra.mrb[0].mxu0 %vm454_vm2, %v2556_v52  ;;  %v5659_v52 = vld [vmem:[%s5208_s25 + $0x68] sm:$0xff]  }
  0x90   : > { %4687 = vmatpush3.bf16.msra.mxu0 %v3091_v62  ;;  %4654 = vmatprep.mubr.msk.bf16.mxu0 %vm454_vm2, %v2558_v14  ;;  %v917_v62 = vsel %vm912_vm5, %v914_v6, %v916_v10  ;;  %v919_v14 = vsel %vm912_vm5, %v916_v10, %v918_v23  ;;  %v2573_v33 = vrot.slane %v5659_v52, 2  ;;  %v925_v10 = vsel %vm912_vm5, %v922_v16, %v924_v30 }
  0x91   : > { %5061 = vmatprep.subr.msk.bf16.mxu0 %vm509_vm0, %v5604_v29  ;;  %v2867_v16 = vshrl.u32 %v5561_v37, 16 }
  0x92   : > { %v2574_v17 = vsel %vm2112_vm4, %v2571_v19, %v2573_v33 }
  0x94   : > { %4485 = vmatmul.mubr.msk.bf16.gmra.mrb[24].mxu1 %vm454_vm2, %v5389_v11 }
  0x95   : > { %4488 = vmatprep.mubr.msk.bf16.mxu1 %vm454_vm2, %v5406_v32 }
  0x97   : > { %4655 = vmatmul.mubr.msk.bf16.gmra.mrb[4].mxu0 %vm454_vm2, %v2560_v34  ;;  %v2572_v34 = vsel %vm2112_vm4, %v2569_v43, %v2571_v19  ;;  %v5701_v43 = vld [vmem:[%s5208_s25 + $0x88] sm:$0xff]   ;;  %v930_v19 = vrot.slane %v5343_v63, 1  ;;  %v2870_v63 = vshll.u32 %v5561_v37, 16 }
  0x98   : > { %4658 = vmatprep.mubr.msk.bf16.mxu0 %vm454_vm2, %v2562_v5  ;;  %v5674_v5 = vld [vmem:[%s5208_s25 + $0x70] sm:$0xff]   ;;  %v2581_v23 = vrot.slane %v5701_v43, 2 }
  0x99   : > { %v2575_v24 = vrot.slane %v5674_v5, 2  ;;  %v931_v51 = vsel %vm912_vm5, %v928_v35, %v930_v19 }
  0x9b   : > { %v2576_v6 = vsel %vm2112_vm4, %v2573_v33, %v2575_v24  ;;  %v929_v33 = vsel %vm912_vm5, %v926_v42, %v928_v35 }
  0x9c   : > { %4489 = vmatmul.mubr.msk.bf16.gmra.mrb[28].mxu1 %vm454_vm2, %v5412_v40 }
  0x9d   : > { %4492 = vmatprep.mubr.msk.bf16.mxu1 %vm454_vm2, %v5427_v56 }
  0x9f   : > { %4659 = vmatmul.mubr.msk.bf16.gmra.mrb[8].mxu0 %vm454_vm2, %v2564_v49  ;;  %v2577_v49 = vrot.slane %v5683_v21, 2 }
  0xa0   : > { %4662 = vmatprep.mubr.msk.bf16.mxu0 %vm454_vm2, %v2566_v36  ;;  %v5696_v36 = vld [vmem:[%s5208_s25 + $0x80] sm:$0xff]  }
  0xa1   : > { %v2579_v0 = vrot.slane %v5696_v36, 2 }
  0xa4   : > { %4493 = vmatmul.mubr.msk.bf16.gmra.mrb[32].mxu1 %vm454_vm2, %v5434_v4 }
  0xa5   : > { %4498 = vmatprep.mubr.msk.bf16.mxu1 %vm454_vm2, %v915_v18  ;;  %v2578_v18 = vsel %vm2112_vm4, %v2575_v24, %v2577_v49 }
  0xa7   : > { %4663 = vmatmul.mubr.msk.bf16.gmra.mrb[12].mxu0 %vm454_vm2, %v2568_v45  ;;  %v927_v45 = vsel %vm912_vm5, %v924_v30, %v926_v42  ;;  %v934_v30 = vrot.slane %v5370_v41, 1  ;;  %v2872_v42 = vrot.slane %v2870_v63, 3  ;;  %v2893_v41 = vshrl.u32 %v5581_v50, 16 }
  0xa8   : > { %4666 = vmatprep.mubr.msk.bf16.mxu0 %vm454_vm2, %v2570_v44  ;;  %v2580_v44 = vsel %vm2112_vm4, %v2577_v49, %v2579_v0  ;;  %v5130_v49 = vld [vmem:[%s5208_s25 + $0xa0] ss:$0 sps:$4 sm:$0x33]  }
  0xac   : > { %4499 = vmatmul.mubr.msk.bf16.vlgmr.msra.gmra.mrb[0].mxu1 %vm454_vm2, %v917_v62  ;;  %v5714_v62 = vld [vmem:[%s5208_s25 + $0x90] sm:$0xff]  }
  0xad   : > { %4502 = vmatprep.mubr.msk.bf16.mxu1 %vm454_vm2, %v919_v14  ;;  %4535 = vmatpush3.bf16.msra.mxu1 %v1444_v39  ;;  %v5718_v14 = vld [vmem:[%s5208_s25 + $0x98] sm:$0xff]   ;;  %v2582_v39 = vsel %vm2112_vm4, %v2579_v0, %v2581_v23  ;;  %v2583_v61 = vrot.slane %v5714_v62, 2  ;;  %v2587_v0 = vrot.slane %v5130_v49, 2 }
  0xae   : > { %5057 = vmatprep.subr.msk.bf16.mxu1 %vm509_vm0, %v5134_v9  ;;  %v2875_v9 = vshrl.u32 %v5564_v38, 16 }
  0xaf   : > { %4667 = vmatmul.mubr.msk.bf16.gmra.mrb[16].mxu0 %vm454_vm2, %v2572_v34  ;;  %v2585_v34 = vrot.slane %v5718_v14, 2  ;;  %v2584_v24 = vsel %vm2112_vm4, %v2581_v23, %v2583_v61  ;;  %v2887_v23 = vshll.u32 %v5577_v46, 16 }
  0xb0   : > { %4670 = vmatprep.mubr.msk.bf16.mxu0 %vm454_vm2, %v2574_v17  ;;  %v2878_v17 = vshll.u32 %v5564_v38, 16  ;;  %v2877_v37 = vrot.slane %v2875_v9, 2  ;;  %v2895_v9 = vrot.slane %v2893_v41, 2  ;;  %v2920_v41 = vshrl.u32 %v5618_v3, 16 }
  0xb4   : > { %4503 = vmatmul.mubr.msk.bf16.gmra.mrb[4].mxu1 %vm454_vm2, %v921_v48  ;;  %v932_v48 = vrot.slane %v5360_v25, 1 }
  0xb5   : > { %4506 = vmatprep.mubr.msk.bf16.mxu1 %vm454_vm2, %v923_v54  ;;  %v2586_v54 = vsel %vm2112_vm4, %v2583_v61, %v2585_v34 }
  0xb6   : > { %v935_v25 = vsel %vm912_vm5, %v932_v48, %v934_v30 }
  0xb7   : > { %4671 = vmatmul.mubr.msk.bf16.gmra.mrb[20].mxu0 %vm454_vm2, %v2576_v6  ;;  %v2869_v6 = vrot.slane %v2867_v16, 2  ;;  %v938_v16 = vrot.slane %v5389_v11, 1  ;;  %v2911_v11 = vshrl.u32 %v5599_v28, 16 }
  0xb8   : > { %4674 = vmatprep.mubr.msk.bf16.mxu0 %vm454_vm2, %v2578_v18  ;;  %v2880_v18 = vrot.slane %v2878_v17, 3 }
  0xb9   : > { %v2873_v35 = vor.u32 %v2872_v42, %v2869_v6  ;;  %v2914_v6 = vshll.u32 %v5599_v28, 16 }
  0xbc   : > { %4507 = vmatmul.mubr.msk.bf16.gmra.mrb[8].mxu1 %vm454_vm2, %v925_v10  ;;  %v933_v10 = vsel %vm912_vm5, %v930_v19, %v932_v48  ;;  %v936_v19 = vrot.slane %v5384_v58, 1  ;;  %v2902_v58 = vshrl.u32 %v5593_v53, 16 }
  0xbd   : > { %4510 = vmatprep.mubr.msk.bf16.mxu1 %vm454_vm2, %v927_v45  ;;  %v2884_v45 = vshrl.u32 %v5577_v46, 16 }
  0xbe   : > { %v937_v48 = vsel %vm912_vm5, %v934_v30, %v936_v19  ;;  %v940_v30 = vrot.slane %v5406_v32, 1  ;;  %v2923_v32 = vshll.u32 %v5618_v3, 16 }
  0xbf   : > { %4675 = vmatmul.mubr.msk.bf16.gmra.mrb[24].mxu0 %vm454_vm2, %v2580_v44  ;;  %v2881_v44 = vor.u32 %v2880_v18, %v2877_v37  ;;  %v2886_v61 = vrot.slane %v2884_v45, 2  ;;  %v2904_v37 = vrot.slane %v2902_v58, 2  ;;  %v2913_v45 = vrot.slane %v2911_v11, 2 }
  0xc0   : > { %4678 = vmatprep.mubr.msk.bf16.mxu0 %vm454_vm2, %v2582_v39  ;;  %v2896_v39 = vshll.u32 %v5581_v50, 16  ;;  %v2938_v58 = vshrl.u32 %v5636_v13, 16  ;;  %v2950_v11 = vshll.u32 %v5641_v8, 16 }
  0xc1   : > { %v2882_v63 = vsel %vm2865_vm6, %v2873_v35, %v2881_v44  ;;  %v941_v35 = vsel %vm912_vm5, %v938_v16, %v940_v30 }
  0xc2   : > { %v2898_v17 = vrot.slane %v2896_v39, 3 }
  0xc4   : > { %4511 = vmatmul.mubr.msk.bf16.gmra.mrb[12].mxu1 %vm454_vm2, %v929_v33  ;;  %v2588_v33 = vsel %vm2112_vm4, %v2585_v34, %v2587_v0  ;;  %v2905_v34 = vshll.u32 %v5593_v53, 16  ;;  %v2899_v49 = vor.u32 %v2898_v17, %v2895_v9  ;;  %v3405_v0 = vsel %vm509_vm0, %v5604_v29, 0 }
  0xc5   : > { %4514 = vmatprep.mubr.msk.bf16.mxu1 %vm454_vm2, %v931_v51  ;;  %v2889_v51 = vrot.slane %v2887_v23, 3  ;;  %v2916_v23 = vrot.slane %v2914_v6, 3  ;;  %v2929_v29 = vshrl.u32 %v5622_v1, 16 }
  0xc6   : > { %v2907_v18 = vrot.slane %v2905_v34, 3  ;;  %v2941_v34 = vshll.u32 %v5636_v13, 16 }
  0xc7   : > { %4679 = vmatmul.mubr.msk.bf16.gmra.mrb[28].mxu0 %vm454_vm2, %v2584_v24  ;;  %v2890_v24 = vor.u32 %v2889_v51, %v2886_v61  ;;  %v2917_v39 = vor.u32 %v2916_v23, %v2913_v45  ;;  %v2922_v61 = vrot.slane %v2920_v41, 2  ;;  %v2925_v51 = vrot.slane %v2923_v32, 3 }
  0xc8   : > { %4682 = vmatprep.mubr.msk.bf16.mxu0 %vm454_vm2, %v2586_v54  ;;  %v939_v54 = vsel %vm912_vm5, %v936_v19, %v938_v16  ;;  %v2932_v19 = vshll.u32 %v5622_v1, 16  ;;  %v2931_v17 = vrot.slane %v2929_v29, 2  ;;  %v2952_v23 = vrot.slane %v2950_v11, 3  ;;  %v5136_v29 = vld [vmem:[%s5208_s25 + $0x18] sm:$0xff]  }
  0xc9   : > { %v2891_v42 = vsel %vm2865_vm6, %v2881_v44, %v2890_v24  ;;  %v2908_v44 = vor.u32 %v2907_v18, %v2904_v37  ;;  %v2943_v37 = vrot.slane %v2941_v34, 3  ;;  %v1352_v18 = vrot.slane %v5239_v20, 1 }
  0xca   : > { %v2956_v32 = vshrl.u32 %v5654_v47, 16  ;;  %v2959_v20 = vshll.u32 %v5654_v47, 16  ;;  %v2977_v34 = vshll.u32 %v5674_v5, 16  ;;  %v2986_v11 = vshll.u32 %v5683_v21, 16 }
  0xcb   : > { %v2909_v16 = vsel %vm2865_vm6, %v2899_v49, %v2908_v44  ;;  %v2918_v9 = vsel %vm2865_vm6, %v2908_v44, %v2917_v39 }
  0xcc   : > { %4515 = vmatmul.mubr.msk.bf16.gmra.mrb[16].mxu1 %vm454_vm2, %v933_v10  ;;  %v942_v10 = vrot.slane %v5412_v40, 1 }
  0xcd   : > { %4518 = vmatprep.mubr.msk.bf16.mxu1 %vm454_vm2, %v935_v25  ;;  %v2900_v25 = vsel %vm2865_vm6, %v2890_v24, %v2899_v49 }
  0xce   : > { %v943_v40 = vsel %vm912_vm5, %v940_v30, %v942_v10  ;;  %v948_v30 = vrot.slane %v5457_v27, 1 }
  0xcf   : > { %4683 = vmatmul.mubr.msk.bf16.gmra.mrb[32].mxu0 %vm454_vm2, %v2588_v33  ;;  %v944_v33 = vrot.slane %v5427_v56, 1 }
  0xd0   : > { %4688 = vmatprep.mubr.msk.bf16.mxu0 %vm454_vm2, %v2882_v63  ;;  %v946_v63 = vrot.slane %v5434_v4, 1  ;;  %v2947_v4 = vshrl.u32 %v5641_v8, 16 }
  0xd1   : > { %v945_v24 = vsel %vm912_vm5, %v942_v10, %v944_v33  ;;  %v5135_v10 = vld [vmem:[%s5208_s25 + $0x10] sm:$0xff]  }
  0xd2   : > { %v947_v56 = vsel %vm912_vm5, %v944_v33, %v946_v63  ;;  %v2949_v45 = vrot.slane %v2947_v4, 2  ;;  %v2983_v4 = vshrl.u32 %v5683_v21, 16 }
  0xd4   : > { %4519 = vmatmul.mubr.msk.bf16.gmra.mrb[20].mxu1 %vm454_vm2, %v937_v48  ;;  %v2934_v48 = vrot.slane %v2932_v19, 3  ;;  %v2953_v44 = vor.u32 %v2952_v23, %v2949_v45  ;;  %v1355_v19 = vrot.slane %v5136_v29, 1  ;;  %v2985_v45 = vrot.slane %v2983_v4, 2 }
  0xd5   : > { %4522 = vmatprep.mubr.msk.bf16.mxu1 %vm454_vm2, %v939_v54  ;;  %v2926_v54 = vor.u32 %v2925_v51, %v2922_v61  ;;  %v2958_v61 = vrot.slane %v2956_v32, 2  ;;  %v2961_v51 = vrot.slane %v2959_v20, 3  ;;  %v2988_v23 = vrot.slane %v2986_v11, 3  ;;  %v5142_v11 = vld [vmem:[%s5208_s25 + $0x48] sm:$0xff]  }
  0xd6   : > { %v2935_v49 = vor.u32 %v2934_v48, %v2931_v17  ;;  %v2995_v32 = vshll.u32 %v5696_v36, 16  ;;  %v3022_v4 = vshll.u32 %v5718_v14, 16 }
  0xd7   : > { %4689 = vmatmul.mubr.msk.bf16.vlgmr.msra.gmra.mrb[0].mxu0 %vm454_vm2, %v2891_v42  ;;  %v2927_v6 = vsel %vm2865_vm6, %v2917_v39, %v2926_v54  ;;  %v2940_v42 = vrot.slane %v2938_v58, 2  ;;  %v2968_v39 = vshll.u32 %v5659_v52, 16  ;;  %v2974_v58 = vshrl.u32 %v5674_v5, 16 }
  0xd8   : > { %4725 = vmatpush3.bf16.msra.mxu0 %v3405_v0  ;;  %4692 = vmatprep.mubr.msk.bf16.mxu0 %vm454_vm2, %v2900_v25  ;;  %v1353_v0 = vrot.slane %v5135_v10, 1  ;;  %v2936_v25 = vsel %vm2865_vm6, %v2926_v54, %v2935_v49  ;;  %v2962_v54 = vor.u32 %v2961_v51, %v2958_v61  ;;  %v5139_v10 = vld [vmem:[%s5208_s25 + $0x30] sm:$0xff]   ;;  %v2989_v20 = vor.u32 %v2988_v23, %v2985_v45  ;;  %v5141_v51 = vld [vmem:[%s5208_s25 + $0x40] sm:$0xff]  }
  0xd9   : > { %v2944_v41 = vor.u32 %v2943_v37, %v2940_v42  ;;  %v2970_v48 = vrot.slane %v2968_v39, 3  ;;  %v2976_v37 = vrot.slane %v2974_v58, 2  ;;  %v5140_v39 = vld [vmem:[%s5208_s25 + $0x38] sm:$0xff]   ;;  %v2997_v61 = vrot.slane %v2995_v32, 3 }
  0xda   : > { %v1354_v27 = vsel %vm912_vm5, %v1352_v18, %v1353_v0  ;;  %v2963_v42 = vsel %vm2865_vm6, %v2953_v44, %v2962_v54  ;;  %v2979_v18 = vrot.slane %v2977_v34, 3  ;;  %v1363_v29 = vrot.slane %v5140_v39, 1 }
  0xdb   : > { %v2945_v33 = vsel %vm2865_vm6, %v2935_v49, %v2944_v41  ;;  %v3013_v58 = vshll.u32 %v5714_v62, 16  ;;  %v3024_v23 = vrot.slane %v3022_v4, 3  ;;  %v3318_v4 = vrot.slane %v5581_v50, 3 }
  0xdc   : > { %4523 = vmatmul.mubr.msk.bf16.gmra.mrb[24].mxu1 %vm454_vm2, %v941_v35  ;;  %v949_v35 = vsel %vm912_vm5, %v946_v63, %v948_v30  ;;  %v3320_v50 = vrot.slane %v5593_v53, 3 }
  0xdd   : > { %4526 = vmatprep.mubr.msk.bf16.mxu1 %vm454_vm2, %v943_v40  ;;  %v2965_v40 = vshrl.u32 %v5659_v52, 16 }
  0xdf   : > { %4693 = vmatmul.mubr.msk.bf16.gmra.mrb[4].mxu0 %vm454_vm2, %v2909_v16  ;;  %v5137_v16 = vld [vmem:[%s5208_s25 + $0x20] sm:$0xff]   ;;  %v2967_v17 = vrot.slane %v2965_v40, 2  ;;  %v3004_v40 = vshll.u32 %v5701_v43, 16 }
  0xe0   : > { %4696 = vmatprep.mubr.msk.bf16.mxu0 %vm454_vm2, %v2918_v9  ;;  %v1357_v63 = vrot.slane %v5137_v16, 1  ;;  %v2954_v9 = vsel %vm2865_vm6, %v2944_v41, %v2953_v44  ;;  %v2980_v41 = vor.u32 %v2979_v18, %v2976_v37  ;;  %v3001_v44 = vshrl.u32 %v5701_v43, 16  ;;  %v5143_v18 = vld [vmem:[%s5208_s25 + $0x50] sm:$0xff]  }
  0xe1   : > { %v2971_v49 = vor.u32 %v2970_v48, %v2967_v17  ;;  %v1365_v16 = vrot.slane %v5141_v51, 1  ;;  %v3006_v17 = vrot.slane %v3004_v40, 3  ;;  %v3015_v37 = vrot.slane %v3013_v58, 3  ;;  %v5144_v40 = vld [vmem:[%s5208_s25 + $0x58] sm:$0xff]  }
  0xe2   : > { %v1371_v39 = vrot.slane %v5144_v40, 1  ;;  %v1774_v40 = vshrl.u32 %v5503_v57, 16 }
  0xe4   : > { %4527 = vmatmul.mubr.msk.bf16.gmra.mrb[28].mxu1 %vm454_vm2, %v945_v24  ;;  %v1356_v24 = vsel %vm912_vm5, %v1353_v0, %v1355_v19  ;;  %v1361_v0 = vrot.slane %v5139_v10, 1  ;;  %v1369_v10 = vrot.slane %v5143_v18, 1  ;;  %v3322_v18 = vrot.slane %v5599_v28, 3 }
  0xe5   : > { %4530 = vmatprep.mubr.msk.bf16.mxu1 %vm454_vm2, %v947_v56  ;;  %v1358_v56 = vsel %vm912_vm5, %v1355_v19, %v1357_v63  ;;  %v2981_v19 = vsel %vm2865_vm6, %v2971_v49, %v2980_v41 }
  0xe6   : > { %v1364_v48 = vsel %vm912_vm5, %v1361_v0, %v1363_v29  ;;  %v3323_v53 = vsel %vm3312_vm7, %v3320_v50, %v3322_v18 }
  0xe7   : > { %4697 = vmatmul.mubr.msk.bf16.gmra.mrb[8].mxu0 %vm454_vm2, %v2927_v6  ;;  %v5138_v6 = vld [vmem:[%s5208_s25 + $0x28] sm:$0xff]  }
  0xe8   : > { %4700 = vmatprep.mubr.msk.bf16.mxu0 %vm454_vm2, %v2936_v25  ;;  %v1359_v30 = vrot.slane %v5138_v6, 1  ;;  %v2972_v25 = vsel %vm2865_vm6, %v2962_v54, %v2971_v49  ;;  %v1366_v54 = vsel %vm912_vm5, %v1363_v29, %v1365_v16  ;;  %v3019_v49 = vshrl.u32 %v5718_v14, 16 }
  0xe9   : > { %v1367_v6 = vrot.slane %v5142_v11, 1  ;;  %v1379_v11 = vrot.slane %v5521_v7, 1 }
  0xea   : > { %v3021_v45 = vrot.slane %v3019_v49, 2 }
  0xec   : > { %4531 = vmatmul.mubr.msk.bf16.gmra.mrb[32].mxu1 %vm454_vm2, %v949_v35  ;;  %v1360_v35 = vsel %vm912_vm5, %v1357_v63, %v1359_v30  ;;  %v2990_v63 = vsel %vm2865_vm6, %v2980_v41, %v2989_v20 }
  0xed   : > { %4536 = vmatprep.mubr.msk.bf16.mxu1 %vm454_vm2, %v1354_v27  ;;  %v2992_v27 = vshrl.u32 %v5696_v36, 16 }
  0xef   : > { %4701 = vmatmul.mubr.msk.bf16.gmra.mrb[12].mxu0 %vm454_vm2, %v2945_v33  ;;  %v2994_v33 = vrot.slane %v2992_v27, 2 }
  0xf0   : > { %4704 = vmatprep.mubr.msk.bf16.mxu0 %vm454_vm2, %v2954_v9  ;;  %v3003_v9 = vrot.slane %v3001_v44, 2  ;;  %v3306_v44 = vld [vmem:[%s5208_s25 + $0x10] sm:$0x8] }
  0xf2   : > { %v3007_v34 = vor.u32 %v3006_v17, %v3003_v9 }
  0xf4   : > { %4537 = vmatmul.mubr.msk.bf16.vlgmr.msra.gmra.mrb[0].mxu1 %vm454_vm2, %v1356_v24  ;;  %v2998_v24 = vor.u32 %v2997_v61, %v2994_v33  ;;  %v1373_v61 = vrot.slane %v5484_v55, 1 }
  0xf5   : > { %4540 = vmatprep.mubr.msk.bf16.mxu1 %vm454_vm2, %v1358_v56  ;;  %4763 = vmatpush3.bf16.msra.mxu1 %v5190_v2  ;;  %v1362_v2 = vsel %vm912_vm5, %v1359_v30, %v1361_v0  ;;  %v3010_v56 = vshrl.u32 %v5714_v62, 16  ;;  %v5854_v0 = vld [vmem:[%s5208_s25 + $0xa0] ss:$0 sps:$4 sm:$0x77]  }
  0xf6   : > { %v2999_v30 = vsel %vm2865_vm6, %v2989_v20, %v2998_v24  ;;  %v3028_v27 = vshrl.u32 %v5854_v0, 16  ;;  %v3031_v32 = vshll.u32 %v5854_v0, 16  ;;  %v3025_v20 = vor.u32 %v3024_v23, %v3021_v45 }
  0xf7   : > { %4705 = vmatmul.mubr.msk.bf16.gmra.mrb[16].mxu0 %vm454_vm2, %v2963_v42  ;;  %v3012_v42 = vrot.slane %v3010_v56, 2  ;;  %v1374_v17 = vsel %vm912_vm5, %v1371_v39, %v1373_v61  ;;  %v1377_v56 = vrot.slane %v5509_v60, 1  ;;  %v1385_v45 = vrot.slane %v5541_v26, 1 }
  0xf8   : > { %4708 = vmatprep.mubr.msk.bf16.mxu0 %vm454_vm2, %v2972_v25  ;;  %v3008_v25 = vsel %vm2865_vm6, %v2998_v24, %v3007_v34  ;;  %v3033_v33 = vrot.slane %v3031_v32, 3  ;;  %v3314_v24 = vrot.slane %v5564_v38, 3  ;;  %v3316_v38 = vrot.slane %v5577_v46, 3 }
  0xf9   : > { %v3016_v41 = vor.u32 %v3015_v37, %v3012_v42  ;;  %v1380_v46 = vsel %vm912_vm5, %v1377_v56, %v1379_v11  ;;  %v1765_v23 = vshrl.u32 %v5484_v55, 16 }
  0xfa   : > { %v3319_v42 = vsel %vm3312_vm7, %v3316_v38, %v3318_v4 }
  0xfb   : > { %v3017_v29 = vsel %vm2865_vm6, %v3007_v34, %v3016_v41  ;;  %v3026_v51 = vsel %vm2865_vm6, %v3016_v41, %v3025_v20  ;;  %v5133_v41 = vld [vmem:[%s5208_s25 + $0x98] ss:$0 sps:$4 sm:$0x11]   ;;  %v1767_v32 = vrot.slane %v1765_v23, 1 }
  0xfc   : > { %4541 = vmatmul.mubr.msk.bf16.gmra.mrb[4].mxu1 %vm454_vm2, %v1360_v35  ;;  %v1368_v35 = vsel %vm912_vm5, %v1365_v16, %v1367_v6  ;;  %v4155_v16 = vcombine.low %v3306_v44, %v5551_v31  ;;  %v3326_v44 = vrot.slane %v5622_v1, 3 }
  0xfd   : > { %4544 = vmatprep.mubr.msk.bf16.mxu1 %vm454_vm2, %v1362_v2  ;;  %v1370_v2 = vsel %vm912_vm5, %v1367_v6, %v1369_v10  ;;  %v3317_v6 = vsel %vm3312_vm7, %v3314_v24, %v3316_v38 }
  0xff   : > { %4709 = vmatmul.mubr.msk.bf16.gmra.mrb[20].mxu0 %vm454_vm2, %v2981_v19  ;;  %v3030_v19 = vrot.slane %v3028_v27, 2 }
 0x100   : > { %4712 = vmatprep.mubr.msk.bf16.mxu0 %vm454_vm2, %v2990_v63  ;;  %v1372_v63 = vsel %vm912_vm5, %v1369_v10, %v1371_v39  ;;  %v1383_v10 = vrot.slane %v5537_v22, 1  ;;  %v1777_v39 = vshll.u32 %v5503_v57, 16 }
 0x101   : > { %v3034_v9 = vor.u32 %v3033_v33, %v3030_v19  ;;  %v1786_v33 = vshll.u32 %v5509_v60, 16 }
 0x102   : > { %v1386_v27 = vsel %vm912_vm5, %v1383_v10, %v1385_v45 }
 0x103   : > { %v3035_v31 = vsel %vm2865_vm6, %v3025_v20, %v3034_v9 }
 0x104   : > { %4545 = vmatmul.mubr.msk.bf16.gmra.mrb[8].mxu1 %vm454_vm2, %v1364_v48  ;;  %v3313_v48 = vrot.slane %v4155_v16, 3  ;;  %v1779_v16 = vrot.slane %v1777_v39, 2 }
 0x105   : > { %4548 = vmatprep.mubr.msk.bf16.mxu1 %vm454_vm2, %v1366_v54  ;;  %v1375_v54 = vrot.slane %v5503_v57, 1 }
 0x106   : > { %v3315_v58 = vsel %vm3312_vm7, %v3313_v48, %v3314_v24  ;;  %v3330_v48 = vrot.slane %v5641_v8, 3  ;;  %v1792_v24 = vshrl.u32 %v5521_v7, 16 }
 0x107   : > { %4713 = vmatmul.mubr.msk.bf16.gmra.mrb[24].mxu0 %vm454_vm2, %v2999_v30  ;;  %v1376_v34 = vsel %vm912_vm5, %v1373_v61, %v1375_v54  ;;  %v1378_v49 = vsel %vm912_vm5, %v1375_v54, %v1377_v56  ;;  %v1381_v30 = vrot.slane %v5525_v12, 1  ;;  %v1795_v54 = vshll.u32 %v5521_v7, 16 }
 0x108   : > { %4716 = vmatprep.mubr.msk.bf16.mxu0 %vm454_vm2, %v3008_v25  ;;  %v3321_v25 = vsel %vm3312_vm7, %v3318_v4, %v3320_v50 }
 0x109   : > { %v1382_v37 = vsel %vm912_vm5, %v1379_v11, %v1381_v30  ;;  %v1384_v28 = vsel %vm912_vm5, %v1381_v30, %v1383_v10  ;;  %v1797_v38 = vrot.slane %v1795_v54, 2  ;;  %v1810_v30 = vshrl.u32 %v5537_v22, 16 }
 0x10b   : > { %v1812_v10 = vrot.slane %v1810_v30, 1 }
 0x10c   : > { %4549 = vmatmul.mubr.msk.bf16.gmra.mrb[12].mxu1 %vm454_vm2, %v1368_v35  ;;  %v1768_v35 = vshll.u32 %v5484_v55, 16  ;;  %v1387_v55 = vrot.slane %v5133_v41, 1  ;;  %v1831_v41 = vshll.u32 %v5557_v59, 16 }
 0x10d   : > { %4552 = vmatprep.mubr.msk.bf16.mxu1 %vm454_vm2, %v1370_v2  ;;  %v3324_v2 = vrot.slane %v5618_v3, 3  ;;  %v1783_v3 = vshrl.u32 %v5509_v60, 16 }
 0x10e   : > { %v1770_v20 = vrot.slane %v1768_v35, 2  ;;  %v1388_v1 = vsel %vm912_vm5, %v1385_v45, %v1387_v55  ;;  %v3336_v45 = vrot.slane %v5674_v5, 3 }
 0x10f   : > { %4717 = vmatmul.mubr.msk.bf16.gmra.mrb[28].mxu0 %vm454_vm2, %v3017_v29  ;;  %v3325_v29 = vsel %vm3312_vm7, %v3322_v18, %v3324_v2  ;;  %v3327_v61 = vsel %vm3312_vm7, %v3324_v2, %v3326_v44  ;;  %v1785_v9 = vrot.slane %v1783_v3, 1  ;;  %v3346_v3 = vrot.slane %v5718_v14, 3 }
 0x110   : > { %4720 = vmatprep.mubr.msk.bf16.mxu0 %vm454_vm2, %v3026_v51  ;;  %v1771_v19 = vor.u32 %v1770_v20, %v1767_v32  ;;  %v1776_v51 = vrot.slane %v1774_v40, 1  ;;  %v3342_v40 = vrot.slane %v5701_v43, 3 }
 0x112   : > { %v1772_v57 = vsel %vm1665_vm3, %v5398_v15, %v1771_v19  ;;  %v1780_v60 = vor.u32 %v1779_v16, %v1776_v51  ;;  %v1804_v15 = vshll.u32 %v5525_v12, 16 }
 0x114   : > { %4553 = vmatmul.mubr.msk.bf16.gmra.mrb[16].mxu1 %vm454_vm2, %v1372_v63  ;;  %v3328_v63 = vrot.slane %v5636_v13, 3  ;;  %v1801_v13 = vshrl.u32 %v5525_v12, 16  ;;  %v1781_v8 = vsel %vm1665_vm3, %v1771_v19, %v1780_v60  ;;  %v1806_v11 = vrot.slane %v1804_v15, 2 }
 0x115   : > { %4556 = vmatprep.mubr.msk.bf16.mxu1 %vm454_vm2, %v1374_v17  ;;  %v1788_v17 = vrot.slane %v1786_v33, 2 }
 0x116   : > { %v1803_v4 = vrot.slane %v1801_v13, 1 }
 0x117   : > { %4721 = vmatmul.mubr.msk.bf16.gmra.mrb[32].mxu0 %vm454_vm2, %v3035_v31  ;;  %v3329_v31 = vsel %vm3312_vm7, %v3326_v44, %v3328_v63  ;;  %v1789_v56 = vor.u32 %v1788_v17, %v1785_v9  ;;  %v3340_v44 = vrot.slane %v5696_v36, 3  ;;  %v3344_v36 = vrot.slane %v5714_v62, 3 }
 0x118   : > { %4726 = vmatprep.mubr.msk.bf16.mxu0 %vm454_vm2, %v3315_v58  ;;  %v3331_v58 = vsel %vm3312_vm7, %v3328_v63, %v3330_v48  ;;  %v1807_v50 = vor.u32 %v1806_v11, %v1803_v4 }
 0x119   : > { %v1790_v7 = vsel %vm1665_vm3, %v1780_v60, %v1789_v56  ;;  %v3345_v43 = vsel %vm3312_vm7, %v3342_v40, %v3344_v36  ;;  %v3347_v33 = vsel %vm3312_vm7, %v3344_v36, %v3346_v3 }
 0x11c   : > { %4557 = vmatmul.mubr.msk.bf16.gmra.mrb[20].mxu1 %vm454_vm2, %v1376_v34  ;;  %v1794_v34 = vrot.slane %v1792_v24, 1 }
 0x11d   : > { %4560 = vmatprep.mubr.msk.bf16.mxu1 %vm454_vm2, %v1378_v49  ;;  %v3332_v49 = vrot.slane %v5654_v47, 3  ;;  %v1819_v47 = vshrl.u32 %v5541_v26, 16 }
 0x11e   : > { %v1798_v12 = vor.u32 %v1797_v38, %v1794_v34 }
 0x11f   : > { %4727 = vmatmul.mubr.msk.bf16.vlgmr.msra.gmra.mrb[0].mxu0 %vm454_vm2, %v3317_v6  ;;  %v3334_v6 = vrot.slane %v5659_v52, 3  ;;  %v1821_v23 = vrot.slane %v1819_v47, 1 }
 0x120   : > { %4730 = vmatprep.mubr.msk.bf16.mxu0 %vm454_vm2, %v3319_v42  ;;  %v1813_v42 = vshll.u32 %v5537_v22, 16  ;;  %v1799_v52 = vsel %vm1665_vm3, %v1789_v56, %v1798_v12  ;;  %v1808_v22 = vsel %vm1665_vm3, %v1798_v12, %v1807_v50 }
 0x121   : > { %v3335_v18 = vsel %vm3312_vm7, %v3332_v49, %v3334_v6  ;;  %v3337_v2 = vsel %vm3312_vm7, %v3334_v6, %v3336_v45 }
 0x124   : > { %4561 = vmatmul.mubr.msk.bf16.gmra.mrb[24].mxu1 %vm454_vm2, %v1380_v46  ;;  %v3333_v46 = vsel %vm3312_vm7, %v3330_v48, %v3332_v49  ;;  %v6012_v49 = vld [vmem:[%s6144_s2] ss:$0 sm:$0xff] }
 0x125   : > { %4564 = vmatprep.mubr.msk.bf16.mxu1 %vm454_vm2, %v1382_v37  ;;  %v1822_v37 = vshll.u32 %v5541_v26, 16 }
 0x127   : > { %4731 = vmatmul.mubr.msk.bf16.gmra.mrb[4].mxu0 %vm454_vm2, %v3321_v25  ;;  %v1815_v25 = vrot.slane %v1813_v42, 2  ;;  %v1824_v35 = vrot.slane %v1822_v37, 2 }
 0x128   : > { %4734 = vmatprep.mubr.msk.bf16.mxu0 %vm454_vm2, %v3323_v53  ;;  %v3338_v53 = vrot.slane %v5683_v21, 3  ;;  %v1833_v21 = vrot.slane %v1831_v41, 2 }
 0x129   : > { %v1816_v26 = vor.u32 %v1815_v25, %v1812_v10 }
 0x12a   : > { %v3339_v5 = vsel %vm3312_vm7, %v3336_v45, %v3338_v53  ;;  %v3341_v39 = vsel %vm3312_vm7, %v3338_v53, %v3340_v44 }
 0x12b   : > { %v1817_v32 = vsel %vm1665_vm3, %v1807_v50, %v1816_v26 }
 0x12c   : > { %4565 = vmatmul.mubr.msk.bf16.gmra.mrb[28].mxu1 %vm454_vm2, %v1384_v28  ;;  %v1828_v28 = vshrl.u32 %v5557_v59, 16 }
 0x12d   : > { %4568 = vmatprep.mubr.msk.bf16.mxu1 %vm454_vm2, %v1386_v27  ;;  %v1825_v27 = vor.u32 %v1824_v35, %v1821_v23 }
 0x12e   : > { %v1830_v20 = vrot.slane %v1828_v28, 1 }
 0x12f   : > { %4735 = vmatmul.mubr.msk.bf16.gmra.mrb[8].mxu0 %vm454_vm2, %v3325_v29  ;;  %v1826_v55 = vsel %vm1665_vm3, %v1816_v26, %v1825_v27  ;;  %v3343_v29 = vsel %vm3312_vm7, %v3340_v44, %v3342_v40 }
 0x130   : > { %4738 = vmatprep.mubr.msk.bf16.mxu0 %vm454_vm2, %v3327_v61  ;;  %v1834_v59 = vor.u32 %v1833_v21, %v1830_v20  ;;  %v3348_v61 = vrot.slane %v5854_v0, 3 }
 0x132   : > { %v1835_v19 = vsel %vm1665_vm3, %v1825_v27, %v1834_v59 }
 0x134   : > { %4569 = vmatmul.mubr.msk.bf16.gmra.mrb[32].mxu1 %vm454_vm2, %v1388_v1  ;;  %v3349_v1 = vsel %vm3312_vm7, %v3346_v3, %v3348_v61 }
 0x135   : > { %4594 = vmatprep.mubr.msk.bf16.mxu1 %vm454_vm2, %v1772_v57 }
 0x137   : > { %4739 = vmatmul.mubr.msk.bf16.gmra.mrb[12].mxu0 %vm454_vm2, %v3329_v31 }
 0x138   : > { %4742 = vmatprep.mubr.msk.bf16.mxu0 %vm454_vm2, %v3331_v58 }
 0x13c   : > { %4595 = vmatmul.mubr.msk.bf16.vlgmr.msra.gmra.mrb[20].mxu1 %vm454_vm2, %v1781_v8 }
 0x13d   : > { %4598 = vmatprep.mubr.msk.bf16.mxu1 %vm454_vm2, %v1790_v7 }
 0x13f   : > { %4743 = vmatmul.mubr.msk.bf16.gmra.mrb[16].mxu0 %vm454_vm2, %v3333_v46 }
 0x140   : > { %4746 = vmatprep.mubr.msk.bf16.mxu0 %vm454_vm2, %v3335_v18 }
 0x144   : > { %4599 = vmatmul.mubr.msk.bf16.gmra.mrb[24].mxu1 %vm454_vm2, %v1799_v52 }
 0x145   : > { %4602 = vmatprep.mubr.msk.bf16.mxu1 %vm454_vm2, %v1808_v22 }
 0x147   : > { %4747 = vmatmul.mubr.msk.bf16.gmra.mrb[20].mxu0 %vm454_vm2, %v3337_v2 }
 0x148   : > { %4750 = vmatprep.mubr.msk.bf16.mxu0 %vm454_vm2, %v3339_v5 }
 0x14c   : > { %4603 = vmatmul.mubr.msk.bf16.gmra.mrb[28].mxu1 %vm454_vm2, %v1817_v32 }
 0x14d   : > { %4606 = vmatprep.mubr.msk.bf16.mxu1 %vm454_vm2, %v1826_v55 }
 0x14f   : > { %4751 = vmatmul.mubr.msk.bf16.gmra.mrb[24].mxu0 %vm454_vm2, %v3341_v39 }
 0x150   : > { %4754 = vmatprep.mubr.msk.bf16.mxu0 %vm454_vm2, %v3343_v29 }
 0x154   : > { %4607 = vmatmul.mubr.msk.bf16.gmra.mrb[32].mxu1 %vm454_vm2, %v1835_v19 }
 0x157   : > { %4755 = vmatmul.mubr.msk.bf16.gmra.mrb[28].mxu0 %vm454_vm2, %v3345_v43 }
 0x158   : > { %4758 = vmatprep.mubr.msk.bf16.mxu0 %vm454_vm2, %v3347_v33 }
 0x15f   : > { %4759 = vmatmul.mubr.msk.bf16.gmra.mrb[32].mxu0 %vm454_vm2, %v3349_v1 }
 0x1c7   : > { %v4538_v51 = vpop.f32.mrb[0].mxu1 }
 0x1c8   : > { %v1480_v62 = vpop.f32.mrb[1].mxu1 }
 0x1c9   : > { %v4539_v16 = vpop.f32.mrb[2].mxu1 }
 0x1ca   : > { %v1483_v14 = vpop.f32.mrb[3].mxu1 }
 0x1cf   : > { %v4542_v63 = vpop.f32.mrb[4].mxu1 }
 0x1d0   : > { %v1496_v57 = vpop.f32.mrb[5].mxu1 }
 0x1d1   : > { %v4543_v9 = vpop.f32.mrb[6].mxu1 }
 0x1d2   : > { %v1499_v17 = vpop.f32.mrb[7].mxu1 }
 0x1d7   : > { %v4546_v48 = vpop.f32.mrb[8].mxu1 }
 0x1d8   : > { %v5987_v60 = vpop.f32.mrb[9].mxu1 }
 0x1d9   : > { %v5989_v24 = vpop.f32.mrb[10].mxu1 }
 0x1da   : > { %v5991_v54 = vpop.f32.mrb[11].mxu1 }
 0x1df   : > { %v5993_v0 = vpop.f32.mrb[12].mxu1 }
 0x1e0   : > { %v5995_v31 = vpop.f32.mrb[13].mxu1 }
 0x1e1   : > { %v5997_v56 = vpop.f32.mrb[14].mxu1 }
 0x1e2   : > { %v5999_v13 = vpop.f32.mrb[15].mxu1 }
 0x1e7   : > { %v6001_v15 = vpop.f32.mrb[16].mxu1 }
 0x1e8   : > { %v6003_v58 = vpop.f32.mrb[17].mxu1 }
 0x1e9   : > { %v6005_v8 = vpop.f32.mrb[18].mxu1 }
 0x1ea   : > { %v6007_v34 = vpop.f32.mrb[19].mxu1 }
 0x1f2   : > { %v4728_v38 = vpop.f32.mrb[0].mxu0 }
 0x1f3   : > { %v4764_v7 = vadd.f32 %v4728_v38, %v4538_v51  ;;  %v3441_v4 = vpop.f32.mrb[1].mxu0 }
 0x1f4   : > { %v4765_v11 = vadd.f32 %v3441_v4, %v1480_v62  ;;  %v4729_v6 = vpop.f32.mrb[2].mxu0 }
 0x1f5   : > { %v3629_v12 = vadd.f32 %v4764_v7, %v6012_v49  ;;  %v4766_v30 = vadd.f32 %v4729_v6, %v4539_v16  ;;  %v3444_v42 = vpop.f32.mrb[3].mxu0 }
 0x1f6   : > { %v3627_v46 = vadd.f32 %v4765_v11, %v6012_v49  ;;  %v4767_v50 = vadd.f32 %v3444_v42, %v1483_v14 }
 0x1f7   : > { %v3665_v47 = vmax.f32 %v3629_v12, 0.0  ;;  %v3630_v37 = vadd.f32 %v4766_v30, %v6012_v49 }
 0x1f8   : > { %v3663_v18 = vmax.f32 %v3627_v46, 0.0  ;;  %v3628_v52 = vadd.f32 %v4767_v50, %v6012_v49 }
 0x1f9   : > { %v4215_v10 = vpack.c.bf16 %v3665_v47, %v3665_v47  ;;  %v3666_v25 = vmax.f32 %v3630_v37, 0.0 }
 0x1fa   : > { %v4213_v45 = vpack.c.bf16 %v3663_v18, %v3663_v18  ;;  %v3664_v22 = vmax.f32 %v3628_v52, 0.0  ;;  %v4732_v23 = vpop.f32.mrb[4].mxu0 }
 0x1fb   : > { %3846 = vst.msk [vmem:[%s6021_s18 + $0x8] sm:$0xf] %vm3843_vm8, %v4215_v10  ;;  %v4216_v35 = vpack.c.bf16 %v3666_v25, %v3666_v25  ;;  %v4768_v53 = vadd.f32 %v4732_v23, %v4542_v63  ;;  %v3457_v26 = vpop.f32.mrb[5].mxu0 }
 0x1fc   : > { %3844 = vst.msk [vmem:[%s6021_s18] sm:$0xf] %vm3843_vm8, %v4213_v45  ;;  %v4214_v28 = vpack.c.bf16 %v3664_v22, %v3664_v22  ;;  %v4769_v41 = vadd.f32 %v3457_v26, %v1496_v57  ;;  %v4733_v2 = vpop.f32.mrb[6].mxu0 }
 0x1fd   : > { %3847 = vst.msk [vmem:[%s6021_s18 + $0xc] sm:$0xf] %vm3843_vm8, %v4216_v35  ;;  %v3633_v27 = vadd.f32 %v4768_v53, %v6012_v49  ;;  %v4770_v5 = vadd.f32 %v4733_v2, %v4543_v9  ;;  %v3460_v32 = vpop.f32.mrb[7].mxu0 }
 0x1fe   : > { %3845 = vst.msk [vmem:[%s6021_s18 + $0x4] sm:$0xf] %vm3843_vm8, %v4214_v28  ;;  %v3631_v20 = vadd.f32 %v4769_v41, %v6012_v49  ;;  %v4771_v21 = vadd.f32 %v3460_v32, %v1499_v17 }
 0x1ff   : > { %v3669_v44 = vmax.f32 %v3633_v27, 0.0  ;;  %v3634_v55 = vadd.f32 %v4770_v5, %v6012_v49 }
 0x200   : > { %v3667_v40 = vmax.f32 %v3631_v20, 0.0  ;;  %v3632_v59 = vadd.f32 %v4771_v21, %v6012_v49 }
 0x201   : > { %v4219_v39 = vpack.c.bf16 %v3669_v44, %v3669_v44  ;;  %v3670_v29 = vmax.f32 %v3634_v55, 0.0 }
 0x202   : > { %v4217_v19 = vpack.c.bf16 %v3667_v40, %v3667_v40  ;;  %v3668_v36 = vmax.f32 %v3632_v59, 0.0  ;;  %v4736_v3 = vpop.f32.mrb[8].mxu0 }
 0x203   : > { %3850 = vst.msk [vmem:[%s6021_s18 + $0x18] sm:$0xf] %vm3843_vm8, %v4219_v39  ;;  %v4220_v43 = vpack.c.bf16 %v3670_v29, %v3670_v29  ;;  %v4772_v33 = vadd.f32 %v4736_v3, %v4546_v48  ;;  %v3473_v61 = vpop.f32.mrb[9].mxu0 }
 0x204   : > { %3848 = vst.msk [vmem:[%s6021_s18 + $0x10] sm:$0xf] %vm3843_vm8, %v4217_v19  ;;  %v4218_v1 = vpack.c.bf16 %v3668_v36, %v3668_v36  ;;  %v4773_v51 = vadd.f32 %v3473_v61, %v5987_v60  ;;  %v4737_v62 = vpop.f32.mrb[10].mxu0 }
 0x205   : > { %3851 = vst.msk [vmem:[%s6021_s18 + $0x1c] sm:$0xf] %vm3843_vm8, %v4220_v43  ;;  %v3637_v16 = vadd.f32 %v4772_v33, %v6012_v49  ;;  %v4774_v14 = vadd.f32 %v4737_v62, %v5989_v24  ;;  %v3476_v63 = vpop.f32.mrb[11].mxu0 }
 0x206   : > { %3849 = vst.msk [vmem:[%s6021_s18 + $0x14] sm:$0xf] %vm3843_vm8, %v4218_v1  ;;  %v3635_v57 = vadd.f32 %v4773_v51, %v6012_v49  ;;  %v4775_v9 = vadd.f32 %v3476_v63, %v5991_v54 }
 0x207   : > { %v3673_v17 = vmax.f32 %v3637_v16, 0.0  ;;  %v3638_v48 = vadd.f32 %v4774_v14, %v6012_v49 }
 0x208   : > { %v3671_v60 = vmax.f32 %v3635_v57, 0.0  ;;  %v3636_v38 = vadd.f32 %v4775_v9, %v6012_v49 }
 0x209   : > { %v4223_v7 = vpack.c.bf16 %v3673_v17, %v3673_v17  ;;  %v3674_v4 = vmax.f32 %v3638_v48, 0.0 }
 0x20a   : > { %v4221_v11 = vpack.c.bf16 %v3671_v60, %v3671_v60  ;;  %v3672_v24 = vmax.f32 %v3636_v38, 0.0  ;;  %v4740_v6 = vpop.f32.mrb[12].mxu0 }
 0x20b   : > { %3854 = vst.msk [vmem:[%s6021_s18 + $0x28] sm:$0xf] %vm3843_vm8, %v4223_v7  ;;  %v4224_v12 = vpack.c.bf16 %v3674_v4, %v3674_v4  ;;  %v4776_v30 = vadd.f32 %v4740_v6, %v5993_v0  ;;  %v3489_v42 = vpop.f32.mrb[13].mxu0 }
 0x20c   : > { %3852 = vst.msk [vmem:[%s6021_s18 + $0x20] sm:$0xf] %vm3843_vm8, %v4221_v11  ;;  %v4222_v54 = vpack.c.bf16 %v3672_v24, %v3672_v24  ;;  %v4777_v46 = vadd.f32 %v3489_v42, %v5995_v31  ;;  %v4741_v50 = vpop.f32.mrb[14].mxu0 }
 0x20d   : > { %3855 = vst.msk [vmem:[%s6021_s18 + $0x2c] sm:$0xf] %vm3843_vm8, %v4224_v12  ;;  %v3641_v47 = vadd.f32 %v4776_v30, %v6012_v49  ;;  %v4778_v37 = vadd.f32 %v4741_v50, %v5997_v56  ;;  %v3492_v18 = vpop.f32.mrb[15].mxu0 }
 0x20e   : > { %3853 = vst.msk [vmem:[%s6021_s18 + $0x24] sm:$0xf] %vm3843_vm8, %v4222_v54  ;;  %v3639_v0 = vadd.f32 %v4777_v46, %v6012_v49  ;;  %v4779_v10 = vadd.f32 %v3492_v18, %v5999_v13 }
 0x20f   : > { %v4596_v52 = vpop.f32.mrb[20].mxu1  ;;  %v3677_v45 = vmax.f32 %v3641_v47, 0.0  ;;  %v3642_v31 = vadd.f32 %v4778_v37, %v6012_v49 }
 0x210   : > { %v2007_v25 = vpop.f32.mrb[21].mxu1  ;;  %v3675_v23 = vmax.f32 %v3639_v0, 0.0  ;;  %v3640_v35 = vadd.f32 %v4779_v10, %v6012_v49 }
 0x211   : > { %v4597_v22 = vpop.f32.mrb[22].mxu1  ;;  %v4227_v53 = vpack.c.bf16 %v3677_v45, %v3677_v45  ;;  %v3678_v26 = vmax.f32 %v3642_v31, 0.0 }
 0x212   : > { %v2010_v56 = vpop.f32.mrb[23].mxu1  ;;  %v4225_v28 = vpack.c.bf16 %v3675_v23, %v3675_v23  ;;  %v3676_v41 = vmax.f32 %v3640_v35, 0.0  ;;  %v4744_v2 = vpop.f32.mrb[16].mxu0 }
 0x213   : > { %3858 = vst.msk [vmem:[%s6021_s18 + $0x38] sm:$0xf] %vm3843_vm8, %v4227_v53  ;;  %v4228_v13 = vpack.c.bf16 %v3678_v26, %v3678_v26  ;;  %v4780_v27 = vadd.f32 %v4744_v2, %v6001_v15  ;;  %v3505_v5 = vpop.f32.mrb[17].mxu0 }
 0x214   : > { %3856 = vst.msk [vmem:[%s6021_s18 + $0x30] sm:$0xf] %vm3843_vm8, %v4225_v28  ;;  %v4226_v32 = vpack.c.bf16 %v3676_v41, %v3676_v41  ;;  %v4781_v20 = vadd.f32 %v3505_v5, %v6003_v58  ;;  %v4745_v21 = vpop.f32.mrb[18].mxu0 }
 0x215   : > { %3859 = vst.msk [vmem:[%s6021_s18 + $0x3c] sm:$0xf] %vm3843_vm8, %v4228_v13  ;;  %v3645_v44 = vadd.f32 %v4780_v27, %v6012_v49  ;;  %v4782_v55 = vadd.f32 %v4745_v21, %v6005_v8  ;;  %v3508_v40 = vpop.f32.mrb[19].mxu0 }
 0x216   : > { %3857 = vst.msk [vmem:[%s6021_s18 + $0x34] sm:$0xf] %vm3843_vm8, %v4226_v32  ;;  %v3643_v15 = vadd.f32 %v4781_v20, %v6012_v49  ;;  %v4783_v39 = vadd.f32 %v3508_v40, %v6007_v34 }
 0x217   : > { %v4600_v59 = vpop.f32.mrb[24].mxu1  ;;  %v3681_v19 = vmax.f32 %v3645_v44, 0.0  ;;  %v3646_v58 = vadd.f32 %v4782_v55, %v6012_v49 }
 0x218   : > { %v2023_v29 = vpop.f32.mrb[25].mxu1  ;;  %v3679_v3 = vmax.f32 %v3643_v15, 0.0  ;;  %v3644_v43 = vadd.f32 %v4783_v39, %v6012_v49 }
 0x219   : > { %v4601_v36 = vpop.f32.mrb[26].mxu1  ;;  %v4231_v33 = vpack.c.bf16 %v3681_v19, %v3681_v19  ;;  %v3682_v61 = vmax.f32 %v3646_v58, 0.0 }
 0x21a   : > { %v2026_v8 = vpop.f32.mrb[27].mxu1  ;;  %v4229_v1 = vpack.c.bf16 %v3679_v3, %v3679_v3  ;;  %v3680_v51 = vmax.f32 %v3644_v43, 0.0  ;;  %v4748_v62 = vpop.f32.mrb[20].mxu0 }
 0x21b   : > { %3862 = vst.msk [vmem:[%s6021_s18 + $0x48] sm:$0xf] %vm3843_vm8, %v4231_v33  ;;  %v4232_v34 = vpack.c.bf16 %v3682_v61, %v3682_v61  ;;  %v4784_v16 = vadd.f32 %v4748_v62, %v4596_v52  ;;  %v3521_v14 = vpop.f32.mrb[21].mxu0 }
 0x21c   : > { %3860 = vst.msk [vmem:[%s6021_s18 + $0x40] sm:$0xf] %vm3843_vm8, %v4229_v1  ;;  %v4230_v63 = vpack.c.bf16 %v3680_v51, %v3680_v51  ;;  %v4785_v57 = vadd.f32 %v3521_v14, %v2007_v25  ;;  %v4749_v9 = vpop.f32.mrb[22].mxu0 }
 0x21d   : > { %3863 = vst.msk [vmem:[%s6021_s18 + $0x4c] sm:$0xf] %vm3843_vm8, %v4232_v34  ;;  %v3649_v17 = vadd.f32 %v4784_v16, %v6012_v49  ;;  %v4786_v48 = vadd.f32 %v4749_v9, %v4597_v22  ;;  %v3524_v60 = vpop.f32.mrb[23].mxu0 }
 0x21e   : > { %3861 = vst.msk [vmem:[%s6021_s18 + $0x44] sm:$0xf] %vm3843_vm8, %v4230_v63  ;;  %v3647_v7 = vadd.f32 %v4785_v57, %v6012_v49  ;;  %v4787_v4 = vadd.f32 %v3524_v60, %v2010_v56 }
 0x21f   : > { %v4604_v38 = vpop.f32.mrb[28].mxu1  ;;  %v3685_v24 = vmax.f32 %v3649_v17, 0.0  ;;  %v3650_v6 = vadd.f32 %v4786_v48, %v6012_v49 }
 0x220   : > { %v2039_v11 = vpop.f32.mrb[29].mxu1  ;;  %v3683_v30 = vmax.f32 %v3647_v7, 0.0  ;;  %v3648_v42 = vadd.f32 %v4787_v4, %v6012_v49 }
 0x221   : > { %v4605_v12 = vpop.f32.mrb[30].mxu1  ;;  %v4235_v46 = vpack.c.bf16 %v3685_v24, %v3685_v24  ;;  %v3686_v50 = vmax.f32 %v3650_v6, 0.0 }
 0x222   : > { %v2042_v54 = vpop.f32.mrb[31].mxu1  ;;  %v4233_v47 = vpack.c.bf16 %v3683_v30, %v3683_v30  ;;  %v3684_v37 = vmax.f32 %v3648_v42, 0.0  ;;  %v4752_v18 = vpop.f32.mrb[24].mxu0 }
 0x223   : > { %3866 = vst.msk [vmem:[%s6021_s18 + $0x58] sm:$0xf] %vm3843_vm8, %v4235_v46  ;;  %v4236_v52 = vpack.c.bf16 %v3686_v50, %v3686_v50  ;;  %v4788_v0 = vadd.f32 %v4752_v18, %v4600_v59  ;;  %v3537_v10 = vpop.f32.mrb[25].mxu0 }
 0x224   : > { %3864 = vst.msk [vmem:[%s6021_s18 + $0x50] sm:$0xf] %vm3843_vm8, %v4233_v47  ;;  %v4234_v25 = vpack.c.bf16 %v3684_v37, %v3684_v37  ;;  %v4789_v45 = vadd.f32 %v3537_v10, %v2023_v29  ;;  %v4753_v31 = vpop.f32.mrb[26].mxu0 }
 0x225   : > { %3867 = vst.msk [vmem:[%s6021_s18 + $0x5c] sm:$0xf] %vm3843_vm8, %v4236_v52  ;;  %v3653_v22 = vadd.f32 %v4788_v0, %v6012_v49  ;;  %v4790_v23 = vadd.f32 %v4753_v31, %v4601_v36  ;;  %v3540_v35 = vpop.f32.mrb[27].mxu0 }
 0x226   : > { %3865 = vst.msk [vmem:[%s6021_s18 + $0x54] sm:$0xf] %vm3843_vm8, %v4234_v25  ;;  %v3651_v53 = vadd.f32 %v4789_v45, %v6012_v49  ;;  %v4791_v26 = vadd.f32 %v3540_v35, %v2026_v8 }
 0x227   : > { %v4608_v56 = vpop.f32.mrb[32].mxu1  ;;  %v3689_v41 = vmax.f32 %v3653_v22, 0.0  ;;  %v3654_v2 = vadd.f32 %v4790_v23, %v6012_v49 }
 0x228   : > { %v2055_v28 = vpop.f32.mrb[33].mxu1  ;;  %v3687_v27 = vmax.f32 %v3651_v53, 0.0  ;;  %v3652_v5 = vadd.f32 %v4791_v26, %v6012_v49 }
 0x229   : > { %v4609_v13 = vpop.f32.mrb[34].mxu1  ;;  %v4239_v20 = vpack.c.bf16 %v3689_v41, %v3689_v41  ;;  %v3690_v21 = vmax.f32 %v3654_v2, 0.0 }
 0x22a   : > { %v2058_v32 = vpop.f32.mrb[35].mxu1  ;;  %v4237_v44 = vpack.c.bf16 %v3687_v27, %v3687_v27  ;;  %v3688_v55 = vmax.f32 %v3652_v5, 0.0  ;;  %v4756_v40 = vpop.f32.mrb[28].mxu0 }
 0x22b   : > { %3870 = vst.msk [vmem:[%s6021_s18 + $0x68] sm:$0xf] %vm3843_vm8, %v4239_v20  ;;  %v4240_v59 = vpack.c.bf16 %v3690_v21, %v3690_v21  ;;  %v4792_v15 = vadd.f32 %v4756_v40, %v4604_v38  ;;  %v3553_v39 = vpop.f32.mrb[29].mxu0 }
 0x22c   : > { %3868 = vst.msk [vmem:[%s6021_s18 + $0x60] sm:$0xf] %vm3843_vm8, %v4237_v44  ;;  %v4238_v29 = vpack.c.bf16 %v3688_v55, %v3688_v55  ;;  %v4793_v19 = vadd.f32 %v3553_v39, %v2039_v11  ;;  %v4757_v58 = vpop.f32.mrb[30].mxu0 }
 0x22d   : > { %3871 = vst.msk [vmem:[%s6021_s18 + $0x6c] sm:$0xf] %vm3843_vm8, %v4240_v59  ;;  %v3657_v36 = vadd.f32 %v4792_v15, %v6012_v49  ;;  %v4794_v3 = vadd.f32 %v4757_v58, %v4605_v12  ;;  %v3556_v43 = vpop.f32.mrb[31].mxu0 }
 0x22e   : > { %3869 = vst.msk [vmem:[%s6021_s18 + $0x64] sm:$0xf] %vm3843_vm8, %v4238_v29  ;;  %v3655_v8 = vadd.f32 %v4793_v19, %v6012_v49  ;;  %v4795_v33 = vadd.f32 %v3556_v43, %v2042_v54 }
 0x22f   : > { %v3693_v61 = vmax.f32 %v3657_v36, 0.0  ;;  %v3658_v1 = vadd.f32 %v4794_v3, %v6012_v49 }
 0x230   : > { %v3691_v51 = vmax.f32 %v3655_v8, 0.0  ;;  %v3656_v62 = vadd.f32 %v4795_v33, %v6012_v49 }
 0x231   : > { %v4243_v34 = vpack.c.bf16 %v3693_v61, %v3693_v61  ;;  %v3694_v16 = vmax.f32 %v3658_v1, 0.0 }
 0x232   : > { %v4241_v14 = vpack.c.bf16 %v3691_v51, %v3691_v51  ;;  %v3692_v63 = vmax.f32 %v3656_v62, 0.0  ;;  %v4760_v57 = vpop.f32.mrb[32].mxu0 }
 0x233   : > { %3874 = vst.msk [vmem:[%s6021_s18 + $0x78] sm:$0xf] %vm3843_vm8, %v4243_v34  ;;  %v4244_v9 = vpack.c.bf16 %v3694_v16, %v3694_v16  ;;  %v4796_v17 = vadd.f32 %v4760_v57, %v4608_v56  ;;  %v3569_v48 = vpop.f32.mrb[33].mxu0 }
 0x234   : > { %3872 = vst.msk [vmem:[%s6021_s18 + $0x70] sm:$0xf] %vm3843_vm8, %v4241_v14  ;;  %v4242_v60 = vpack.c.bf16 %v3692_v63, %v3692_v63  ;;  %v4797_v38 = vadd.f32 %v3569_v48, %v2055_v28  ;;  %v4761_v7 = vpop.f32.mrb[34].mxu0 }
 0x235   : > { %3875 = vst.msk [vmem:[%s6021_s18 + $0x7c] sm:$0xf] %vm3843_vm8, %v4244_v9  ;;  %v3661_v4 = vadd.f32 %v4796_v17, %v6012_v49  ;;  %v4798_v11 = vadd.f32 %v4761_v7, %v4609_v13  ;;  %v3572_v24 = vpop.f32.mrb[35].mxu0 }
 0x236   : > { %3873 = vst.msk [vmem:[%s6021_s18 + $0x74] sm:$0xf] %vm3843_vm8, %v4242_v60  ;;  %v3659_v6 = vadd.f32 %v4797_v38, %v6012_v49  ;;  %v4799_v12 = vadd.f32 %v3572_v24, %v2058_v32 }
 0x237   : > { %v3697_v30 = vmax.f32 %v3661_v4, 0.0  ;;  %v3662_v42 = vadd.f32 %v4798_v11, %v6012_v49 }
 0x238   : > { %v3695_v54 = vmax.f32 %v3659_v6, 0.0  ;;  %v3660_v46 = vadd.f32 %v4799_v12, %v6012_v49 }
 0x239   : > { %v4247_v50 = vpack.c.bf16 %v3697_v30, %v3697_v30  ;;  %v3698_v47 = vmax.f32 %v3662_v42, 0.0 }
 0x23a   : > { %v4245_v37 = vpack.c.bf16 %v3695_v54, %v3695_v54  ;;  %v3696_v18 = vmax.f32 %v3660_v46, 0.0 }
 0x23b   : > { %3878 = vst.msk [vmem:[%s6021_s18 + $0x88] sm:$0xf] %vm3843_vm8, %v4247_v50  ;;  %v4248_v52 = vpack.c.bf16 %v3698_v47, %v3698_v47 }
 0x23c   : > { %3876 = vst.msk [vmem:[%s6021_s18 + $0x80] sm:$0xf] %vm3843_vm8, %v4245_v37  ;;  %v4246_v0 = vpack.c.bf16 %v3696_v18, %v3696_v18 }
 0x23d   : > { %3879 = vst.msk [vmem:[%s6021_s18 + $0x8c] sm:$0xf] %vm3843_vm8, %v4248_v52 }
 0x23e   : > { %3877 = vst.msk [vmem:[%s6021_s18 + $0x84] sm:$0xf] %vm3843_vm8, %v4246_v0 }
 0x23f PF: > { %s13_s12 = sadd.s32 1, %s5151_s12  }
 0x240   : > { %p10_p4 = scmp.ge.s32.totalorder %s13_s12, 4  }
 0x242   :  { %12 = sbr.rel (!%p10_p4) target bundleno = 1 (0x1), region = 70 }

</bundles_post_ra>
